<compile_context>
chip_gen: v6e
topology: v6e:2x2x1
jax: 0.10.0
libtpu: 0.0.40
codegen_flags: <defaults>
</compile_context>

<pallas_src>
import functools

import jax
import jax.numpy as jnp
from jax import lax
from jax.experimental import pallas as pl
from jax.experimental.pallas import tpu as pltpu

LEAK = 0.2                     # LeakyReLU negative slope
BN_EPS = 1e-5                  # PyTorch BatchNorm2d default eps
OC_PAD = 128                   # lane-dense output width (pad out-channels to this multiple)
TM_MAX = 512                   # M-tile rows; fits v5e/v6e/v7x VMEM comfortably
VMEM_LIMIT = 32 * 1024 * 1024  # explicit scoped-VMEM cap, safe on all generations


def _round_up(x, m):
    return (x + m - 1) // m * m


# ----------------------------------------------------------------------------
# Pallas kernels
# ----------------------------------------------------------------------------
def _conv_bias_act_kernel(p_ref, w_ref, b_ref, o_ref, *, act):
    """One M-tile: (TM, K) @ (K, OCP) on the MXU, + bias, + activation."""
    y = jnp.dot(p_ref[...], w_ref[...], preferred_element_type=jnp.float32)
    y = y + b_ref[...]
    if act == "leaky":
        o_ref[...] = jnp.maximum(y, LEAK * y).astype(o_ref.dtype)
    elif act == "sigmoid":
        o_ref[...] = (1.0 / (1.0 + jnp.exp(-y))).astype(o_ref.dtype)   # EUP exp
    else:
        raise ValueError(act)


def _conv_bn_stats_kernel(p_ref, w_ref, g_ref, b_ref, y_ref, scale_ref, shift_ref,
                          *, m_true):
    """Pass 1 of a BN layer: matmul tile + running sum / sum-of-squares.

    scale_ref / shift_ref are grid-resident accumulators (same block every
    step).  They hold sum(y) / sum(y^2) during the sweep and are converted to
    the folded BN scale / shift on the last grid step.  Stats are computed on
    the f32 accumulator before the bf16 store, so they are exact.
    """
    i = pl.program_id(0)

    @pl.when(i == 0)
    def _init():
        scale_ref[...] = jnp.zeros_like(scale_ref)
        shift_ref[...] = jnp.zeros_like(shift_ref)

    y = jnp.dot(p_ref[...], w_ref[...], preferred_element_type=jnp.float32)
    y_ref[...] = y.astype(y_ref.dtype)
    scale_ref[...] += jnp.sum(y, axis=0, keepdims=True)        # running sum
    shift_ref[...] += jnp.sum(y * y, axis=0, keepdims=True)    # running sum of squares

    @pl.when(i == pl.num_programs(0) - 1)
    def _finalize():
        inv_m = 1.0 / m_true                                   # true M (padded rows are zeros)
        mean = scale_ref[...] * inv_m
        var = jnp.maximum(shift_ref[...] * inv_m - mean * mean, 0.0)
        rstd = lax.rsqrt(var + BN_EPS)
        sc = g_ref[...] * rstd                                 # gamma * rstd
        scale_ref[...] = sc
        shift_ref[...] = b_ref[...] - mean * sc                # beta - mean * gamma * rstd


def _bn_apply_kernel(y_ref, scale_ref, shift_ref, o_ref):
    """Pass 2 of a BN layer: y * scale + shift, then LeakyReLU(0.2)."""
    y = y_ref[...].astype(jnp.float32) * scale_ref[...] + shift_ref[...]
    o_ref[...] = jnp.maximum(y, LEAK * y).astype(o_ref.dtype)


# ----------------------------------------------------------------------------
# Glue: patch extraction (NHWC), zero-padded to a multiple of the M tile
# ----------------------------------------------------------------------------
def _extract_patches(x_nhwc, k, stride, pad):
    x_bf = x_nhwc if x_nhwc.dtype == jnp.bfloat16 else x_nhwc.astype(jnp.bfloat16)
    p = lax.conv_general_dilated_patches(
        x_bf, (k, k), (stride, stride), [(pad, pad), (pad, pad)],
        dimension_numbers=("NHWC", "HWIO", "NHWC"))            # (N, OH, OW, C*k*k), C-major
    n, oh, ow, kk = p.shape
    m = n * oh * ow
    p = p.reshape(m, kk)
    tm = min(TM_MAX, _round_up(m, 16))
    m_pad = _round_up(m, tm)
    if m_pad != m:
        p = jnp.pad(p, ((0, m_pad - m), (0, 0)))               # zero rows: harmless for stats
    return p, (n, oh, ow, m, m_pad, tm)


# ----------------------------------------------------------------------------
# Layer wrappers
# ----------------------------------------------------------------------------
def _conv_bias_act_layer(x_nhwc, L):
    p, (n, oh, ow, m, m_pad, tm) = _extract_patches(x_nhwc, L["k"], L["stride"], L["pad"])
    kk = p.shape[1]
    ocp = L["w"].shape[1]
    grid = (m_pad // tm,)

    out = pl.pallas_call(
        functools.partial(_conv_bias_act_kernel, act=L["act"]),
        grid=grid,
        in_specs=[
            pl.BlockSpec((tm, kk), lambda i: (i, 0)),
            pl.BlockSpec((kk, ocp), lambda i: (0, 0)),
            pl.BlockSpec((1, ocp), lambda i: (0, 0)),
        ],
        out_specs=pl.BlockSpec((tm, ocp), lambda i: (i, 0)),
        out_shape=jax.ShapeDtypeStruct((m_pad, ocp), L["out_dtype"]),
        compiler_params=pltpu.CompilerParams(
            dimension_semantics=("parallel",),
            vmem_limit_bytes=VMEM_LIMIT),
    )(p, L["w"], L["b"])

    return out[:m, :L["oc"]].reshape(n, oh, ow, L["oc"])


def _conv_bn_leaky_layer(x_nhwc, L):
    p, (n, oh, ow, m, m_pad, tm) = _extract_patches(x_nhwc, L["k"], L["stride"], L["pad"])
    kk = p.shape[1]
    ocp = L["w"].shape[1]
    grid = (m_pad // tm,)

    # Pass 1: matmul + global batch statistics (reduction over the M grid axis).
    y, scale, shift = pl.pallas_call(
        functools.partial(_conv_bn_stats_kernel, m_true=float(m)),
        grid=grid,
        in_specs=[
            pl.BlockSpec((tm, kk), lambda i: (i, 0)),
            pl.BlockSpec((kk, ocp), lambda i: (0, 0)),
            pl.BlockSpec((1, ocp), lambda i: (0, 0)),
            pl.BlockSpec((1, ocp), lambda i: (0, 0)),
        ],
        out_specs=(
            pl.BlockSpec((tm, ocp), lambda i: (i, 0)),
            pl.BlockSpec((1, ocp), lambda i: (0, 0)),
            pl.BlockSpec((1, ocp), lambda i: (0, 0)),
        ),
        out_shape=(
            jax.ShapeDtypeStruct((m_pad, ocp), jnp.bfloat16),
            jax.ShapeDtypeStruct((1, ocp), jnp.float32),
            jax.ShapeDtypeStruct((1, ocp), jnp.float32),
        ),
        compiler_params=pltpu.CompilerParams(
            dimension_semantics=("arbitrary",),
            vmem_limit_bytes=VMEM_LIMIT),
    )(p, L["w"], L["g"], L["b"])

    # Pass 2: folded BN (single FMA) + LeakyReLU, independent per M tile.
    out = pl.pallas_call(
        _bn_apply_kernel,
        grid=grid,
        in_specs=[
            pl.BlockSpec((tm, ocp), lambda i: (i, 0)),
            pl.BlockSpec((1, ocp), lambda i: (0, 0)),
            pl.BlockSpec((1, ocp), lambda i: (0, 0)),
        ],
        out_specs=pl.BlockSpec((tm, ocp), lambda i: (i, 0)),
        out_shape=jax.ShapeDtypeStruct((m_pad, ocp), jnp.bfloat16),
        compiler_params=pltpu.CompilerParams(
            dimension_semantics=("parallel",),
            vmem_limit_bytes=VMEM_LIMIT),
    )(y, scale, shift)

    return out[:m, :L["oc"]].reshape(n, oh, ow, L["oc"])


# ----------------------------------------------------------------------------
# Parameter init (deterministic, synthetic — mirrors nn.Module shapes)
# ----------------------------------------------------------------------------
def init_params(key, img_channels, features_d):
    fd = features_d
    ks = jax.random.split(key, 8)

    def conv_w(k, oc, ic):
        return jax.random.normal(k, (oc, ic, 4, 4), jnp.float32) * 0.05

    return {
        "c1_w": conv_w(ks[0], fd, img_channels),
        "c1_b": jax.random.normal(ks[1], (fd,), jnp.float32) * 0.05,
        "c2_w": conv_w(ks[2], 2 * fd, fd),
        "bn2_g": jnp.ones((2 * fd,), jnp.float32), "bn2_b": jnp.zeros((2 * fd,), jnp.float32),
        "c3_w": conv_w(ks[3], 4 * fd, 2 * fd),
        "bn3_g": jnp.ones((4 * fd,), jnp.float32), "bn3_b": jnp.zeros((4 * fd,), jnp.float32),
        "c4_w": conv_w(ks[4], 8 * fd, 4 * fd),
        "bn4_g": jnp.ones((8 * fd,), jnp.float32), "bn4_b": jnp.zeros((8 * fd,), jnp.float32),
        "c5_w": conv_w(ks[5], 1, 8 * fd),
        "c5_b": jax.random.normal(ks[6], (1,), jnp.float32) * 0.05,
    }


# ----------------------------------------------------------------------------
# One-time parameter prep (hoisted out of the forward path):
#   - weight (OC, IC, KH, KW) -> (K, OC) matrix, zero-padded to lane-dense OC,
#     cast to bf16 for the MXU.
#   - bias / gamma / beta -> (1, OC_pad) f32 rows.
# ----------------------------------------------------------------------------
def _prep_wmat(w_oihw):
    oc, ic, kh, kw = w_oihw.shape
    ocp = _round_up(oc, OC_PAD)
    wm = jnp.transpose(w_oihw.reshape(oc, ic * kh * kw))       # (K, OC), K is C-major
    wm = jnp.pad(wm, ((0, 0), (0, ocp - oc)))
    return wm.astype(jnp.bfloat16)


def _prep_row(v):
    v = v.reshape(1, -1).astype(jnp.float32)
    ocp = _round_up(v.shape[1], OC_PAD)
    return jnp.pad(v, ((0, 0), (0, ocp - v.shape[1])))


def prepare_params(params):
    layers = [dict(kind="bias_act", act="leaky", k=4, stride=2, pad=1,
                   oc=int(params["c1_w"].shape[0]), out_dtype=jnp.bfloat16,
                   w=_prep_wmat(params["c1_w"]), b=_prep_row(params["c1_b"]))]
    for i in (2, 3, 4):
        w = params[f"c{i}_w"]
        layers.append(dict(kind="bn_leaky", k=4, stride=2, pad=1,
                           oc=int(w.shape[0]), w=_prep_wmat(w),
                           g=_prep_row(params[f"bn{i}_g"]),
                           b=_prep_row(params[f"bn{i}_b"])))
    layers.append(dict(kind="bias_act", act="sigmoid", k=4, stride=2, pad=0,
                       oc=int(params["c5_w"].shape[0]), out_dtype=jnp.float32,
                       w=_prep_wmat(params["c5_w"]), b=_prep_row(params["c5_b"])))
    return layers


# ----------------------------------------------------------------------------
# Discriminator forward (Pallas)
# ----------------------------------------------------------------------------
def discriminator_forward(layers, x_nchw):
    x = jnp.transpose(x_nchw, (0, 2, 3, 1)).astype(jnp.float32)    # NCHW -> NHWC
    for L in layers:
        if L["kind"] == "bn_leaky":
            x = _conv_bn_leaky_layer(x, L)
        else:
            x = _conv_bias_act_layer(x, L)
    return jnp.transpose(x, (0, 3, 1, 2)).astype(jnp.float32)      # NHWC -> NCHW


# ----------------------------------------------------------------------------
# Pure-JAX reference (PyTorch semantics, f32) for correctness checking
# ----------------------------------------------------------------------------
def _ref_conv(x, w, b, stride, pad):
    y = lax.conv_general_dilated(x, w, (stride, stride), [(pad, pad), (pad, pad)],
                                 dimension_numbers=("NCHW", "OIHW", "NCHW"))
    if b is not None:
        y = y + b[None, :, None, None]
    return y


def _ref_bn_train(x, g, b):
    mean = jnp.mean(x, axis=(0, 2, 3), keepdims=True)
    var = jnp.mean((x - mean) ** 2, axis=(0, 2, 3), keepdims=True)
    return (x - mean) * lax.rsqrt(var + BN_EPS) * g[None, :, None, None] + b[None, :, None, None]


def _leaky(x):
    return jnp.where(x >= 0, x, LEAK * x)


def reference_forward(params, x):
    y = _leaky(_ref_conv(x, params["c1_w"], params["c1_b"], 2, 1))
    y = _leaky(_ref_bn_train(_ref_conv(y, params["c2_w"], None, 2, 1), params["bn2_g"], params["bn2_b"]))
    y = _leaky(_ref_bn_train(_ref_conv(y, params["c3_w"], None, 2, 1), params["bn3_g"], params["bn3_b"]))
    y = _leaky(_ref_bn_train(_ref_conv(y, params["c4_w"], None, 2, 1), params["bn4_g"], params["bn4_b"]))
    y = _ref_conv(y, params["c5_w"], params["c5_b"], 2, 0)
    return jax.nn.sigmoid(y)


# ----------------------------------------------------------------------------
if __name__ == "__main__":
    # 64x64 input is required so the final Conv2d(8fd, 1, k=4, s=2, p=0) lands
    # on a 4x4 map -> output (N, 1, 1, 1), matching the PyTorch module.
    batch, img_channels, features_d, hw = 2, 3, 8, 64

    key = jax.random.PRNGKey(0)
    k_params, k_x = jax.random.split(key)
    params = init_params(k_params, img_channels, features_d)
    layers = prepare_params(params)
    x = jax.random.normal(k_x, (batch, img_channels, hw, hw), jnp.float32)

    fwd = jax.jit(lambda xx: discriminator_forward(layers, xx))
    out = jax.block_until_ready(fwd(x))
    ref = jax.block_until_ready(reference_forward(params, x))

    assert out.shape == (batch, 1, 1, 1), out.shape
    err = float(jnp.max(jnp.abs(out - ref)))
    assert err < 5e-2, ("mismatch vs reference", err)

    print("KERNEL_OK")
</pallas_src>

<mosaic_0001>
module attributes {stable_mosaic.version = 11 : i64} {
  func.func @_conv_bias_act_kernel(%arg0: i32, %arg1: memref<512x48xbf16, #tpu.memory_space<vmem>>, %arg2: memref<48x128xbf16, #tpu.memory_space<vmem>>, %arg3: memref<1x128xf32, #tpu.memory_space<vmem>>, %arg4: memref<512x128xbf16, #tpu.memory_space<vmem>>) attributes {dimension_semantics = [#tpu.dimension_semantics<parallel>], iteration_bounds = array<i64: 4>, scalar_prefetch = 0 : i64, scratch_operands = 0 : i64, tpu.core_type = #tpu.core_type<tc>, window_params = [{transform_indices = @transform_0, window_bounds = array<i64: 512, 48>}, {pipeline_mode = #tpu.pipeline_mode<synchronous>, transform_indices = @transform_1, window_bounds = array<i64: 48, 128>}, {pipeline_mode = #tpu.pipeline_mode<synchronous>, transform_indices = @transform_2, window_bounds = array<i64: 1, 128>}, {transform_indices = @transform_3, window_bounds = array<i64: 512, 128>}]} {
    %c0 = arith.constant 0 : index
    %c0_0 = arith.constant 0 : index
    %0 = vector.load %arg1[%c0, %c0_0] : memref<512x48xbf16, #tpu.memory_space<vmem>>, vector<512x48xbf16>
    %c0_1 = arith.constant 0 : index
    %c0_2 = arith.constant 0 : index
    %1 = vector.load %arg2[%c0_1, %c0_2] : memref<48x128xbf16, #tpu.memory_space<vmem>>, vector<48x128xbf16>
    %cst = arith.constant dense<0.000000e+00> : vector<512x128xf32>
    %2 = tpu.matmul %0, %1, %cst {dimension_numbers = #tpu.dot_dimension_numbers<[1], [0], [0], [1], [0, 0, 1, 1], [], []>} : vector<512x48xbf16>, vector<48x128xbf16>, vector<512x128xf32> -> vector<512x128xf32>
    %c0_3 = arith.constant 0 : index
    %c0_4 = arith.constant 0 : index
    %3 = vector.load %arg3[%c0_3, %c0_4] : memref<1x128xf32, #tpu.memory_space<vmem>>, vector<1x128xf32>
    %4 = vector.broadcast %3 : vector<1x128xf32> to vector<512x128xf32>
    %5 = arith.addf %2, %4 : vector<512x128xf32>
    %cst_5 = arith.constant 2.000000e-01 : f32
    %6 = vector.broadcast %cst_5 : f32 to vector<512x128xf32>
    %7 = arith.mulf %6, %5 : vector<512x128xf32>
    %8 = arith.maximumf %5, %7 : vector<512x128xf32>
    %9 = arith.truncf %8 : vector<512x128xf32> to vector<512x128xbf16>
    %c0_6 = arith.constant 0 : index
    %c0_7 = arith.constant 0 : index
    %10 = vector.load %arg4[%c0_6, %c0_7] : memref<512x128xbf16, #tpu.memory_space<vmem>>, vector<512x128xbf16>
    tpu.vector_store %arg4[%c0_6, %c0_7], %9 {strides = array<i32>} : memref<512x128xbf16, #tpu.memory_space<vmem>>, vector<512x128xbf16>,
    return
  }
  func.func @transform_0(%arg0: i32) -> (i32, i32) {
    %c0_i32 = arith.constant 0 : i32
    %c0_i32_0 = arith.constant 0 : i32
    return %arg0, %c0_i32 : i32, i32
  }
  func.func @transform_1(%arg0: i32) -> (i32, i32) {
    %c0_i32 = arith.constant 0 : i32
    %c0_i32_0 = arith.constant 0 : i32
    %c0_i32_1 = arith.constant 0 : i32
    return %c0_i32, %c0_i32_0 : i32, i32
  }
  func.func @transform_2(%arg0: i32) -> (i32, i32) {
    %c0_i32 = arith.constant 0 : i32
    %c0_i32_0 = arith.constant 0 : i32
    %c0_i32_1 = arith.constant 0 : i32
    return %c0_i32, %c0_i32_0 : i32, i32
  }
  func.func @transform_3(%arg0: i32) -> (i32, i32) {
    %c0_i32 = arith.constant 0 : i32
    %c0_i32_0 = arith.constant 0 : i32
    return %arg0, %c0_i32 : i32, i32
  }
}

module attributes {stable_mosaic.version = 11 : i64} {
  func.func @_conv_bn_stats_kernel(%arg0: i32, %arg1: memref<512x128xbf16, #tpu.memory_space<vmem>>, %arg2: memref<128x128xbf16, #tpu.memory_space<vmem>>, %arg3: memref<1x128xf32, #tpu.memory_space<vmem>>, %arg4: memref<1x128xf32, #tpu.memory_space<vmem>>, %arg5: memref<512x128xbf16, #tpu.memory_space<vmem>>, %arg6: memref<1x128xf32, #tpu.memory_space<vmem>>, %arg7: memref<1x128xf32, #tpu.memory_space<vmem>>) attributes {dimension_semantics = [#tpu.dimension_semantics<arbitrary>], iteration_bounds = array<i64: 1>, scalar_prefetch = 0 : i64, scratch_operands = 0 : i64, tpu.core_type = #tpu.core_type<tc>, window_params = [{transform_indices = @transform_0, window_bounds = array<i64: 512, 128>}, {pipeline_mode = #tpu.pipeline_mode<synchronous>, transform_indices = @transform_1, window_bounds = array<i64: 128, 128>}, {pipeline_mode = #tpu.pipeline_mode<synchronous>, transform_indices = @transform_2, window_bounds = array<i64: 1, 128>}, {pipeline_mode = #tpu.pipeline_mode<synchronous>, transform_indices = @transform_3, window_bounds = array<i64: 1, 128>}, {transform_indices = @transform_4, window_bounds = array<i64: 512, 128>}, {pipeline_mode = #tpu.pipeline_mode<synchronous>, transform_indices = @transform_5, window_bounds = array<i64: 1, 128>}, {pipeline_mode = #tpu.pipeline_mode<synchronous>, transform_indices = @transform_6, window_bounds = array<i64: 1, 128>}]} {
    %c0_i32 = arith.constant 0 : i32
    %0 = arith.cmpi eq, %arg0, %c0_i32 : i32
    %1 = arith.extui %0 : i1 to i32
    %c0_i32_0 = arith.constant 0 : i32
    %2 = arith.cmpi ne, %1, %c0_i32_0 : i32
    scf.if %2 {
      %cst_18 = arith.constant 0.000000e+00 : f32
      %22 = vector.broadcast %cst_18 : f32 to vector<1x128xf32>
      %c0_19 = arith.constant 0 : index
      %c0_20 = arith.constant 0 : index
      %23 = vector.load %arg6[%c0_19, %c0_20] : memref<1x128xf32, #tpu.memory_space<vmem>>, vector<1x128xf32>
      tpu.vector_store %arg6[%c0_19, %c0_20], %22 {strides = array<i32>} : memref<1x128xf32, #tpu.memory_space<vmem>>, vector<1x128xf32>,
      %cst_21 = arith.constant 0.000000e+00 : f32
      %24 = vector.broadcast %cst_21 : f32 to vector<1x128xf32>
      %c0_22 = arith.constant 0 : index
      %c0_23 = arith.constant 0 : index
      %25 = vector.load %arg7[%c0_22, %c0_23] : memref<1x128xf32, #tpu.memory_space<vmem>>, vector<1x128xf32>
      tpu.vector_store %arg7[%c0_22, %c0_23], %24 {strides = array<i32>} : memref<1x128xf32, #tpu.memory_space<vmem>>, vector<1x128xf32>,
    } else {
    }
    %c0 = arith.constant 0 : index
    %c0_1 = arith.constant 0 : index
    %3 = vector.load %arg1[%c0, %c0_1] : memref<512x128xbf16, #tpu.memory_space<vmem>>, vector<512x128xbf16>
    %c0_2 = arith.constant 0 : index
    %c0_3 = arith.constant 0 : index
    %4 = vector.load %arg2[%c0_2, %c0_3] : memref<128x128xbf16, #tpu.memory_space<vmem>>, vector<128x128xbf16>
    %cst = arith.constant dense<0.000000e+00> : vector<512x128xf32>
    %5 = tpu.matmul %3, %4, %cst {dimension_numbers = #tpu.dot_dimension_numbers<[1], [0], [0], [1], [0, 0, 1, 1], [], []>} : vector<512x128xbf16>, vector<128x128xbf16>, vector<512x128xf32> -> vector<512x128xf32>
    %6 = arith.truncf %5 : vector<512x128xf32> to vector<512x128xbf16>
    %c0_4 = arith.constant 0 : index
    %c0_5 = arith.constant 0 : index
    %7 = vector.load %arg5[%c0_4, %c0_5] : memref<512x128xbf16, #tpu.memory_space<vmem>>, vector<512x128xbf16>
    tpu.vector_store %arg5[%c0_4, %c0_5], %6 {strides = array<i32>} : memref<512x128xbf16, #tpu.memory_space<vmem>>, vector<512x128xbf16>,
    %c0_6 = arith.constant 0 : index
    %c0_7 = arith.constant 0 : index
    %8 = vector.load %arg6[%c0_6, %c0_7] : memref<1x128xf32, #tpu.memory_space<vmem>>, vector<1x128xf32>
    %cst_8 = arith.constant dense<0.000000e+00> : vector<128xf32>
    %9 = vector.multi_reduction <add>, %5, %cst_8 [0] : vector<512x128xf32> to vector<128xf32>
    %10 = vector.shape_cast %9 : vector<128xf32> to vector<1x128xf32>
    %11 = arith.addf %8, %10 : vector<1x128xf32>
    %c0_9 = arith.constant 0 : index
    %c0_10 = arith.constant 0 : index
    %12 = vector.load %arg6[%c0_9, %c0_10] : memref<1x128xf32, #tpu.memory_space<vmem>>, vector<1x128xf32>
    tpu.vector_store %arg6[%c0_9, %c0_10], %11 {strides = array<i32>} : memref<1x128xf32, #tpu.memory_space<vmem>>, vector<1x128xf32>,
    %c0_11 = arith.constant 0 : index
    %c0_12 = arith.constant 0 : index
    %13 = vector.load %arg7[%c0_11, %c0_12] : memref<1x128xf32, #tpu.memory_space<vmem>>, vector<1x128xf32>
    %14 = arith.mulf %5, %5 : vector<512x128xf32>
    %cst_13 = arith.constant dense<0.000000e+00> : vector<128xf32>
    %15 = vector.multi_reduction <add>, %14, %cst_13 [0] : vector<512x128xf32> to vector<128xf32>
    %16 = vector.shape_cast %15 : vector<128xf32> to vector<1x128xf32>
    %17 = arith.addf %13, %16 : vector<1x128xf32>
    %c0_14 = arith.constant 0 : index
    %c0_15 = arith.constant 0 : index
    %18 = vector.load %arg7[%c0_14, %c0_15] : memref<1x128xf32, #tpu.memory_space<vmem>>, vector<1x128xf32>
    tpu.vector_store %arg7[%c0_14, %c0_15], %17 {strides = array<i32>} : memref<1x128xf32, #tpu.memory_space<vmem>>, vector<1x128xf32>,
    %c0_i32_16 = arith.constant 0 : i32
    %19 = arith.cmpi eq, %arg0, %c0_i32_16 : i32
    %20 = arith.extui %19 : i1 to i32
    %c0_i32_17 = arith.constant 0 : i32
    %21 = arith.cmpi ne, %20, %c0_i32_17 : i32
    scf.if %21 {
      %c0_18 = arith.constant 0 : index
      %c0_19 = arith.constant 0 : index
      %22 = vector.load %arg6[%c0_18, %c0_19] : memref<1x128xf32, #tpu.memory_space<vmem>>, vector<1x128xf32>
      %cst_20 = arith.constant 0.001953125 : f32
      %23 = vector.broadcast %cst_20 : f32 to vector<1x128xf32>
      %24 = arith.mulf %22, %23 : vector<1x128xf32>
      %c0_21 = arith.constant 0 : index
      %c0_22 = arith.constant 0 : index
      %25 = vector.load %arg7[%c0_21, %c0_22] : memref<1x128xf32, #tpu.memory_space<vmem>>, vector<1x128xf32>
      %cst_23 = arith.constant 0.001953125 : f32
      %26 = vector.broadcast %cst_23 : f32 to vector<1x128xf32>
      %27 = arith.mulf %25, %26 : vector<1x128xf32>
      %28 = arith.mulf %24, %24 : vector<1x128xf32>
      %29 = arith.subf %27, %28 : vector<1x128xf32>
      %cst_24 = arith.constant 0.000000e+00 : f32
      %30 = vector.broadcast %cst_24 : f32 to vector<1x128xf32>
      %31 = arith.maximumf %29, %30 : vector<1x128xf32>
      %cst_25 = arith.constant 9.99999974E-6 : f32
      %32 = vector.broadcast %cst_25 : f32 to vector<1x128xf32>
      %33 = arith.addf %31, %32 : vector<1x128xf32>
      %34 = math.rsqrt %33 : vector<1x128xf32>
      %c0_26 = arith.constant 0 : index
      %c0_27 = arith.constant 0 : index
      %35 = vector.load %arg3[%c0_26, %c0_27] : memref<1x128xf32, #tpu.memory_space<vmem>>, vector<1x128xf32>
      %36 = arith.mulf %35, %34 : vector<1x128xf32>
      %c0_28 = arith.constant 0 : index
      %c0_29 = arith.constant 0 : index
      %37 = vector.load %arg6[%c0_28, %c0_29] : memref<1x128xf32, #tpu.memory_space<vmem>>, vector<1x128xf32>
      tpu.vector_store %arg6[%c0_28, %c0_29], %36 {strides = array<i32>} : memref<1x128xf32, #tpu.memory_space<vmem>>, vector<1x128xf32>,
      %c0_30 = arith.constant 0 : index
      %c0_31 = arith.constant 0 : index
      %38 = vector.load %arg4[%c0_30, %c0_31] : memref<1x128xf32, #tpu.memory_space<vmem>>, vector<1x128xf32>
      %39 = arith.mulf %24, %36 : vector<1x128xf32>
      %40 = arith.subf %38, %39 : vector<1x128xf32>
      %c0_32 = arith.constant 0 : index
      %c0_33 = arith.constant 0 : index
      %41 = vector.load %arg7[%c0_32, %c0_33] : memref<1x128xf32, #tpu.memory_space<vmem>>, vector<1x128xf32>
      tpu.vector_store %arg7[%c0_32, %c0_33], %40 {strides = array<i32>} : memref<1x128xf32, #tpu.memory_space<vmem>>, vector<1x128xf32>,
    } else {
    }
    return
  }
  func.func @transform_0(%arg0: i32) -> (i32, i32) {
    %c0_i32 = arith.constant 0 : i32
    %c0_i32_0 = arith.constant 0 : i32
    return %arg0, %c0_i32 : i32, i32
  }
  func.func @transform_1(%arg0: i32) -> (i32, i32) {
    %c0_i32 = arith.constant 0 : i32
    %c0_i32_0 = arith.constant 0 : i32
    %c0_i32_1 = arith.constant 0 : i32
    return %c0_i32, %c0_i32_0 : i32, i32
  }
  func.func @transform_2(%arg0: i32) -> (i32, i32) {
    %c0_i32 = arith.constant 0 : i32
    %c0_i32_0 = arith.constant 0 : i32
    %c0_i32_1 = arith.constant 0 : i32
    return %c0_i32, %c0_i32_0 : i32, i32
  }
  func.func @transform_3(%arg0: i32) -> (i32, i32) {
    %c0_i32 = arith.constant 0 : i32
    %c0_i32_0 = arith.constant 0 : i32
    %c0_i32_1 = arith.constant 0 : i32
    return %c0_i32, %c0_i32_0 : i32, i32
  }
  func.func @transform_4(%arg0: i32) -> (i32, i32) {
    %c0_i32 = arith.constant 0 : i32
    %c0_i32_0 = arith.constant 0 : i32
    return %arg0, %c0_i32 : i32, i32
  }
  func.func @transform_5(%arg0: i32) -> (i32, i32) {
    %c0_i32 = arith.constant 0 : i32
    %c0_i32_0 = arith.constant 0 : i32
    %c0_i32_1 = arith.constant 0 : i32
    return %c0_i32, %c0_i32_0 : i32, i32
  }
  func.func @transform_6(%arg0: i32) -> (i32, i32) {
    %c0_i32 = arith.constant 0 : i32
    %c0_i32_0 = arith.constant 0 : i32
    %c0_i32_1 = arith.constant 0 : i32
    return %c0_i32, %c0_i32_0 : i32, i32
  }
}

module attributes {stable_mosaic.version = 11 : i64} {
  func.func @_bn_apply_kernel(%arg0: i32, %arg1: memref<512x128xbf16, #tpu.memory_space<vmem>>, %arg2: memref<1x128xf32, #tpu.memory_space<vmem>>, %arg3: memref<1x128xf32, #tpu.memory_space<vmem>>, %arg4: memref<512x128xbf16, #tpu.memory_space<vmem>>) attributes {dimension_semantics = [#tpu.dimension_semantics<parallel>], iteration_bounds = array<i64: 1>, scalar_prefetch = 0 : i64, scratch_operands = 0 : i64, tpu.core_type = #tpu.core_type<tc>, window_params = [{transform_indices = @transform_0, window_bounds = array<i64: 512, 128>}, {pipeline_mode = #tpu.pipeline_mode<synchronous>, transform_indices = @transform_1, window_bounds = array<i64: 1, 128>}, {pipeline_mode = #tpu.pipeline_mode<synchronous>, transform_indices = @transform_2, window_bounds = array<i64: 1, 128>}, {transform_indices = @transform_3, window_bounds = array<i64: 512, 128>}]} {
    %c0 = arith.constant 0 : index
    %c0_0 = arith.constant 0 : index
    %0 = vector.load %arg1[%c0, %c0_0] : memref<512x128xbf16, #tpu.memory_space<vmem>>, vector<512x128xbf16>
    %1 = arith.extf %0 : vector<512x128xbf16> to vector<512x128xf32>
    %c0_1 = arith.constant 0 : index
    %c0_2 = arith.constant 0 : index
    %2 = vector.load %arg2[%c0_1, %c0_2] : memref<1x128xf32, #tpu.memory_space<vmem>>, vector<1x128xf32>
    %3 = vector.broadcast %2 : vector<1x128xf32> to vector<512x128xf32>
    %4 = arith.mulf %1, %3 : vector<512x128xf32>
    %c0_3 = arith.constant 0 : index
    %c0_4 = arith.constant 0 : index
    %5 = vector.load %arg3[%c0_3, %c0_4] : memref<1x128xf32, #tpu.memory_space<vmem>>, vector<1x128xf32>
    %6 = vector.broadcast %5 : vector<1x128xf32> to vector<512x128xf32>
    %7 = arith.addf %4, %6 : vector<512x128xf32>
    %cst = arith.constant 2.000000e-01 : f32
    %8 = vector.broadcast %cst : f32 to vector<512x128xf32>
    %9 = arith.mulf %8, %7 : vector<512x128xf32>
    %10 = arith.maximumf %7, %9 : vector<512x128xf32>
    %11 = arith.truncf %10 : vector<512x128xf32> to vector<512x128xbf16>
    %c0_5 = arith.constant 0 : index
    %c0_6 = arith.constant 0 : index
    %12 = vector.load %arg4[%c0_5, %c0_6] : memref<512x128xbf16, #tpu.memory_space<vmem>>, vector<512x128xbf16>
    tpu.vector_store %arg4[%c0_5, %c0_6], %11 {strides = array<i32>} : memref<512x128xbf16, #tpu.memory_space<vmem>>, vector<512x128xbf16>,
    return
  }
  func.func @transform_0(%arg0: i32) -> (i32, i32) {
    %c0_i32 = arith.constant 0 : i32
    %c0_i32_0 = arith.constant 0 : i32
    return %arg0, %c0_i32 : i32, i32
  }
  func.func @transform_1(%arg0: i32) -> (i32, i32) {
    %c0_i32 = arith.constant 0 : i32
    %c0_i32_0 = arith.constant 0 : i32
    %c0_i32_1 = arith.constant 0 : i32
    return %c0_i32, %c0_i32_0 : i32, i32
  }
  func.func @transform_2(%arg0: i32) -> (i32, i32) {
    %c0_i32 = arith.constant 0 : i32
    %c0_i32_0 = arith.constant 0 : i32
    %c0_i32_1 = arith.constant 0 : i32
    return %c0_i32, %c0_i32_0 : i32, i32
  }
  func.func @transform_3(%arg0: i32) -> (i32, i32) {
    %c0_i32 = arith.constant 0 : i32
    %c0_i32_0 = arith.constant 0 : i32
    return %arg0, %c0_i32 : i32, i32
  }
}

module attributes {stable_mosaic.version = 11 : i64} {
  func.func @_conv_bn_stats_kernel(%arg0: i32, %arg1: memref<128x256xbf16, #tpu.memory_space<vmem>>, %arg2: memref<256x128xbf16, #tpu.memory_space<vmem>>, %arg3: memref<1x128xf32, #tpu.memory_space<vmem>>, %arg4: memref<1x128xf32, #tpu.memory_space<vmem>>, %arg5: memref<128x128xbf16, #tpu.memory_space<vmem>>, %arg6: memref<1x128xf32, #tpu.memory_space<vmem>>, %arg7: memref<1x128xf32, #tpu.memory_space<vmem>>) attributes {dimension_semantics = [#tpu.dimension_semantics<arbitrary>], iteration_bounds = array<i64: 1>, scalar_prefetch = 0 : i64, scratch_operands = 0 : i64, tpu.core_type = #tpu.core_type<tc>, window_params = [{transform_indices = @transform_0, window_bounds = array<i64: 128, 256>}, {pipeline_mode = #tpu.pipeline_mode<synchronous>, transform_indices = @transform_1, window_bounds = array<i64: 256, 128>}, {pipeline_mode = #tpu.pipeline_mode<synchronous>, transform_indices = @transform_2, window_bounds = array<i64: 1, 128>}, {pipeline_mode = #tpu.pipeline_mode<synchronous>, transform_indices = @transform_3, window_bounds = array<i64: 1, 128>}, {transform_indices = @transform_4, window_bounds = array<i64: 128, 128>}, {pipeline_mode = #tpu.pipeline_mode<synchronous>, transform_indices = @transform_5, window_bounds = array<i64: 1, 128>}, {pipeline_mode = #tpu.pipeline_mode<synchronous>, transform_indices = @transform_6, window_bounds = array<i64: 1, 128>}]} {
    %c0_i32 = arith.constant 0 : i32
    %0 = arith.cmpi eq, %arg0, %c0_i32 : i32
    %1 = arith.extui %0 : i1 to i32
    %c0_i32_0 = arith.constant 0 : i32
    %2 = arith.cmpi ne, %1, %c0_i32_0 : i32
    scf.if %2 {
      %cst_18 = arith.constant 0.000000e+00 : f32
      %22 = vector.broadcast %cst_18 : f32 to vector<1x128xf32>
      %c0_19 = arith.constant 0 : index
      %c0_20 = arith.constant 0 : index
      %23 = vector.load %arg6[%c0_19, %c0_20] : memref<1x128xf32, #tpu.memory_space<vmem>>, vector<1x128xf32>
      tpu.vector_store %arg6[%c0_19, %c0_20], %22 {strides = array<i32>} : memref<1x128xf32, #tpu.memory_space<vmem>>, vector<1x128xf32>,
      %cst_21 = arith.constant 0.000000e+00 : f32
      %24 = vector.broadcast %cst_21 : f32 to vector<1x128xf32>
      %c0_22 = arith.constant 0 : index
      %c0_23 = arith.constant 0 : index
      %25 = vector.load %arg7[%c0_22, %c0_23] : memref<1x128xf32, #tpu.memory_space<vmem>>, vector<1x128xf32>
      tpu.vector_store %arg7[%c0_22, %c0_23], %24 {strides = array<i32>} : memref<1x128xf32, #tpu.memory_space<vmem>>, vector<1x128xf32>,
    } else {
    }
    %c0 = arith.constant 0 : index
    %c0_1 = arith.constant 0 : index
    %3 = vector.load %arg1[%c0, %c0_1] : memref<128x256xbf16, #tpu.memory_space<vmem>>, vector<128x256xbf16>
    %c0_2 = arith.constant 0 : index
    %c0_3 = arith.constant 0 : index
    %4 = vector.load %arg2[%c0_2, %c0_3] : memref<256x128xbf16, #tpu.memory_space<vmem>>, vector<256x128xbf16>
    %cst = arith.constant dense<0.000000e+00> : vector<128x128xf32>
    %5 = tpu.matmul %3, %4, %cst {dimension_numbers = #tpu.dot_dimension_numbers<[1], [0], [0], [1], [0, 0, 1, 1], [], []>} : vector<128x256xbf16>, vector<256x128xbf16>, vector<128x128xf32> -> vector<128x128xf32>
    %6 = arith.truncf %5 : vector<128x128xf32> to vector<128x128xbf16>
    %c0_4 = arith.constant 0 : index
    %c0_5 = arith.constant 0 : index
    %7 = vector.load %arg5[%c0_4, %c0_5] : memref<128x128xbf16, #tpu.memory_space<vmem>>, vector<128x128xbf16>
    tpu.vector_store %arg5[%c0_4, %c0_5], %6 {strides = array<i32>} : memref<128x128xbf16, #tpu.memory_space<vmem>>, vector<128x128xbf16>,
    %c0_6 = arith.constant 0 : index
    %c0_7 = arith.constant 0 : index
    %8 = vector.load %arg6[%c0_6, %c0_7] : memref<1x128xf32, #tpu.memory_space<vmem>>, vector<1x128xf32>
    %cst_8 = arith.constant dense<0.000000e+00> : vector<128xf32>
    %9 = vector.multi_reduction <add>, %5, %cst_8 [0] : vector<128x128xf32> to vector<128xf32>
    %10 = vector.shape_cast %9 : vector<128xf32> to vector<1x128xf32>
    %11 = arith.addf %8, %10 : vector<1x128xf32>
    %c0_9 = arith.constant 0 : index
    %c0_10 = arith.constant 0 : index
    %12 = vector.load %arg6[%c0_9, %c0_10] : memref<1x128xf32, #tpu.memory_space<vmem>>, vector<1x128xf32>
    tpu.vector_store %arg6[%c0_9, %c0_10], %11 {strides = array<i32>} : memref<1x128xf32, #tpu.memory_space<vmem>>, vector<1x128xf32>,
    %c0_11 = arith.constant 0 : index
    %c0_12 = arith.constant 0 : index
    %13 = vector.load %arg7[%c0_11, %c0_12] : memref<1x128xf32, #tpu.memory_space<vmem>>, vector<1x128xf32>
    %14 = arith.mulf %5, %5 : vector<128x128xf32>
    %cst_13 = arith.constant dense<0.000000e+00> : vector<128xf32>
    %15 = vector.multi_reduction <add>, %14, %cst_13 [0] : vector<128x128xf32> to vector<128xf32>
    %16 = vector.shape_cast %15 : vector<128xf32> to vector<1x128xf32>
    %17 = arith.addf %13, %16 : vector<1x128xf32>
    %c0_14 = arith.constant 0 : index
    %c0_15 = arith.constant 0 : index
    %18 = vector.load %arg7[%c0_14, %c0_15] : memref<1x128xf32, #tpu.memory_space<vmem>>, vector<1x128xf32>
    tpu.vector_store %arg7[%c0_14, %c0_15], %17 {strides = array<i32>} : memref<1x128xf32, #tpu.memory_space<vmem>>, vector<1x128xf32>,
    %c0_i32_16 = arith.constant 0 : i32
    %19 = arith.cmpi eq, %arg0, %c0_i32_16 : i32
    %20 = arith.extui %19 : i1 to i32
    %c0_i32_17 = arith.constant 0 : i32
    %21 = arith.cmpi ne, %20, %c0_i32_17 : i32
    scf.if %21 {
      %c0_18 = arith.constant 0 : index
      %c0_19 = arith.constant 0 : index
      %22 = vector.load %arg6[%c0_18, %c0_19] : memref<1x128xf32, #tpu.memory_space<vmem>>, vector<1x128xf32>
      %cst_20 = arith.constant 7.812500e-03 : f32
      %23 = vector.broadcast %cst_20 : f32 to vector<1x128xf32>
      %24 = arith.mulf %22, %23 : vector<1x128xf32>
      %c0_21 = arith.constant 0 : index
      %c0_22 = arith.constant 0 : index
      %25 = vector.load %arg7[%c0_21, %c0_22] : memref<1x128xf32, #tpu.memory_space<vmem>>, vector<1x128xf32>
      %cst_23 = arith.constant 7.812500e-03 : f32
      %26 = vector.broadcast %cst_23 : f32 to vector<1x128xf32>
      %27 = arith.mulf %25, %26 : vector<1x128xf32>
      %28 = arith.mulf %24, %24 : vector<1x128xf32>
      %29 = arith.subf %27, %28 : vector<1x128xf32>
      %cst_24 = arith.constant 0.000000e+00 : f32
      %30 = vector.broadcast %cst_24 : f32 to vector<1x128xf32>
      %31 = arith.maximumf %29, %30 : vector<1x128xf32>
      %cst_25 = arith.constant 9.99999974E-6 : f32
      %32 = vector.broadcast %cst_25 : f32 to vector<1x128xf32>
      %33 = arith.addf %31, %32 : vector<1x128xf32>
      %34 = math.rsqrt %33 : vector<1x128xf32>
      %c0_26 = arith.constant 0 : index
      %c0_27 = arith.constant 0 : index
      %35 = vector.load %arg3[%c0_26, %c0_27] : memref<1x128xf32, #tpu.memory_space<vmem>>, vector<1x128xf32>
      %36 = arith.mulf %35, %34 : vector<1x128xf32>
      %c0_28 = arith.constant 0 : index
      %c0_29 = arith.constant 0 : index
      %37 = vector.load %arg6[%c0_28, %c0_29] : memref<1x128xf32, #tpu.memory_space<vmem>>, vector<1x128xf32>
      tpu.vector_store %arg6[%c0_28, %c0_29], %36 {strides = array<i32>} : memref<1x128xf32, #tpu.memory_space<vmem>>, vector<1x128xf32>,
      %c0_30 = arith.constant 0 : index
      %c0_31 = arith.constant 0 : index
      %38 = vector.load %arg4[%c0_30, %c0_31] : memref<1x128xf32, #tpu.memory_space<vmem>>, vector<1x128xf32>
      %39 = arith.mulf %24, %36 : vector<1x128xf32>
      %40 = arith.subf %38, %39 : vector<1x128xf32>
      %c0_32 = arith.constant 0 : index
      %c0_33 = arith.constant 0 : index
      %41 = vector.load %arg7[%c0_32, %c0_33] : memref<1x128xf32, #tpu.memory_space<vmem>>, vector<1x128xf32>
      tpu.vector_store %arg7[%c0_32, %c0_33], %40 {strides = array<i32>} : memref<1x128xf32, #tpu.memory_space<vmem>>, vector<1x128xf32>,
    } else {
    }
    return
  }
  func.func @transform_0(%arg0: i32) -> (i32, i32) {
    %c0_i32 = arith.constant 0 : i32
    %c0_i32_0 = arith.constant 0 : i32
    return %arg0, %c0_i32 : i32, i32
  }
  func.func @transform_1(%arg0: i32) -> (i32, i32) {
    %c0_i32 = arith.constant 0 : i32
    %c0_i32_0 = arith.constant 0 : i32
    %c0_i32_1 = arith.constant 0 : i32
    return %c0_i32, %c0_i32_0 : i32, i32
  }
  func.func @transform_2(%arg0: i32) -> (i32, i32) {
    %c0_i32 = arith.constant 0 : i32
    %c0_i32_0 = arith.constant 0 : i32
    %c0_i32_1 = arith.constant 0 : i32
    return %c0_i32, %c0_i32_0 : i32, i32
  }
  func.func @transform_3(%arg0: i32) -> (i32, i32) {
    %c0_i32 = arith.constant 0 : i32
    %c0_i32_0 = arith.constant 0 : i32
    %c0_i32_1 = arith.constant 0 : i32
    return %c0_i32, %c0_i32_0 : i32, i32
  }
  func.func @transform_4(%arg0: i32) -> (i32, i32) {
    %c0_i32 = arith.constant 0 : i32
    %c0_i32_0 = arith.constant 0 : i32
    return %arg0, %c0_i32 : i32, i32
  }
  func.func @transform_5(%arg0: i32) -> (i32, i32) {
    %c0_i32 = arith.constant 0 : i32
    %c0_i32_0 = arith.constant 0 : i32
    %c0_i32_1 = arith.constant 0 : i32
    return %c0_i32, %c0_i32_0 : i32, i32
  }
  func.func @transform_6(%arg0: i32) -> (i32, i32) {
    %c0_i32 = arith.constant 0 : i32
    %c0_i32_0 = arith.constant 0 : i32
    %c0_i32_1 = arith.constant 0 : i32
    return %c0_i32, %c0_i32_0 : i32, i32
  }
}

module attributes {stable_mosaic.version = 11 : i64} {
  func.func @_bn_apply_kernel(%arg0: i32, %arg1: memref<128x128xbf16, #tpu.memory_space<vmem>>, %arg2: memref<1x128xf32, #tpu.memory_space<vmem>>, %arg3: memref<1x128xf32, #tpu.memory_space<vmem>>, %arg4: memref<128x128xbf16, #tpu.memory_space<vmem>>) attributes {dimension_semantics = [#tpu.dimension_semantics<parallel>], iteration_bounds = array<i64: 1>, scalar_prefetch = 0 : i64, scratch_operands = 0 : i64, tpu.core_type = #tpu.core_type<tc>, window_params = [{transform_indices = @transform_0, window_bounds = array<i64: 128, 128>}, {pipeline_mode = #tpu.pipeline_mode<synchronous>, transform_indices = @transform_1, window_bounds = array<i64: 1, 128>}, {pipeline_mode = #tpu.pipeline_mode<synchronous>, transform_indices = @transform_2, window_bounds = array<i64: 1, 128>}, {transform_indices = @transform_3, window_bounds = array<i64: 128, 128>}]} {
    %c0 = arith.constant 0 : index
    %c0_0 = arith.constant 0 : index
    %0 = vector.load %arg1[%c0, %c0_0] : memref<128x128xbf16, #tpu.memory_space<vmem>>, vector<128x128xbf16>
    %1 = arith.extf %0 : vector<128x128xbf16> to vector<128x128xf32>
    %c0_1 = arith.constant 0 : index
    %c0_2 = arith.constant 0 : index
    %2 = vector.load %arg2[%c0_1, %c0_2] : memref<1x128xf32, #tpu.memory_space<vmem>>, vector<1x128xf32>
    %3 = vector.broadcast %2 : vector<1x128xf32> to vector<128x128xf32>
    %4 = arith.mulf %1, %3 : vector<128x128xf32>
    %c0_3 = arith.constant 0 : index
    %c0_4 = arith.constant 0 : index
    %5 = vector.load %arg3[%c0_3, %c0_4] : memref<1x128xf32, #tpu.memory_space<vmem>>, vector<1x128xf32>
    %6 = vector.broadcast %5 : vector<1x128xf32> to vector<128x128xf32>
    %7 = arith.addf %4, %6 : vector<128x128xf32>
    %cst = arith.constant 2.000000e-01 : f32
    %8 = vector.broadcast %cst : f32 to vector<128x128xf32>
    %9 = arith.mulf %8, %7 : vector<128x128xf32>
    %10 = arith.maximumf %7, %9 : vector<128x128xf32>
    %11 = arith.truncf %10 : vector<128x128xf32> to vector<128x128xbf16>
    %c0_5 = arith.constant 0 : index
    %c0_6 = arith.constant 0 : index
    %12 = vector.load %arg4[%c0_5, %c0_6] : memref<128x128xbf16, #tpu.memory_space<vmem>>, vector<128x128xbf16>
    tpu.vector_store %arg4[%c0_5, %c0_6], %11 {strides = array<i32>} : memref<128x128xbf16, #tpu.memory_space<vmem>>, vector<128x128xbf16>,
    return
  }
  func.func @transform_0(%arg0: i32) -> (i32, i32) {
    %c0_i32 = arith.constant 0 : i32
    %c0_i32_0 = arith.constant 0 : i32
    return %arg0, %c0_i32 : i32, i32
  }
  func.func @transform_1(%arg0: i32) -> (i32, i32) {
    %c0_i32 = arith.constant 0 : i32
    %c0_i32_0 = arith.constant 0 : i32
    %c0_i32_1 = arith.constant 0 : i32
    return %c0_i32, %c0_i32_0 : i32, i32
  }
  func.func @transform_2(%arg0: i32) -> (i32, i32) {
    %c0_i32 = arith.constant 0 : i32
    %c0_i32_0 = arith.constant 0 : i32
    %c0_i32_1 = arith.constant 0 : i32
    return %c0_i32, %c0_i32_0 : i32, i32
  }
  func.func @transform_3(%arg0: i32) -> (i32, i32) {
    %c0_i32 = arith.constant 0 : i32
    %c0_i32_0 = arith.constant 0 : i32
    return %arg0, %c0_i32 : i32, i32
  }
}

module attributes {stable_mosaic.version = 11 : i64} {
  func.func @_bn_apply_kernel(%arg0: i32, %arg1: memref<32x128xbf16, #tpu.memory_space<vmem>>, %arg2: memref<1x128xf32, #tpu.memory_space<vmem>>, %arg3: memref<1x128xf32, #tpu.memory_space<vmem>>, %arg4: memref<32x128xbf16, #tpu.memory_space<vmem>>) attributes {dimension_semantics = [#tpu.dimension_semantics<parallel>], iteration_bounds = array<i64: 1>, scalar_prefetch = 0 : i64, scratch_operands = 0 : i64, tpu.core_type = #tpu.core_type<tc>, window_params = [{transform_indices = @transform_0, window_bounds = array<i64: 32, 128>}, {pipeline_mode = #tpu.pipeline_mode<synchronous>, transform_indices = @transform_1, window_bounds = array<i64: 1, 128>}, {pipeline_mode = #tpu.pipeline_mode<synchronous>, transform_indices = @transform_2, window_bounds = array<i64: 1, 128>}, {transform_indices = @transform_3, window_bounds = array<i64: 32, 128>}]} {
    %c0 = arith.constant 0 : index
    %c0_0 = arith.constant 0 : index
    %0 = vector.load %arg1[%c0, %c0_0] : memref<32x128xbf16, #tpu.memory_space<vmem>>, vector<32x128xbf16>
    %1 = arith.extf %0 : vector<32x128xbf16> to vector<32x128xf32>
    %c0_1 = arith.constant 0 : index
    %c0_2 = arith.constant 0 : index
    %2 = vector.load %arg2[%c0_1, %c0_2] : memref<1x128xf32, #tpu.memory_space<vmem>>, vector<1x128xf32>
    %3 = vector.broadcast %2 : vector<1x128xf32> to vector<32x128xf32>
    %4 = arith.mulf %1, %3 : vector<32x128xf32>
    %c0_3 = arith.constant 0 : index
    %c0_4 = arith.constant 0 : index
    %5 = vector.load %arg3[%c0_3, %c0_4] : memref<1x128xf32, #tpu.memory_space<vmem>>, vector<1x128xf32>
    %6 = vector.broadcast %5 : vector<1x128xf32> to vector<32x128xf32>
    %7 = arith.addf %4, %6 : vector<32x128xf32>
    %cst = arith.constant 2.000000e-01 : f32
    %8 = vector.broadcast %cst : f32 to vector<32x128xf32>
    %9 = arith.mulf %8, %7 : vector<32x128xf32>
    %10 = arith.maximumf %7, %9 : vector<32x128xf32>
    %11 = arith.truncf %10 : vector<32x128xf32> to vector<32x128xbf16>
    %c0_5 = arith.constant 0 : index
    %c0_6 = arith.constant 0 : index
    %12 = vector.load %arg4[%c0_5, %c0_6] : memref<32x128xbf16, #tpu.memory_space<vmem>>, vector<32x128xbf16>
    tpu.vector_store %arg4[%c0_5, %c0_6], %11 {strides = array<i32>} : memref<32x128xbf16, #tpu.memory_space<vmem>>, vector<32x128xbf16>,
    return
  }
  func.func @transform_0(%arg0: i32) -> (i32, i32) {
    %c0_i32 = arith.constant 0 : i32
    %c0_i32_0 = arith.constant 0 : i32
    return %arg0, %c0_i32 : i32, i32
  }
  func.func @transform_1(%arg0: i32) -> (i32, i32) {
    %c0_i32 = arith.constant 0 : i32
    %c0_i32_0 = arith.constant 0 : i32
    %c0_i32_1 = arith.constant 0 : i32
    return %c0_i32, %c0_i32_0 : i32, i32
  }
  func.func @transform_2(%arg0: i32) -> (i32, i32) {
    %c0_i32 = arith.constant 0 : i32
    %c0_i32_0 = arith.constant 0 : i32
    %c0_i32_1 = arith.constant 0 : i32
    return %c0_i32, %c0_i32_0 : i32, i32
  }
  func.func @transform_3(%arg0: i32) -> (i32, i32) {
    %c0_i32 = arith.constant 0 : i32
    %c0_i32_0 = arith.constant 0 : i32
    return %arg0, %c0_i32 : i32, i32
  }
}

module attributes {stable_mosaic.version = 11 : i64} {
  func.func @_conv_bn_stats_kernel(%arg0: i32, %arg1: memref<32x512xbf16, #tpu.memory_space<vmem>>, %arg2: memref<512x128xbf16, #tpu.memory_space<vmem>>, %arg3: memref<1x128xf32, #tpu.memory_space<vmem>>, %arg4: memref<1x128xf32, #tpu.memory_space<vmem>>, %arg5: memref<32x128xbf16, #tpu.memory_space<vmem>>, %arg6: memref<1x128xf32, #tpu.memory_space<vmem>>, %arg7: memref<1x128xf32, #tpu.memory_space<vmem>>) attributes {dimension_semantics = [#tpu.dimension_semantics<arbitrary>], iteration_bounds = array<i64: 1>, scalar_prefetch = 0 : i64, scratch_operands = 0 : i64, tpu.core_type = #tpu.core_type<tc>, window_params = [{transform_indices = @transform_0, window_bounds = array<i64: 32, 512>}, {pipeline_mode = #tpu.pipeline_mode<synchronous>, transform_indices = @transform_1, window_bounds = array<i64: 512, 128>}, {pipeline_mode = #tpu.pipeline_mode<synchronous>, transform_indices = @transform_2, window_bounds = array<i64: 1, 128>}, {pipeline_mode = #tpu.pipeline_mode<synchronous>, transform_indices = @transform_3, window_bounds = array<i64: 1, 128>}, {transform_indices = @transform_4, window_bounds = array<i64: 32, 128>}, {pipeline_mode = #tpu.pipeline_mode<synchronous>, transform_indices = @transform_5, window_bounds = array<i64: 1, 128>}, {pipeline_mode = #tpu.pipeline_mode<synchronous>, transform_indices = @transform_6, window_bounds = array<i64: 1, 128>}]} {
    %c0_i32 = arith.constant 0 : i32
    %0 = arith.cmpi eq, %arg0, %c0_i32 : i32
    %1 = arith.extui %0 : i1 to i32
    %c0_i32_0 = arith.constant 0 : i32
    %2 = arith.cmpi ne, %1, %c0_i32_0 : i32
    scf.if %2 {
      %cst_18 = arith.constant 0.000000e+00 : f32
      %22 = vector.broadcast %cst_18 : f32 to vector<1x128xf32>
      %c0_19 = arith.constant 0 : index
      %c0_20 = arith.constant 0 : index
      %23 = vector.load %arg6[%c0_19, %c0_20] : memref<1x128xf32, #tpu.memory_space<vmem>>, vector<1x128xf32>
      tpu.vector_store %arg6[%c0_19, %c0_20], %22 {strides = array<i32>} : memref<1x128xf32, #tpu.memory_space<vmem>>, vector<1x128xf32>,
      %cst_21 = arith.constant 0.000000e+00 : f32
      %24 = vector.broadcast %cst_21 : f32 to vector<1x128xf32>
      %c0_22 = arith.constant 0 : index
      %c0_23 = arith.constant 0 : index
      %25 = vector.load %arg7[%c0_22, %c0_23] : memref<1x128xf32, #tpu.memory_space<vmem>>, vector<1x128xf32>
      tpu.vector_store %arg7[%c0_22, %c0_23], %24 {strides = array<i32>} : memref<1x128xf32, #tpu.memory_space<vmem>>, vector<1x128xf32>,
    } else {
    }
    %c0 = arith.constant 0 : index
    %c0_1 = arith.constant 0 : index
    %3 = vector.load %arg1[%c0, %c0_1] : memref<32x512xbf16, #tpu.memory_space<vmem>>, vector<32x512xbf16>
    %c0_2 = arith.constant 0 : index
    %c0_3 = arith.constant 0 : index
    %4 = vector.load %arg2[%c0_2, %c0_3] : memref<512x128xbf16, #tpu.memory_space<vmem>>, vector<512x128xbf16>
    %cst = arith.constant dense<0.000000e+00> : vector<32x128xf32>
    %5 = tpu.matmul %3, %4, %cst {dimension_numbers = #tpu.dot_dimension_numbers<[1], [0], [0], [1], [0, 0, 1, 1], [], []>} : vector<32x512xbf16>, vector<512x128xbf16>, vector<32x128xf32> -> vector<32x128xf32>
    %6 = arith.truncf %5 : vector<32x128xf32> to vector<32x128xbf16>
    %c0_4 = arith.constant 0 : index
    %c0_5 = arith.constant 0 : index
    %7 = vector.load %arg5[%c0_4, %c0_5] : memref<32x128xbf16, #tpu.memory_space<vmem>>, vector<32x128xbf16>
    tpu.vector_store %arg5[%c0_4, %c0_5], %6 {strides = array<i32>} : memref<32x128xbf16, #tpu.memory_space<vmem>>, vector<32x128xbf16>,
    %c0_6 = arith.constant 0 : index
    %c0_7 = arith.constant 0 : index
    %8 = vector.load %arg6[%c0_6, %c0_7] : memref<1x128xf32, #tpu.memory_space<vmem>>, vector<1x128xf32>
    %cst_8 = arith.constant dense<0.000000e+00> : vector<128xf32>
    %9 = vector.multi_reduction <add>, %5, %cst_8 [0] : vector<32x128xf32> to vector<128xf32>
    %10 = vector.shape_cast %9 : vector<128xf32> to vector<1x128xf32>
    %11 = arith.addf %8, %10 : vector<1x128xf32>
    %c0_9 = arith.constant 0 : index
    %c0_10 = arith.constant 0 : index
    %12 = vector.load %arg6[%c0_9, %c0_10] : memref<1x128xf32, #tpu.memory_space<vmem>>, vector<1x128xf32>
    tpu.vector_store %arg6[%c0_9, %c0_10], %11 {strides = array<i32>} : memref<1x128xf32, #tpu.memory_space<vmem>>, vector<1x128xf32>,
    %c0_11 = arith.constant 0 : index
    %c0_12 = arith.constant 0 : index
    %13 = vector.load %arg7[%c0_11, %c0_12] : memref<1x128xf32, #tpu.memory_space<vmem>>, vector<1x128xf32>
    %14 = arith.mulf %5, %5 : vector<32x128xf32>
    %cst_13 = arith.constant dense<0.000000e+00> : vector<128xf32>
    %15 = vector.multi_reduction <add>, %14, %cst_13 [0] : vector<32x128xf32> to vector<128xf32>
    %16 = vector.shape_cast %15 : vector<128xf32> to vector<1x128xf32>
    %17 = arith.addf %13, %16 : vector<1x128xf32>
    %c0_14 = arith.constant 0 : index
    %c0_15 = arith.constant 0 : index
    %18 = vector.load %arg7[%c0_14, %c0_15] : memref<1x128xf32, #tpu.memory_space<vmem>>, vector<1x128xf32>
    tpu.vector_store %arg7[%c0_14, %c0_15], %17 {strides = array<i32>} : memref<1x128xf32, #tpu.memory_space<vmem>>, vector<1x128xf32>,
    %c0_i32_16 = arith.constant 0 : i32
    %19 = arith.cmpi eq, %arg0, %c0_i32_16 : i32
    %20 = arith.extui %19 : i1 to i32
    %c0_i32_17 = arith.constant 0 : i32
    %21 = arith.cmpi ne, %20, %c0_i32_17 : i32
    scf.if %21 {
      %c0_18 = arith.constant 0 : index
      %c0_19 = arith.constant 0 : index
      %22 = vector.load %arg6[%c0_18, %c0_19] : memref<1x128xf32, #tpu.memory_space<vmem>>, vector<1x128xf32>
      %cst_20 = arith.constant 3.125000e-02 : f32
      %23 = vector.broadcast %cst_20 : f32 to vector<1x128xf32>
      %24 = arith.mulf %22, %23 : vector<1x128xf32>
      %c0_21 = arith.constant 0 : index
      %c0_22 = arith.constant 0 : index
      %25 = vector.load %arg7[%c0_21, %c0_22] : memref<1x128xf32, #tpu.memory_space<vmem>>, vector<1x128xf32>
      %cst_23 = arith.constant 3.125000e-02 : f32
      %26 = vector.broadcast %cst_23 : f32 to vector<1x128xf32>
      %27 = arith.mulf %25, %26 : vector<1x128xf32>
      %28 = arith.mulf %24, %24 : vector<1x128xf32>
      %29 = arith.subf %27, %28 : vector<1x128xf32>
      %cst_24 = arith.constant 0.000000e+00 : f32
      %30 = vector.broadcast %cst_24 : f32 to vector<1x128xf32>
      %31 = arith.maximumf %29, %30 : vector<1x128xf32>
      %cst_25 = arith.constant 9.99999974E-6 : f32
      %32 = vector.broadcast %cst_25 : f32 to vector<1x128xf32>
      %33 = arith.addf %31, %32 : vector<1x128xf32>
      %34 = math.rsqrt %33 : vector<1x128xf32>
      %c0_26 = arith.constant 0 : index
      %c0_27 = arith.constant 0 : index
      %35 = vector.load %arg3[%c0_26, %c0_27] : memref<1x128xf32, #tpu.memory_space<vmem>>, vector<1x128xf32>
      %36 = arith.mulf %35, %34 : vector<1x128xf32>
      %c0_28 = arith.constant 0 : index
      %c0_29 = arith.constant 0 : index
      %37 = vector.load %arg6[%c0_28, %c0_29] : memref<1x128xf32, #tpu.memory_space<vmem>>, vector<1x128xf32>
      tpu.vector_store %arg6[%c0_28, %c0_29], %36 {strides = array<i32>} : memref<1x128xf32, #tpu.memory_space<vmem>>, vector<1x128xf32>,
      %c0_30 = arith.constant 0 : index
      %c0_31 = arith.constant 0 : index
      %38 = vector.load %arg4[%c0_30, %c0_31] : memref<1x128xf32, #tpu.memory_space<vmem>>, vector<1x128xf32>
      %39 = arith.mulf %24, %36 : vector<1x128xf32>
      %40 = arith.subf %38, %39 : vector<1x128xf32>
      %c0_32 = arith.constant 0 : index
      %c0_33 = arith.constant 0 : index
      %41 = vector.load %arg7[%c0_32, %c0_33] : memref<1x128xf32, #tpu.memory_space<vmem>>, vector<1x128xf32>
      tpu.vector_store %arg7[%c0_32, %c0_33], %40 {strides = array<i32>} : memref<1x128xf32, #tpu.memory_space<vmem>>, vector<1x128xf32>,
    } else {
    }
    return
  }
  func.func @transform_0(%arg0: i32) -> (i32, i32) {
    %c0_i32 = arith.constant 0 : i32
    %c0_i32_0 = arith.constant 0 : i32
    return %arg0, %c0_i32 : i32, i32
  }
  func.func @transform_1(%arg0: i32) -> (i32, i32) {
    %c0_i32 = arith.constant 0 : i32
    %c0_i32_0 = arith.constant 0 : i32
    %c0_i32_1 = arith.constant 0 : i32
    return %c0_i32, %c0_i32_0 : i32, i32
  }
  func.func @transform_2(%arg0: i32) -> (i32, i32) {
    %c0_i32 = arith.constant 0 : i32
    %c0_i32_0 = arith.constant 0 : i32
    %c0_i32_1 = arith.constant 0 : i32
    return %c0_i32, %c0_i32_0 : i32, i32
  }
  func.func @transform_3(%arg0: i32) -> (i32, i32) {
    %c0_i32 = arith.constant 0 : i32
    %c0_i32_0 = arith.constant 0 : i32
    %c0_i32_1 = arith.constant 0 : i32
    return %c0_i32, %c0_i32_0 : i32, i32
  }
  func.func @transform_4(%arg0: i32) -> (i32, i32) {
    %c0_i32 = arith.constant 0 : i32
    %c0_i32_0 = arith.constant 0 : i32
    return %arg0, %c0_i32 : i32, i32
  }
  func.func @transform_5(%arg0: i32) -> (i32, i32) {
    %c0_i32 = arith.constant 0 : i32
    %c0_i32_0 = arith.constant 0 : i32
    %c0_i32_1 = arith.constant 0 : i32
    return %c0_i32, %c0_i32_0 : i32, i32
  }
  func.func @transform_6(%arg0: i32) -> (i32, i32) {
    %c0_i32 = arith.constant 0 : i32
    %c0_i32_0 = arith.constant 0 : i32
    %c0_i32_1 = arith.constant 0 : i32
    return %c0_i32, %c0_i32_0 : i32, i32
  }
}

module attributes {stable_mosaic.version = 11 : i64} {
  func.func @_conv_bias_act_kernel(%arg0: i32, %arg1: memref<16x1024xbf16, #tpu.memory_space<vmem>>, %arg2: memref<1024x128xbf16, #tpu.memory_space<vmem>>, %arg3: memref<1x128xf32, #tpu.memory_space<vmem>>, %arg4: memref<16x128xf32, #tpu.memory_space<vmem>>) attributes {dimension_semantics = [#tpu.dimension_semantics<parallel>], iteration_bounds = array<i64: 1>, scalar_prefetch = 0 : i64, scratch_operands = 0 : i64, tpu.core_type = #tpu.core_type<tc>, window_params = [{transform_indices = @transform_0, window_bounds = array<i64: 16, 1024>}, {pipeline_mode = #tpu.pipeline_mode<synchronous>, transform_indices = @transform_1, window_bounds = array<i64: 1024, 128>}, {pipeline_mode = #tpu.pipeline_mode<synchronous>, transform_indices = @transform_2, window_bounds = array<i64: 1, 128>}, {transform_indices = @transform_3, window_bounds = array<i64: 16, 128>}]} {
    %c0 = arith.constant 0 : index
    %c0_0 = arith.constant 0 : index
    %0 = vector.load %arg1[%c0, %c0_0] : memref<16x1024xbf16, #tpu.memory_space<vmem>>, vector<16x1024xbf16>
    %c0_1 = arith.constant 0 : index
    %c0_2 = arith.constant 0 : index
    %1 = vector.load %arg2[%c0_1, %c0_2] : memref<1024x128xbf16, #tpu.memory_space<vmem>>, vector<1024x128xbf16>
    %cst = arith.constant dense<0.000000e+00> : vector<16x128xf32>
    %2 = tpu.matmul %0, %1, %cst {dimension_numbers = #tpu.dot_dimension_numbers<[1], [0], [0], [1], [0, 0, 1, 1], [], []>} : vector<16x1024xbf16>, vector<1024x128xbf16>, vector<16x128xf32> -> vector<16x128xf32>
    %c0_3 = arith.constant 0 : index
    %c0_4 = arith.constant 0 : index
    %3 = vector.load %arg3[%c0_3, %c0_4] : memref<1x128xf32, #tpu.memory_space<vmem>>, vector<1x128xf32>
    %4 = vector.broadcast %3 : vector<1x128xf32> to vector<16x128xf32>
    %5 = arith.addf %2, %4 : vector<16x128xf32>
    %cst_5 = arith.constant 0.000000e+00 : f32
    %6 = vector.broadcast %cst_5 : f32 to vector<16x128xf32>
    %7 = arith.subf %6, %5 : vector<16x128xf32>
    %8 = math.exp %7 : vector<16x128xf32>
    %cst_6 = arith.constant 1.000000e+00 : f32
    %9 = vector.broadcast %cst_6 : f32 to vector<16x128xf32>
    %10 = arith.addf %9, %8 : vector<16x128xf32>
    %cst_7 = arith.constant 1.000000e+00 : f32
    %11 = vector.broadcast %cst_7 : f32 to vector<16x128xf32>
    %12 = arith.divf %11, %10 : vector<16x128xf32>
    %c0_8 = arith.constant 0 : index
    %c0_9 = arith.constant 0 : index
    %13 = vector.load %arg4[%c0_8, %c0_9] : memref<16x128xf32, #tpu.memory_space<vmem>>, vector<16x128xf32>
    tpu.vector_store %arg4[%c0_8, %c0_9], %12 {strides = array<i32>} : memref<16x128xf32, #tpu.memory_space<vmem>>, vector<16x128xf32>,
    return
  }
  func.func @transform_0(%arg0: i32) -> (i32, i32) {
    %c0_i32 = arith.constant 0 : i32
    %c0_i32_0 = arith.constant 0 : i32
    return %arg0, %c0_i32 : i32, i32
  }
  func.func @transform_1(%arg0: i32) -> (i32, i32) {
    %c0_i32 = arith.constant 0 : i32
    %c0_i32_0 = arith.constant 0 : i32
    %c0_i32_1 = arith.constant 0 : i32
    return %c0_i32, %c0_i32_0 : i32, i32
  }
  func.func @transform_2(%arg0: i32) -> (i32, i32) {
    %c0_i32 = arith.constant 0 : i32
    %c0_i32_0 = arith.constant 0 : i32
    %c0_i32_1 = arith.constant 0 : i32
    return %c0_i32, %c0_i32_0 : i32, i32
  }
  func.func @transform_3(%arg0: i32) -> (i32, i32) {
    %c0_i32 = arith.constant 0 : i32
    %c0_i32_0 = arith.constant 0 : i32
    return %arg0, %c0_i32 : i32, i32
  }
}

</mosaic_0001>

<bundles_post_ra>
// kernel: _lambda_.8
= control target key start
LH: loop header
LB: loop body
LE: loop exit
PB: predicated region body
PF: predicated region fallthrough
CT: control target
= control target key end

     0   :  { %s1900_s12 = smov 0   ;;  %s2102_s0 = inlined_call_operand.vmem [shape: bf16[2048,48], index: 0, kind: input, shape index: {}]   ;;  %s2103_s1 = inlined_call_operand.vmem [shape: bf16[48,128], index: 1, kind: input, shape index: {}]   ;;  %s2104_s2 = inlined_call_operand.vmem [shape: f32[1,128], index: 2, kind: input, shape index: {}]   ;;  %s2105_s3 = inlined_call_operand.vmem [shape: bf16[2048,128], index: 3, kind: output, shape index: {}]  }
   0x1 LB: > { %s1320_s13 = sadd.s32 4294967295, %s1878_s12   ;;  %p1324_p0 = scmp.ge.s32.totalorder %s1878_s12, 1  ;;  %s1878_s12 = sphi %s1900_s12, %s13_s12  }
   0x2   : > { %p138_p1 = scmp.lt.s32.totalorder %s1878_s12, 5 }
   0x4   : > { %p139_p2 = pnand %p1324_p0, %p138_p1 }
   0x5   : > { %s1325_s16 = sshll.u32 (!%p139_p2), %s1320_s13, 6 }
   0x6   : > { %142 = sbr.rel (%p139_p2) target bundleno = 288 (0x120), region = 32  ;;  %p163_p3 = scmp.lt.s32.totalorder (!%p139_p2), %s1325_s16, 255 }
   0xb   : > { %v1837_v0 = vld [vmem:[%s2103_s1 + $0x10] sm:$0xff]   ;;  %v1838_v1 = vld [vmem:[%s2103_s1 + $0x8] sm:$0xff]   ;;  %s2107_s16 = smov (!%p163_p3, %s1325_s16), 255  ;;  %v1839_v2 = vld [vmem:[%s2103_s1] sm:$0xff]   ;;  %vm430_vm0 = vcmask 392192  }
   0xc   : > { %1753 = vmatprep.subr.bf16.mxu0 %v1837_v0  ;;  %1823 = vmatprep.subr.bf16.mxu1 %v1837_v0  ;;  %s1326_s21 = sshll.u32 %s2107_s16, 2  ;;  %v1994_v35 = vld [vmem:[%s2104_s2] ss:$0 sm:$0xff] }
   0xd   : > { %1754 = vmatpush3.bf16.msra.mxu0 %v1837_v0  ;;  %1826 = vmatpush3.bf16.msra.mxu1 %v1837_v0  ;;  %s1925_s24 = scalar_lea.vmem %s2102_s0, %s1326_s21  ;;  %s2011_s29 = scalar_lea.vmem %s2105_s3, %s1326_s21 }
   0xe   : > { %1755 = vmatprep.subr.bf16.mxu0 %v1838_v1  ;;  %1824 = vmatprep.subr.bf16.mxu1 %v1838_v1  ;;  %v1840_v3 = vld [vmem:[%s1925_s24] sm:$0xff]   ;;  %v1842_v5 = vld [vmem:[%s1925_s24 + $0x8] sm:$0xff]   ;;  %v1844_v7 = vld [vmem:[%s1925_s24 + $0x10] sm:$0xff]  }
   0xf   : > { %v1841_v4 = vld [vmem:[%s1925_s24 + $0x80] sm:$0xff]   ;;  %1759 = vmatprep.mubr.msk.bf16.mxu0 %vm430_vm0, %v1840_v3  ;;  %v1843_v6 = vld [vmem:[%s1925_s24 + $0x88] sm:$0xff]   ;;  %v1845_v8 = vld [vmem:[%s1925_s24 + $0x90] sm:$0xff]  }
  0x10   : > { %1791 = vmatprep.mubr.msk.bf16.mxu1 %vm430_vm0, %v1841_v4  ;;  %v1846_v9 = vld [vmem:[%s1925_s24 + $0x18] sm:$0xff]   ;;  %v1848_v11 = vld [vmem:[%s1925_s24 + $0x20] sm:$0xff]   ;;  %v1850_v13 = vld [vmem:[%s1925_s24 + $0x28] sm:$0xff]  }
  0x11   : > { %1756 = vmatpush3.bf16.msra.mxu0 %v1838_v1  ;;  %1827 = vmatpush3.bf16.msra.mxu1 %v1838_v1  ;;  %v1847_v10 = vld [vmem:[%s1925_s24 + $0x98] sm:$0xff]   ;;  %v1849_v12 = vld [vmem:[%s1925_s24 + $0xa0] sm:$0xff]   ;;  %v1851_v14 = vld [vmem:[%s1925_s24 + $0xa8] sm:$0xff]  }
  0x12   : > { %1757 = vmatprep.subr.bf16.mxu0 %v1839_v2  ;;  %1825 = vmatprep.subr.bf16.mxu1 %v1839_v2  ;;  %v1852_v15 = vld [vmem:[%s1925_s24 + $0x30] sm:$0xff]   ;;  %v1854_v17 = vld [vmem:[%s1925_s24 + $0x38] sm:$0xff]   ;;  %v1856_v19 = vld [vmem:[%s1925_s24 + $0x40] sm:$0xff]  }
  0x13   : > { %v1853_v16 = vld [vmem:[%s1925_s24 + $0xb0] sm:$0xff]   ;;  %v1855_v18 = vld [vmem:[%s1925_s24 + $0xb8] sm:$0xff]   ;;  %v1857_v20 = vld [vmem:[%s1925_s24 + $0xc0] sm:$0xff]  }
  0x14   : > { %v1858_v21 = vld [vmem:[%s1925_s24 + $0x48] sm:$0xff]   ;;  %v1860_v23 = vld [vmem:[%s1925_s24 + $0x50] sm:$0xff]   ;;  %v1862_v25 = vld [vmem:[%s1925_s24 + $0x58] sm:$0xff]  }
  0x15   : > { %1758 = vmatpush3.bf16.msra.mxu0 %v1839_v2  ;;  %1828 = vmatpush3.bf16.msra.mxu1 %v1839_v2  ;;  %v1859_v22 = vld [vmem:[%s1925_s24 + $0xc8] sm:$0xff]   ;;  %v1861_v24 = vld [vmem:[%s1925_s24 + $0xd0] sm:$0xff]   ;;  %v1863_v26 = vld [vmem:[%s1925_s24 + $0xd8] sm:$0xff]  }
  0x16   : > { %v1864_v27 = vld [vmem:[%s1925_s24 + $0x60] sm:$0xff]   ;;  %v1866_v29 = vld [vmem:[%s1925_s24 + $0x68] sm:$0xff]   ;;  %v1868_v31 = vld [vmem:[%s1925_s24 + $0x70] sm:$0xff]  }
  0x17   : > { %v1865_v28 = vld [vmem:[%s1925_s24 + $0xe0] sm:$0xff]   ;;  %v1867_v30 = vld [vmem:[%s1925_s24 + $0xe8] sm:$0xff]   ;;  %v1869_v32 = vld [vmem:[%s1925_s24 + $0xf0] sm:$0xff]  }
  0x18   : > { %1760 = vmatmul.mubr.msk.bf16.vlgmr.msra.gmra.mxu0 %vm430_vm0, %v1842_v5  ;;  %1792 = vmatmul.mubr.msk.bf16.vlgmr.msra.gmra.mxu1 %vm430_vm0, %v1843_v6  ;;  %v1870_v33 = vld [vmem:[%s1925_s24 + $0x78] sm:$0xff]  }
  0x19   : > { %1763 = vmatprep.mubr.msk.bf16.mxu0 %vm430_vm0, %v1844_v7  ;;  %1795 = vmatprep.mubr.msk.bf16.mxu1 %vm430_vm0, %v1845_v8  ;;  %v1871_v34 = vld [vmem:[%s1925_s24 + $0xf8] sm:$0xff]  }
  0x20   : > { %1764 = vmatmul.mubr.msk.bf16.gmra.mxu0 %vm430_vm0, %v1846_v9  ;;  %1796 = vmatmul.mubr.msk.bf16.gmra.mxu1 %vm430_vm0, %v1847_v10 }
  0x21   : > { %1767 = vmatprep.mubr.msk.bf16.mxu0 %vm430_vm0, %v1848_v11  ;;  %1799 = vmatprep.mubr.msk.bf16.mxu1 %vm430_vm0, %v1849_v12 }
  0x28   : > { %1768 = vmatmul.mubr.msk.bf16.gmra.mxu0 %vm430_vm0, %v1850_v13  ;;  %1800 = vmatmul.mubr.msk.bf16.gmra.mxu1 %vm430_vm0, %v1851_v14 }
  0x29   : > { %1771 = vmatprep.mubr.msk.bf16.mxu0 %vm430_vm0, %v1852_v15  ;;  %1803 = vmatprep.mubr.msk.bf16.mxu1 %vm430_vm0, %v1853_v16 }
  0x30   : > { %1772 = vmatmul.mubr.msk.bf16.gmra.mxu0 %vm430_vm0, %v1854_v17  ;;  %1804 = vmatmul.mubr.msk.bf16.gmra.mxu1 %vm430_vm0, %v1855_v18 }
  0x31   : > { %1775 = vmatprep.mubr.msk.bf16.mxu0 %vm430_vm0, %v1856_v19  ;;  %1807 = vmatprep.mubr.msk.bf16.mxu1 %vm430_vm0, %v1857_v20 }
  0x38   : > { %1776 = vmatmul.mubr.msk.bf16.gmra.mxu0 %vm430_vm0, %v1858_v21  ;;  %1808 = vmatmul.mubr.msk.bf16.gmra.mxu1 %vm430_vm0, %v1859_v22 }
  0x39   : > { %1779 = vmatprep.mubr.msk.bf16.mxu0 %vm430_vm0, %v1860_v23  ;;  %1811 = vmatprep.mubr.msk.bf16.mxu1 %vm430_vm0, %v1861_v24 }
  0x40   : > { %1780 = vmatmul.mubr.msk.bf16.gmra.mxu0 %vm430_vm0, %v1862_v25  ;;  %1812 = vmatmul.mubr.msk.bf16.gmra.mxu1 %vm430_vm0, %v1863_v26 }
  0x41   : > { %1783 = vmatprep.mubr.msk.bf16.mxu0 %vm430_vm0, %v1864_v27  ;;  %1815 = vmatprep.mubr.msk.bf16.mxu1 %vm430_vm0, %v1865_v28 }
  0x48   : > { %1784 = vmatmul.mubr.msk.bf16.gmra.mxu0 %vm430_vm0, %v1866_v29  ;;  %1816 = vmatmul.mubr.msk.bf16.gmra.mxu1 %vm430_vm0, %v1867_v30 }
  0x49   : > { %1787 = vmatprep.mubr.msk.bf16.mxu0 %vm430_vm0, %v1868_v31  ;;  %1819 = vmatprep.mubr.msk.bf16.mxu1 %vm430_vm0, %v1869_v32 }
  0x50   : > { %1788 = vmatmul.mubr.msk.bf16.gmra.mxu0 %vm430_vm0, %v1870_v33  ;;  %1820 = vmatmul.mubr.msk.bf16.gmra.mxu1 %vm430_vm0, %v1871_v34 }
  0xd8   : > { %v1761_v36 = vpop.f32.mrf.mxu0  ;;  %v1793_v37 = vpop.f32.mrf.mxu1 }
  0xd9   : > { %v570_v38 = vadd.f32 %v1761_v36, %v1994_v35  ;;  %v698_v39 = vadd.f32 %v1793_v37, %v1994_v35 }
  0xda   : > { %v561_v40 = vpop.f32.mrf.mxu0  ;;  %v689_v41 = vpop.f32.mrf.mxu1 }
  0xdb   : > { %v562_v42 = vadd.f32 %v1994_v35, %v561_v40  ;;  %v690_v43 = vadd.f32 %v1994_v35, %v689_v41  ;;  %v818_v46 = vmul.f32 0.2, %v570_v38  ;;  %v850_v47 = vmul.f32 0.2, %v698_v39 }
  0xdc   : > { %v1762_v44 = vpop.f32.mrf.mxu0  ;;  %v1794_v45 = vpop.f32.mrf.mxu1 }
  0xdd   : > { %v573_v48 = vadd.f32 %v1762_v44, %v1994_v35  ;;  %v701_v49 = vadd.f32 %v1794_v45, %v1994_v35  ;;  %v816_v52 = vmul.f32 0.2, %v562_v42  ;;  %v848_v53 = vmul.f32 0.2, %v690_v43 }
  0xde   : > { %v564_v50 = vpop.f32.mrf.mxu0  ;;  %v692_v51 = vpop.f32.mrf.mxu1  ;;  %v882_v60 = vmax.f32 %v570_v38, %v818_v46  ;;  %v914_v61 = vmax.f32 %v698_v39, %v850_v47 }
  0xdf   : > { %v565_v54 = vadd.f32 %v1994_v35, %v564_v50  ;;  %v693_v55 = vadd.f32 %v1994_v35, %v692_v51  ;;  %v819_v56 = vmul.f32 0.2, %v573_v48  ;;  %v851_v57 = vmul.f32 0.2, %v701_v49 }
  0xe0   : > { %v1765_v58 = vpop.f32.mrf.mxu0  ;;  %v1797_v59 = vpop.f32.mrf.mxu1  ;;  %v880_v6 = vmax.f32 %v562_v42, %v816_v52  ;;  %v912_v7 = vmax.f32 %v690_v43, %v848_v53 }
  0xe1   : > { %v817_v62 = vmul.f32 0.2, %v565_v54  ;;  %v849_v63 = vmul.f32 0.2, %v693_v55  ;;  %v883_v0 = vmax.f32 %v573_v48, %v819_v56  ;;  %v915_v1 = vmax.f32 %v701_v49, %v851_v57 }
  0xe2   : > { %v586_v2 = vadd.f32 %v1765_v58, %v1994_v35  ;;  %v714_v3 = vadd.f32 %v1797_v59, %v1994_v35  ;;  %v577_v4 = vpop.f32.mrf.mxu0  ;;  %v705_v5 = vpop.f32.mrf.mxu1 }
  0xe3   : > { %v881_v8 = vmax.f32 %v565_v54, %v817_v62  ;;  %v913_v9 = vmax.f32 %v693_v55, %v849_v63  ;;  %v1535_v10 = vpack.c.bf16 %v883_v0, %v882_v60  ;;  %v1615_v11 = vpack.c.bf16 %v915_v1, %v914_v61 }
  0xe4   : > { %v578_v12 = vadd.f32 %v1994_v35, %v577_v4  ;;  %v706_v13 = vadd.f32 %v1994_v35, %v705_v5  ;;  %v1766_v14 = vpop.f32.mrf.mxu0  ;;  %v1798_v15 = vpop.f32.mrf.mxu1  ;;  %v822_v18 = vmul.f32 0.2, %v586_v2  ;;  %v854_v19 = vmul.f32 0.2, %v714_v3 }
  0xe5   : > { %v1530_v16 = vpack.c.bf16 %v881_v8, %v880_v6  ;;  %v1610_v17 = vpack.c.bf16 %v913_v9, %v912_v7  ;;  %1687 = vst [vmem:[%s2011_s29 + $0x8] sm:$0xff] %v1535_v10   ;;  %1703 = vst [vmem:[%s2011_s29 + $0x88] sm:$0xff] %v1615_v11   ;;  %v589_v20 = vadd.f32 %v1766_v14, %v1994_v35 }
  0xe6   : > { %v717_v21 = vadd.f32 %v1798_v15, %v1994_v35  ;;  %v580_v22 = vpop.f32.mrf.mxu0  ;;  %v708_v23 = vpop.f32.mrf.mxu1  ;;  %v820_v24 = vmul.f32 0.2, %v578_v12  ;;  %v852_v25 = vmul.f32 0.2, %v706_v13  ;;  %v886_v37 = vmax.f32 %v586_v2, %v822_v18 }
  0xe7   : > { %1531 = vst [vmem:[%s2011_s29] sm:$0xff] %v1530_v16   ;;  %1702 = vst [vmem:[%s2011_s29 + $0x80] sm:$0xff] %v1610_v17   ;;  %v581_v26 = vadd.f32 %v1994_v35, %v580_v22  ;;  %v709_v27 = vadd.f32 %v1994_v35, %v708_v23  ;;  %v823_v28 = vmul.f32 0.2, %v589_v20  ;;  %v918_v38 = vmax.f32 %v714_v3, %v854_v19 }
  0xe8   : > { %v855_v29 = vmul.f32 0.2, %v717_v21  ;;  %v1769_v30 = vpop.f32.mrf.mxu0  ;;  %v1801_v31 = vpop.f32.mrf.mxu1  ;;  %v884_v43 = vmax.f32 %v578_v12, %v820_v24  ;;  %v916_v44 = vmax.f32 %v706_v13, %v852_v25 }
  0xe9   : > { %v821_v32 = vmul.f32 0.2, %v581_v26  ;;  %v853_v33 = vmul.f32 0.2, %v709_v27  ;;  %v602_v34 = vadd.f32 %v1769_v30, %v1994_v35  ;;  %v730_v36 = vadd.f32 %v1801_v31, %v1994_v35 }
  0xea   : > { %v887_v39 = vmax.f32 %v589_v20, %v823_v28  ;;  %v919_v40 = vmax.f32 %v717_v21, %v855_v29  ;;  %v593_v41 = vpop.f32.mrf.mxu0  ;;  %v721_v42 = vpop.f32.mrf.mxu1 }
  0xeb   : > { %v885_v45 = vmax.f32 %v581_v26, %v821_v32  ;;  %v917_v46 = vmax.f32 %v709_v27, %v853_v33  ;;  %v594_v49 = vadd.f32 %v1994_v35, %v593_v41  ;;  %v722_v50 = vadd.f32 %v1994_v35, %v721_v42 }
  0xec   : > { %v1545_v47 = vpack.c.bf16 %v887_v39, %v886_v37  ;;  %v1625_v48 = vpack.c.bf16 %v919_v40, %v918_v38  ;;  %v1770_v51 = vpop.f32.mrf.mxu0  ;;  %v1802_v52 = vpop.f32.mrf.mxu1  ;;  %v826_v55 = vmul.f32 0.2, %v602_v34  ;;  %v858_v56 = vmul.f32 0.2, %v730_v36 }
  0xed   : > { %v1540_v53 = vpack.c.bf16 %v885_v45, %v884_v43  ;;  %v1620_v54 = vpack.c.bf16 %v917_v46, %v916_v44  ;;  %v605_v57 = vadd.f32 %v1770_v51, %v1994_v35  ;;  %v733_v58 = vadd.f32 %v1802_v52, %v1994_v35 }
  0xee   : > { %1689 = vst [vmem:[%s2011_s29 + $0x18] sm:$0xff] %v1545_v47   ;;  %1705 = vst [vmem:[%s2011_s29 + $0x98] sm:$0xff] %v1625_v48   ;;  %v596_v59 = vpop.f32.mrf.mxu0  ;;  %v724_v60 = vpop.f32.mrf.mxu1  ;;  %v824_v61 = vmul.f32 0.2, %v594_v49  ;;  %v856_v62 = vmul.f32 0.2, %v722_v50  ;;  %v890_v5 = vmax.f32 %v602_v34, %v826_v55  ;;  %v922_v6 = vmax.f32 %v730_v36, %v858_v56 }
  0xef   : > { %1688 = vst [vmem:[%s2011_s29 + $0x10] sm:$0xff] %v1540_v53   ;;  %1704 = vst [vmem:[%s2011_s29 + $0x90] sm:$0xff] %v1620_v54   ;;  %v597_v63 = vadd.f32 %v1994_v35, %v596_v59  ;;  %v725_v0 = vadd.f32 %v1994_v35, %v724_v60  ;;  %v827_v1 = vmul.f32 0.2, %v605_v57  ;;  %v859_v2 = vmul.f32 0.2, %v733_v58 }
  0xf0   : > { %v1773_v3 = vpop.f32.mrf.mxu0  ;;  %v1805_v4 = vpop.f32.mrf.mxu1  ;;  %v888_v15 = vmax.f32 %v594_v49, %v824_v61  ;;  %v920_v16 = vmax.f32 %v722_v50, %v856_v62 }
  0xf1   : > { %v825_v7 = vmul.f32 0.2, %v597_v63  ;;  %v857_v8 = vmul.f32 0.2, %v725_v0  ;;  %v891_v9 = vmax.f32 %v605_v57, %v827_v1  ;;  %v923_v10 = vmax.f32 %v733_v58, %v859_v2 }
  0xf2   : > { %v618_v11 = vadd.f32 %v1773_v3, %v1994_v35  ;;  %v746_v12 = vadd.f32 %v1805_v4, %v1994_v35  ;;  %v609_v13 = vpop.f32.mrf.mxu0  ;;  %v737_v14 = vpop.f32.mrf.mxu1 }
  0xf3   : > { %v889_v17 = vmax.f32 %v597_v63, %v825_v7  ;;  %v921_v18 = vmax.f32 %v725_v0, %v857_v8  ;;  %v1555_v19 = vpack.c.bf16 %v891_v9, %v890_v5  ;;  %v1635_v20 = vpack.c.bf16 %v923_v10, %v922_v6 }
  0xf4   : > { %v610_v21 = vadd.f32 %v1994_v35, %v609_v13  ;;  %v738_v22 = vadd.f32 %v1994_v35, %v737_v14  ;;  %v1774_v23 = vpop.f32.mrf.mxu0  ;;  %v1806_v24 = vpop.f32.mrf.mxu1  ;;  %v830_v27 = vmul.f32 0.2, %v618_v11  ;;  %v862_v28 = vmul.f32 0.2, %v746_v12 }
  0xf5   : > { %v1550_v25 = vpack.c.bf16 %v889_v17, %v888_v15  ;;  %v1630_v26 = vpack.c.bf16 %v921_v18, %v920_v16  ;;  %1691 = vst [vmem:[%s2011_s29 + $0x28] sm:$0xff] %v1555_v19   ;;  %1707 = vst [vmem:[%s2011_s29 + $0xa8] sm:$0xff] %v1635_v20   ;;  %v621_v29 = vadd.f32 %v1774_v23, %v1994_v35 }
  0xf6   : > { %v749_v30 = vadd.f32 %v1806_v24, %v1994_v35  ;;  %v612_v31 = vpop.f32.mrf.mxu0  ;;  %v740_v32 = vpop.f32.mrf.mxu1  ;;  %v828_v33 = vmul.f32 0.2, %v610_v21  ;;  %v860_v34 = vmul.f32 0.2, %v738_v22  ;;  %v894_v46 = vmax.f32 %v618_v11, %v830_v27 }
  0xf7   : > { %1690 = vst [vmem:[%s2011_s29 + $0x20] sm:$0xff] %v1550_v25   ;;  %1706 = vst [vmem:[%s2011_s29 + $0xa0] sm:$0xff] %v1630_v26   ;;  %v613_v36 = vadd.f32 %v1994_v35, %v612_v31  ;;  %v741_v37 = vadd.f32 %v1994_v35, %v740_v32  ;;  %v831_v38 = vmul.f32 0.2, %v621_v29  ;;  %v926_v47 = vmax.f32 %v746_v12, %v862_v28 }
  0xf8   : > { %v863_v39 = vmul.f32 0.2, %v749_v30  ;;  %v1777_v40 = vpop.f32.mrf.mxu0  ;;  %v1809_v41 = vpop.f32.mrf.mxu1  ;;  %v892_v52 = vmax.f32 %v610_v21, %v828_v33  ;;  %v924_v53 = vmax.f32 %v738_v22, %v860_v34 }
  0xf9   : > { %v829_v42 = vmul.f32 0.2, %v613_v36  ;;  %v861_v43 = vmul.f32 0.2, %v741_v37  ;;  %v634_v44 = vadd.f32 %v1777_v40, %v1994_v35  ;;  %v762_v45 = vadd.f32 %v1809_v41, %v1994_v35 }
  0xfa   : > { %v895_v48 = vmax.f32 %v621_v29, %v831_v38  ;;  %v927_v49 = vmax.f32 %v749_v30, %v863_v39  ;;  %v625_v50 = vpop.f32.mrf.mxu0  ;;  %v753_v51 = vpop.f32.mrf.mxu1 }
  0xfb   : > { %v893_v54 = vmax.f32 %v613_v36, %v829_v42  ;;  %v925_v55 = vmax.f32 %v741_v37, %v861_v43  ;;  %v626_v58 = vadd.f32 %v1994_v35, %v625_v50  ;;  %v754_v59 = vadd.f32 %v1994_v35, %v753_v51 }
  0xfc   : > { %v1565_v56 = vpack.c.bf16 %v895_v48, %v894_v46  ;;  %v1645_v57 = vpack.c.bf16 %v927_v49, %v926_v47  ;;  %v1778_v60 = vpop.f32.mrf.mxu0  ;;  %v1810_v61 = vpop.f32.mrf.mxu1  ;;  %v834_v0 = vmul.f32 0.2, %v634_v44  ;;  %v866_v1 = vmul.f32 0.2, %v762_v45 }
  0xfd   : > { %v1560_v62 = vpack.c.bf16 %v893_v54, %v892_v52  ;;  %v1640_v63 = vpack.c.bf16 %v925_v55, %v924_v53  ;;  %v637_v2 = vadd.f32 %v1778_v60, %v1994_v35  ;;  %v765_v3 = vadd.f32 %v1810_v61, %v1994_v35 }
  0xfe   : > { %1693 = vst [vmem:[%s2011_s29 + $0x38] sm:$0xff] %v1565_v56   ;;  %1709 = vst [vmem:[%s2011_s29 + $0xb8] sm:$0xff] %v1645_v57   ;;  %v628_v4 = vpop.f32.mrf.mxu0  ;;  %v756_v5 = vpop.f32.mrf.mxu1  ;;  %v832_v6 = vmul.f32 0.2, %v626_v58  ;;  %v864_v7 = vmul.f32 0.2, %v754_v59  ;;  %v898_v14 = vmax.f32 %v634_v44, %v834_v0  ;;  %v930_v15 = vmax.f32 %v762_v45, %v866_v1 }
  0xff   : > { %1692 = vst [vmem:[%s2011_s29 + $0x30] sm:$0xff] %v1560_v62   ;;  %1708 = vst [vmem:[%s2011_s29 + $0xb0] sm:$0xff] %v1640_v63   ;;  %v629_v8 = vadd.f32 %v1994_v35, %v628_v4  ;;  %v757_v9 = vadd.f32 %v1994_v35, %v756_v5  ;;  %v835_v10 = vmul.f32 0.2, %v637_v2  ;;  %v867_v11 = vmul.f32 0.2, %v765_v3 }
 0x100   : > { %v1781_v12 = vpop.f32.mrf.mxu0  ;;  %v1813_v13 = vpop.f32.mrf.mxu1  ;;  %v896_v24 = vmax.f32 %v626_v58, %v832_v6  ;;  %v928_v25 = vmax.f32 %v754_v59, %v864_v7 }
 0x101   : > { %v833_v16 = vmul.f32 0.2, %v629_v8  ;;  %v865_v17 = vmul.f32 0.2, %v757_v9  ;;  %v899_v18 = vmax.f32 %v637_v2, %v835_v10  ;;  %v931_v19 = vmax.f32 %v765_v3, %v867_v11 }
 0x102   : > { %v650_v20 = vadd.f32 %v1781_v12, %v1994_v35  ;;  %v778_v21 = vadd.f32 %v1813_v13, %v1994_v35  ;;  %v641_v22 = vpop.f32.mrf.mxu0  ;;  %v769_v23 = vpop.f32.mrf.mxu1 }
 0x103   : > { %v897_v26 = vmax.f32 %v629_v8, %v833_v16  ;;  %v929_v27 = vmax.f32 %v757_v9, %v865_v17  ;;  %v1575_v28 = vpack.c.bf16 %v899_v18, %v898_v14  ;;  %v1655_v29 = vpack.c.bf16 %v931_v19, %v930_v15 }
 0x104   : > { %v642_v30 = vadd.f32 %v1994_v35, %v641_v22  ;;  %v770_v31 = vadd.f32 %v1994_v35, %v769_v23  ;;  %v1782_v32 = vpop.f32.mrf.mxu0  ;;  %v1814_v33 = vpop.f32.mrf.mxu1  ;;  %v838_v37 = vmul.f32 0.2, %v650_v20  ;;  %v870_v38 = vmul.f32 0.2, %v778_v21 }
 0x105   : > { %v1570_v34 = vpack.c.bf16 %v897_v26, %v896_v24  ;;  %v1650_v36 = vpack.c.bf16 %v929_v27, %v928_v25  ;;  %1695 = vst [vmem:[%s2011_s29 + $0x48] sm:$0xff] %v1575_v28   ;;  %1711 = vst [vmem:[%s2011_s29 + $0xc8] sm:$0xff] %v1655_v29   ;;  %v653_v39 = vadd.f32 %v1782_v32, %v1994_v35 }
 0x106   : > { %v781_v40 = vadd.f32 %v1814_v33, %v1994_v35  ;;  %v644_v41 = vpop.f32.mrf.mxu0  ;;  %v772_v42 = vpop.f32.mrf.mxu1  ;;  %v836_v43 = vmul.f32 0.2, %v642_v30  ;;  %v868_v44 = vmul.f32 0.2, %v770_v31  ;;  %v902_v55 = vmax.f32 %v650_v20, %v838_v37 }
 0x107   : > { %1694 = vst [vmem:[%s2011_s29 + $0x40] sm:$0xff] %v1570_v34   ;;  %1710 = vst [vmem:[%s2011_s29 + $0xc0] sm:$0xff] %v1650_v36   ;;  %v645_v45 = vadd.f32 %v1994_v35, %v644_v41  ;;  %v773_v46 = vadd.f32 %v1994_v35, %v772_v42  ;;  %v839_v47 = vmul.f32 0.2, %v653_v39  ;;  %v934_v56 = vmax.f32 %v778_v21, %v870_v38 }
 0x108   : > { %v871_v48 = vmul.f32 0.2, %v781_v40  ;;  %v1785_v49 = vpop.f32.mrf.mxu0  ;;  %v1817_v50 = vpop.f32.mrf.mxu1  ;;  %v900_v61 = vmax.f32 %v642_v30, %v836_v43  ;;  %v932_v62 = vmax.f32 %v770_v31, %v868_v44 }
 0x109   : > { %v837_v51 = vmul.f32 0.2, %v645_v45  ;;  %v869_v52 = vmul.f32 0.2, %v773_v46  ;;  %v666_v53 = vadd.f32 %v1785_v49, %v1994_v35  ;;  %v794_v54 = vadd.f32 %v1817_v50, %v1994_v35 }
 0x10a   : > { %v903_v57 = vmax.f32 %v653_v39, %v839_v47  ;;  %v935_v58 = vmax.f32 %v781_v40, %v871_v48  ;;  %v657_v59 = vpop.f32.mrf.mxu0  ;;  %v785_v60 = vpop.f32.mrf.mxu1 }
 0x10b   : > { %v901_v63 = vmax.f32 %v645_v45, %v837_v51  ;;  %v933_v0 = vmax.f32 %v773_v46, %v869_v52  ;;  %v658_v3 = vadd.f32 %v1994_v35, %v657_v59  ;;  %v786_v4 = vadd.f32 %v1994_v35, %v785_v60 }
 0x10c   : > { %v1585_v1 = vpack.c.bf16 %v903_v57, %v902_v55  ;;  %v1665_v2 = vpack.c.bf16 %v935_v58, %v934_v56  ;;  %v1786_v5 = vpop.f32.mrf.mxu0  ;;  %v1818_v6 = vpop.f32.mrf.mxu1  ;;  %v842_v9 = vmul.f32 0.2, %v666_v53  ;;  %v874_v10 = vmul.f32 0.2, %v794_v54 }
 0x10d   : > { %v1580_v7 = vpack.c.bf16 %v901_v63, %v900_v61  ;;  %v1660_v8 = vpack.c.bf16 %v933_v0, %v932_v62  ;;  %v669_v11 = vadd.f32 %v1786_v5, %v1994_v35  ;;  %v797_v12 = vadd.f32 %v1818_v6, %v1994_v35 }
 0x10e   : > { %1697 = vst [vmem:[%s2011_s29 + $0x58] sm:$0xff] %v1585_v1   ;;  %1713 = vst [vmem:[%s2011_s29 + $0xd8] sm:$0xff] %v1665_v2   ;;  %v660_v13 = vpop.f32.mrf.mxu0  ;;  %v788_v14 = vpop.f32.mrf.mxu1  ;;  %v840_v15 = vmul.f32 0.2, %v658_v3  ;;  %v872_v16 = vmul.f32 0.2, %v786_v4  ;;  %v906_v23 = vmax.f32 %v666_v53, %v842_v9  ;;  %v938_v24 = vmax.f32 %v794_v54, %v874_v10 }
 0x10f   : > { %1696 = vst [vmem:[%s2011_s29 + $0x50] sm:$0xff] %v1580_v7   ;;  %1712 = vst [vmem:[%s2011_s29 + $0xd0] sm:$0xff] %v1660_v8   ;;  %v661_v17 = vadd.f32 %v1994_v35, %v660_v13  ;;  %v789_v18 = vadd.f32 %v1994_v35, %v788_v14  ;;  %v843_v19 = vmul.f32 0.2, %v669_v11  ;;  %v875_v20 = vmul.f32 0.2, %v797_v12 }
 0x110   : > { %v1789_v21 = vpop.f32.mrf.mxu0  ;;  %v1821_v22 = vpop.f32.mrf.mxu1  ;;  %v904_v33 = vmax.f32 %v658_v3, %v840_v15  ;;  %v936_v34 = vmax.f32 %v786_v4, %v872_v16 }
 0x111   : > { %v841_v25 = vmul.f32 0.2, %v661_v17  ;;  %v873_v26 = vmul.f32 0.2, %v789_v18  ;;  %v907_v27 = vmax.f32 %v669_v11, %v843_v19  ;;  %v939_v28 = vmax.f32 %v797_v12, %v875_v20 }
 0x112   : > { %v682_v29 = vadd.f32 %v1789_v21, %v1994_v35  ;;  %v810_v30 = vadd.f32 %v1821_v22, %v1994_v35  ;;  %v673_v31 = vpop.f32.mrf.mxu0  ;;  %v801_v32 = vpop.f32.mrf.mxu1 }
 0x113   : > { %v905_v36 = vmax.f32 %v661_v17, %v841_v25  ;;  %v937_v37 = vmax.f32 %v789_v18, %v873_v26  ;;  %v1595_v38 = vpack.c.bf16 %v907_v27, %v906_v23  ;;  %v1675_v39 = vpack.c.bf16 %v939_v28, %v938_v24 }
 0x114   : > { %v674_v40 = vadd.f32 %v1994_v35, %v673_v31  ;;  %v802_v41 = vadd.f32 %v1994_v35, %v801_v32  ;;  %v1790_v42 = vpop.f32.mrf.mxu0  ;;  %v1822_v43 = vpop.f32.mrf.mxu1  ;;  %v846_v46 = vmul.f32 0.2, %v682_v29  ;;  %v878_v47 = vmul.f32 0.2, %v810_v30 }
 0x115   : > { %v1590_v44 = vpack.c.bf16 %v905_v36, %v904_v33  ;;  %v1670_v45 = vpack.c.bf16 %v937_v37, %v936_v34  ;;  %1699 = vst [vmem:[%s2011_s29 + $0x68] sm:$0xff] %v1595_v38   ;;  %1715 = vst [vmem:[%s2011_s29 + $0xe8] sm:$0xff] %v1675_v39   ;;  %v685_v48 = vadd.f32 %v1790_v42, %v1994_v35 }
 0x116   : > { %v813_v49 = vadd.f32 %v1822_v43, %v1994_v35  ;;  %v676_v50 = vpop.f32.mrf.mxu0  ;;  %v804_v51 = vpop.f32.mrf.mxu1  ;;  %v844_v52 = vmul.f32 0.2, %v674_v40  ;;  %v876_v53 = vmul.f32 0.2, %v802_v41  ;;  %v910_v60 = vmax.f32 %v682_v29, %v846_v46 }
 0x117   : > { %1698 = vst [vmem:[%s2011_s29 + $0x60] sm:$0xff] %v1590_v44   ;;  %1714 = vst [vmem:[%s2011_s29 + $0xe0] sm:$0xff] %v1670_v45   ;;  %v677_v54 = vadd.f32 %v1994_v35, %v676_v50  ;;  %v805_v55 = vadd.f32 %v1994_v35, %v804_v51  ;;  %v847_v56 = vmul.f32 0.2, %v685_v48  ;;  %v942_v61 = vmax.f32 %v810_v30, %v878_v47 }
 0x118   : > { %v879_v57 = vmul.f32 0.2, %v813_v49  ;;  %v908_v0 = vmax.f32 %v674_v40, %v844_v52  ;;  %v940_v1 = vmax.f32 %v802_v41, %v876_v53 }
 0x119   : > { %v845_v58 = vmul.f32 0.2, %v677_v54  ;;  %v877_v59 = vmul.f32 0.2, %v805_v55  ;;  %v911_v62 = vmax.f32 %v685_v48, %v847_v56 }
 0x11a   : > { %v943_v63 = vmax.f32 %v813_v49, %v879_v57 }
 0x11b   : > { %v909_v2 = vmax.f32 %v677_v54, %v845_v58  ;;  %v941_v3 = vmax.f32 %v805_v55, %v877_v59  ;;  %v1605_v4 = vpack.c.bf16 %v911_v62, %v910_v60 }
 0x11c   : > { %v1685_v5 = vpack.c.bf16 %v943_v63, %v942_v61 }
 0x11d   : > { %v1600_v6 = vpack.c.bf16 %v909_v2, %v908_v0  ;;  %v1680_v35 = vpack.c.bf16 %v941_v3, %v940_v1  ;;  %1701 = vst [vmem:[%s2011_s29 + $0x78] sm:$0xff] %v1605_v4  }
 0x11e   : > { %1717 = vst [vmem:[%s2011_s29 + $0xf8] sm:$0xff] %v1685_v5  }
 0x11f   : > { %1700 = vst [vmem:[%s2011_s29 + $0x70] sm:$0xff] %v1600_v6   ;;  %1716 = vst [vmem:[%s2011_s29 + $0xf0] sm:$0xff] %v1680_v35  }
 0x120 PF: > { %s13_s12 = sadd.s32 1, %s1878_s12  }
 0x121   : > { %p10_p4 = scmp.ge.s32.totalorder %s13_s12, 6  }
 0x123   :  { %12 = sbr.rel (!%p10_p4) target bundleno = 1 (0x1), region = 62 }

// kernel: _lambda_.9
= control target key start
LH: loop header
LB: loop body
LE: loop exit
PB: predicated region body
PF: predicated region fallthrough
CT: control target
= control target key end

     0   :  { %v1733_v42 = vmov 0.0   ;;  %s2213_s1 = inlined_call_operand.vmem [shape: bf16[128,128], index: 1, kind: input, shape index: {}]   ;;  %s2214_s0 = inlined_call_operand.vmem [shape: bf16[512,128], index: 0, kind: input, shape index: {}]   ;;  %s2215_s5 = inlined_call_operand.vmem [shape: f32[1,128], index: 5, kind: output, shape index: {1}]   ;;  %s2216_s6 = inlined_call_operand.vmem [shape: f32[1,128], index: 6, kind: output, shape index: {2}]   ;;  %s2217_s4 = inlined_call_operand.vmem [shape: bf16[512,128], index: 4, kind: output, shape index: {0}]   ;;  %s2218_s2 = inlined_call_operand.vmem [shape: f32[1,128], index: 2, kind: input, shape index: {}]   ;;  %s2219_s3 = inlined_call_operand.vmem [shape: f32[1,128], index: 3, kind: input, shape index: {}]  }
   0x1   :  { %v1691_v0 = vld [vmem:[%s2213_s1 + $0x38] sm:$0xff]   ;;  %v1692_v1 = vld [vmem:[%s2213_s1 + $0x30] sm:$0xff]   ;;  %v1693_v2 = vld [vmem:[%s2213_s1 + $0x28] sm:$0xff]   ;;  %25 = vst [vmem:[%s2215_s5] sm:$0x1] %v1733_v42 }
   0x2   :  { %1594 = vmatprep.subr.bf16.mxu0 %v1691_v0  ;;  %1674 = vmatprep.subr.bf16.mxu1 %v1691_v0  ;;  %v1694_v3 = vld [vmem:[%s2213_s1 + $0x20] sm:$0xff]   ;;  %v1695_v5 = vld [vmem:[%s2213_s1 + $0x18] sm:$0xff]   ;;  %v1696_v6 = vld [vmem:[%s2213_s1 + $0x10] sm:$0xff]   ;;  %26 = vst [vmem:[%s2216_s6] sm:$0x1] %v1733_v42 }
   0x3   :  { %1595 = vmatpush3.bf16.msra.mxu0 %v1691_v0  ;;  %1682 = vmatpush3.bf16.msra.mxu1 %v1691_v0  ;;  %v1699_v4 = vld [vmem:[%s2214_s0] sm:$0xff]   ;;  %v1697_v7 = vld [vmem:[%s2213_s1 + $0x8] sm:$0xff]   ;;  %v1701_v11 = vld [vmem:[%s2214_s0 + $0x10] sm:$0xff]  }
   0x4   :  { %1596 = vmatprep.subr.bf16.mxu0 %v1692_v1  ;;  %1675 = vmatprep.subr.bf16.mxu1 %v1692_v1  ;;  %v1698_v8 = vld [vmem:[%s2213_s1] sm:$0xff]   ;;  %v1700_v10 = vld [vmem:[%s2214_s0 + $0x8] sm:$0xff]   ;;  %v1717_v13 = vld [vmem:[%s2214_s0 + $0x90] sm:$0xff]  }
   0x5   :  { %1610 = vmatprep.mubr.bf16.mxu0 %v1699_v4  ;;  %v1715_v9 = vld [vmem:[%s2214_s0 + $0x80] sm:$0xff]   ;;  %v1716_v12 = vld [vmem:[%s2214_s0 + $0x88] sm:$0xff]   ;;  %v1702_v14 = vld [vmem:[%s2214_s0 + $0x18] sm:$0xff]  }
   0x6   :  { %1642 = vmatprep.mubr.bf16.mxu1 %v1715_v9  ;;  %v1703_v15 = vld [vmem:[%s2214_s0 + $0x20] sm:$0xff]   ;;  %v1718_v16 = vld [vmem:[%s2214_s0 + $0x98] sm:$0xff]   ;;  %v1704_v18 = vld [vmem:[%s2214_s0 + $0x28] sm:$0xff]  }
   0x7   :  { %1597 = vmatpush3.bf16.msra.mxu0 %v1692_v1  ;;  %1683 = vmatpush3.bf16.msra.mxu1 %v1692_v1  ;;  %v1719_v17 = vld [vmem:[%s2214_s0 + $0xa0] sm:$0xff]   ;;  %v1720_v19 = vld [vmem:[%s2214_s0 + $0xa8] sm:$0xff]   ;;  %v1705_v20 = vld [vmem:[%s2214_s0 + $0x30] sm:$0xff]  }
   0x8   :  { %1598 = vmatprep.subr.bf16.mxu0 %v1693_v2  ;;  %1676 = vmatprep.subr.bf16.mxu1 %v1693_v2  ;;  %v1721_v21 = vld [vmem:[%s2214_s0 + $0xb0] sm:$0xff]   ;;  %v1706_v22 = vld [vmem:[%s2214_s0 + $0x38] sm:$0xff]   ;;  %v1707_v24 = vld [vmem:[%s2214_s0 + $0x40] sm:$0xff]  }
   0x9   :  { %v1722_v23 = vld [vmem:[%s2214_s0 + $0xb8] sm:$0xff]   ;;  %v1723_v25 = vld [vmem:[%s2214_s0 + $0xc0] sm:$0xff]   ;;  %v1708_v26 = vld [vmem:[%s2214_s0 + $0x48] sm:$0xff]  }
   0xa   :  { %v1724_v27 = vld [vmem:[%s2214_s0 + $0xc8] sm:$0xff]   ;;  %v1709_v28 = vld [vmem:[%s2214_s0 + $0x50] sm:$0xff]   ;;  %v1710_v30 = vld [vmem:[%s2214_s0 + $0x58] sm:$0xff]  }
   0xb   :  { %1599 = vmatpush3.bf16.msra.mxu0 %v1693_v2  ;;  %1684 = vmatpush3.bf16.msra.mxu1 %v1693_v2  ;;  %v1725_v29 = vld [vmem:[%s2214_s0 + $0xd0] sm:$0xff]   ;;  %v1726_v31 = vld [vmem:[%s2214_s0 + $0xd8] sm:$0xff]   ;;  %v1711_v32 = vld [vmem:[%s2214_s0 + $0x60] sm:$0xff]  }
   0xc   :  { %1600 = vmatprep.subr.bf16.mxu0 %v1694_v3  ;;  %1677 = vmatprep.subr.bf16.mxu1 %v1694_v3  ;;  %v1727_v33 = vld [vmem:[%s2214_s0 + $0xe0] sm:$0xff]   ;;  %v1712_v34 = vld [vmem:[%s2214_s0 + $0x68] sm:$0xff]   ;;  %v1713_v36 = vld [vmem:[%s2214_s0 + $0x70] sm:$0xff]  }
   0xd   :  { %v1728_v35 = vld [vmem:[%s2214_s0 + $0xe8] sm:$0xff]   ;;  %v1729_v37 = vld [vmem:[%s2214_s0 + $0xf0] sm:$0xff]   ;;  %v1714_v38 = vld [vmem:[%s2214_s0 + $0x78] sm:$0xff]  }
   0xe   :  { %v1730_v39 = vld [vmem:[%s2214_s0 + $0xf8] sm:$0xff]  }
   0xf   :  { %1601 = vmatpush3.bf16.msra.mxu0 %v1694_v3  ;;  %1685 = vmatpush3.bf16.msra.mxu1 %v1694_v3 }
  0x10   :  { %1602 = vmatprep.subr.bf16.mxu0 %v1695_v5  ;;  %1678 = vmatprep.subr.bf16.mxu1 %v1695_v5 }
  0x13   :  { %1603 = vmatpush3.bf16.msra.mxu0 %v1695_v5  ;;  %1686 = vmatpush3.bf16.msra.mxu1 %v1695_v5 }
  0x14   :  { %1604 = vmatprep.subr.bf16.mxu0 %v1696_v6  ;;  %1679 = vmatprep.subr.bf16.mxu1 %v1696_v6 }
  0x17   :  { %1605 = vmatpush3.bf16.msra.mxu0 %v1696_v6  ;;  %1687 = vmatpush3.bf16.msra.mxu1 %v1696_v6 }
  0x18   :  { %1606 = vmatprep.subr.bf16.mxu0 %v1697_v7  ;;  %1680 = vmatprep.subr.bf16.mxu1 %v1697_v7 }
  0x1b   :  { %1607 = vmatpush3.bf16.msra.mxu0 %v1697_v7  ;;  %1688 = vmatpush3.bf16.msra.mxu1 %v1697_v7 }
  0x1c   :  { %1608 = vmatprep.subr.bf16.mxu0 %v1698_v8  ;;  %1681 = vmatprep.subr.bf16.mxu1 %v1698_v8 }
  0x1f   :  { %1609 = vmatpush3.bf16.msra.mxu0 %v1698_v8  ;;  %1689 = vmatpush3.bf16.msra.mxu1 %v1698_v8 }
  0x22   :  { %1611 = vmatmul.mubr.bf16.vlgmr.msra.gmra.mxu0 %v1700_v10  ;;  %1643 = vmatmul.mubr.bf16.vlgmr.msra.gmra.mxu1 %v1716_v12 }
  0x23   :  { %1614 = vmatprep.mubr.bf16.mxu0 %v1701_v11  ;;  %1646 = vmatprep.mubr.bf16.mxu1 %v1717_v13 }
  0x2a   :  { %1615 = vmatmul.mubr.bf16.gmra.mxu0 %v1702_v14  ;;  %1647 = vmatmul.mubr.bf16.gmra.mxu1 %v1718_v16 }
  0x2b   :  { %1618 = vmatprep.mubr.bf16.mxu0 %v1703_v15  ;;  %1650 = vmatprep.mubr.bf16.mxu1 %v1719_v17 }
  0x32   :  { %1619 = vmatmul.mubr.bf16.gmra.mxu0 %v1704_v18  ;;  %1651 = vmatmul.mubr.bf16.gmra.mxu1 %v1720_v19 }
  0x33   :  { %1622 = vmatprep.mubr.bf16.mxu0 %v1705_v20  ;;  %1654 = vmatprep.mubr.bf16.mxu1 %v1721_v21 }
  0x3a   :  { %1623 = vmatmul.mubr.bf16.gmra.mxu0 %v1706_v22  ;;  %1655 = vmatmul.mubr.bf16.gmra.mxu1 %v1722_v23 }
  0x3b   :  { %1626 = vmatprep.mubr.bf16.mxu0 %v1707_v24  ;;  %1658 = vmatprep.mubr.bf16.mxu1 %v1723_v25 }
  0x42   :  { %1627 = vmatmul.mubr.bf16.gmra.mxu0 %v1708_v26  ;;  %1659 = vmatmul.mubr.bf16.gmra.mxu1 %v1724_v27 }
  0x43   :  { %1630 = vmatprep.mubr.bf16.mxu0 %v1709_v28  ;;  %1662 = vmatprep.mubr.bf16.mxu1 %v1725_v29 }
  0x4a   :  { %1631 = vmatmul.mubr.bf16.gmra.mxu0 %v1710_v30  ;;  %1663 = vmatmul.mubr.bf16.gmra.mxu1 %v1726_v31 }
  0x4b   :  { %1634 = vmatprep.mubr.bf16.mxu0 %v1711_v32  ;;  %1666 = vmatprep.mubr.bf16.mxu1 %v1727_v33 }
  0x52   :  { %1635 = vmatmul.mubr.bf16.gmra.mxu0 %v1712_v34  ;;  %1667 = vmatmul.mubr.bf16.gmra.mxu1 %v1728_v35 }
  0x53   :  { %1638 = vmatprep.mubr.bf16.mxu0 %v1713_v36  ;;  %1670 = vmatprep.mubr.bf16.mxu1 %v1729_v37 }
  0x5a   :  { %1639 = vmatmul.mubr.bf16.gmra.mxu0 %v1714_v38  ;;  %1671 = vmatmul.mubr.bf16.gmra.mxu1 %v1730_v39 }
  0xe2   :  { %v1612_v40 = vpop.f32.mrf.mxu0  ;;  %v1889_v41 = vpop.f32.mrf.mxu1 }
  0xe3   :  { %v1031_v58 = vmul.f32 %v1612_v40, %v1612_v40 }
  0xe4   :  { %v381_v43 = vpop.f32.mrf.mxu0  ;;  %v1897_v44 = vpop.f32.mrf.mxu1 }
  0xe5   :  { %v1029_v49 = vmul.f32 %v381_v43, %v381_v43 }
  0xe6   :  { %v1613_v45 = vpop.f32.mrf.mxu0  ;;  %v1899_v46 = vpop.f32.mrf.mxu1 }
  0xe7   :  { %v1371_v47 = vpack.c.bf16 %v1613_v45, %v1612_v40  ;;  %v1451_v48 = vpack.c.bf16 %v1899_v46, %v1889_v41  ;;  %v1032_v63 = vmul.f32 %v1613_v45, %v1613_v45 }
  0xe8   :  { %v384_v50 = vpop.f32.mrf.mxu0  ;;  %v1903_v51 = vpop.f32.mrf.mxu1 }
  0xe9   :  { %1523 = vst [vmem:[%s2217_s4 + $0x8] sm:$0xff] %v1371_v47   ;;  %v1366_v52 = vpack.c.bf16 %v384_v50, %v381_v43  ;;  %v957_v53 = vadd.f32 %v384_v50, %v381_v43  ;;  %v1030_v54 = vmul.f32 %v384_v50, %v384_v50  ;;  %1539 = vst [vmem:[%s2217_s4 + $0x88] sm:$0xff] %v1451_v48  }
  0xea   :  { %v1446_v55 = vpack.c.bf16 %v1903_v51, %v1897_v44  ;;  %v1616_v56 = vpop.f32.mrf.mxu0  ;;  %v1913_v57 = vpop.f32.mrf.mxu1 }
  0xeb   :  { %1367 = vst [vmem:[%s2217_s4] sm:$0xff] %v1366_v52   ;;  %v958_v59 = vadd.f32 %v1612_v40, %v957_v53  ;;  %v1093_v60 = vadd.f32 %v1030_v54, %v1029_v49  ;;  %v1035_v18 = vmul.f32 %v1616_v56, %v1616_v56 }
  0xec   :  { %1538 = vst [vmem:[%s2217_s4 + $0x80] sm:$0xff] %v1446_v55   ;;  %v397_v61 = vpop.f32.mrf.mxu0  ;;  %v1921_v62 = vpop.f32.mrf.mxu1 }
  0xed   :  { %v1094_v0 = vadd.f32 %v1093_v60, %v1031_v58  ;;  %v959_v1 = vadd.f32 %v1613_v45, %v958_v59  ;;  %v1033_v5 = vmul.f32 %v397_v61, %v397_v61 }
  0xee   :  { %v1617_v2 = vpop.f32.mrf.mxu0  ;;  %v1923_v3 = vpop.f32.mrf.mxu1 }
  0xef   :  { %v960_v4 = vadd.f32 %v959_v1, %v397_v61  ;;  %v1095_v6 = vadd.f32 %v1094_v0, %v1032_v63  ;;  %v1381_v7 = vpack.c.bf16 %v1617_v2, %v1616_v56  ;;  %v1461_v9 = vpack.c.bf16 %v1923_v3, %v1913_v57 }
  0xf0   :  { %v400_v8 = vpop.f32.mrf.mxu0  ;;  %v1927_v10 = vpop.f32.mrf.mxu1  ;;  %v1036_v23 = vmul.f32 %v1617_v2, %v1617_v2 }
  0xf1   :  { %v1096_v11 = vadd.f32 %v1095_v6, %v1033_v5  ;;  %1525 = vst [vmem:[%s2217_s4 + $0x18] sm:$0xff] %v1381_v7   ;;  %v1376_v12 = vpack.c.bf16 %v400_v8, %v397_v61  ;;  %v961_v13 = vadd.f32 %v960_v4, %v400_v8  ;;  %v1034_v14 = vmul.f32 %v400_v8, %v400_v8 }
  0xf2   :  { %v1620_v15 = vpop.f32.mrf.mxu0  ;;  %1541 = vst [vmem:[%s2217_s4 + $0x98] sm:$0xff] %v1461_v9   ;;  %v1456_v16 = vpack.c.bf16 %v1927_v10, %v1921_v62  ;;  %v1937_v17 = vpop.f32.mrf.mxu1 }
  0xf3   :  { %1524 = vst [vmem:[%s2217_s4 + $0x10] sm:$0xff] %v1376_v12   ;;  %v962_v19 = vadd.f32 %v1616_v56, %v961_v13  ;;  %v1097_v20 = vadd.f32 %v1096_v11, %v1034_v14  ;;  %v1039_v43 = vmul.f32 %v1620_v15, %v1620_v15 }
  0xf4   :  { %v413_v21 = vpop.f32.mrf.mxu0  ;;  %1540 = vst [vmem:[%s2217_s4 + $0x90] sm:$0xff] %v1456_v16   ;;  %v1945_v22 = vpop.f32.mrf.mxu1 }
  0xf5   :  { %v1098_v24 = vadd.f32 %v1097_v20, %v1035_v18  ;;  %v963_v25 = vadd.f32 %v1617_v2, %v962_v19  ;;  %v1037_v29 = vmul.f32 %v413_v21, %v413_v21 }
  0xf6   :  { %v1621_v26 = vpop.f32.mrf.mxu0  ;;  %v1947_v27 = vpop.f32.mrf.mxu1 }
  0xf7   :  { %v964_v28 = vadd.f32 %v963_v25, %v413_v21  ;;  %v1099_v30 = vadd.f32 %v1098_v24, %v1036_v23  ;;  %v1391_v31 = vpack.c.bf16 %v1621_v26, %v1620_v15  ;;  %v1471_v33 = vpack.c.bf16 %v1947_v27, %v1937_v17 }
  0xf8   :  { %v416_v32 = vpop.f32.mrf.mxu0  ;;  %v1951_v34 = vpop.f32.mrf.mxu1  ;;  %v1040_v50 = vmul.f32 %v1621_v26, %v1621_v26 }
  0xf9   :  { %v1100_v35 = vadd.f32 %v1099_v30, %v1037_v29  ;;  %1527 = vst [vmem:[%s2217_s4 + $0x28] sm:$0xff] %v1391_v31   ;;  %v1386_v36 = vpack.c.bf16 %v416_v32, %v413_v21  ;;  %v965_v37 = vadd.f32 %v964_v28, %v416_v32  ;;  %v1038_v38 = vmul.f32 %v416_v32, %v416_v32 }
  0xfa   :  { %v1624_v39 = vpop.f32.mrf.mxu0  ;;  %1543 = vst [vmem:[%s2217_s4 + $0xa8] sm:$0xff] %v1471_v33   ;;  %v1466_v40 = vpack.c.bf16 %v1951_v34, %v1945_v22  ;;  %v1961_v42 = vpop.f32.mrf.mxu1 }
  0xfb   :  { %1526 = vst [vmem:[%s2217_s4 + $0x20] sm:$0xff] %v1386_v36   ;;  %v966_v45 = vadd.f32 %v1620_v15, %v965_v37  ;;  %v1101_v47 = vadd.f32 %v1100_v35, %v1038_v38  ;;  %v1043_v9 = vmul.f32 %v1624_v39, %v1624_v39 }
  0xfc   :  { %v429_v48 = vpop.f32.mrf.mxu0  ;;  %1542 = vst [vmem:[%s2217_s4 + $0xa0] sm:$0xff] %v1466_v40   ;;  %v1969_v49 = vpop.f32.mrf.mxu1 }
  0xfd   :  { %v1102_v52 = vadd.f32 %v1101_v47, %v1039_v43  ;;  %v967_v53 = vadd.f32 %v1621_v26, %v966_v45  ;;  %v1041_v58 = vmul.f32 %v429_v48, %v429_v48 }
  0xfe   :  { %v1625_v54 = vpop.f32.mrf.mxu0  ;;  %v1971_v55 = vpop.f32.mrf.mxu1 }
  0xff   :  { %v968_v56 = vadd.f32 %v967_v53, %v429_v48  ;;  %v1103_v59 = vadd.f32 %v1102_v52, %v1040_v50  ;;  %v1401_v60 = vpack.c.bf16 %v1625_v54, %v1624_v39  ;;  %v1481_v63 = vpack.c.bf16 %v1971_v55, %v1961_v42 }
 0x100   :  { %v432_v61 = vpop.f32.mrf.mxu0  ;;  %v1975_v0 = vpop.f32.mrf.mxu1  ;;  %v1044_v15 = vmul.f32 %v1625_v54, %v1625_v54 }
 0x101   :  { %v1104_v1 = vadd.f32 %v1103_v59, %v1041_v58  ;;  %1529 = vst [vmem:[%s2217_s4 + $0x38] sm:$0xff] %v1401_v60   ;;  %v1396_v2 = vpack.c.bf16 %v432_v61, %v429_v48  ;;  %v969_v4 = vadd.f32 %v968_v56, %v432_v61  ;;  %v1042_v5 = vmul.f32 %v432_v61, %v432_v61 }
 0x102   :  { %v1628_v6 = vpop.f32.mrf.mxu0  ;;  %1545 = vst [vmem:[%s2217_s4 + $0xb8] sm:$0xff] %v1481_v63   ;;  %v1476_v7 = vpack.c.bf16 %v1975_v0, %v1969_v49  ;;  %v1985_v8 = vpop.f32.mrf.mxu1 }
 0x103   :  { %1528 = vst [vmem:[%s2217_s4 + $0x30] sm:$0xff] %v1396_v2   ;;  %v970_v11 = vadd.f32 %v1624_v39, %v969_v4  ;;  %v1105_v12 = vadd.f32 %v1104_v1, %v1042_v5  ;;  %v1047_v38 = vmul.f32 %v1628_v6, %v1628_v6 }
 0x104   :  { %v445_v13 = vpop.f32.mrf.mxu0  ;;  %1544 = vst [vmem:[%s2217_s4 + $0xb0] sm:$0xff] %v1476_v7   ;;  %v1993_v14 = vpop.f32.mrf.mxu1 }
 0x105   :  { %v1106_v16 = vadd.f32 %v1105_v12, %v1043_v9  ;;  %v971_v18 = vadd.f32 %v1625_v54, %v970_v11  ;;  %v1045_v23 = vmul.f32 %v445_v13, %v445_v13 }
 0x106   :  { %v1629_v19 = vpop.f32.mrf.mxu0  ;;  %v1995_v20 = vpop.f32.mrf.mxu1 }
 0x107   :  { %v972_v21 = vadd.f32 %v971_v18, %v445_v13  ;;  %v1107_v24 = vadd.f32 %v1106_v16, %v1044_v15  ;;  %v1411_v25 = vpack.c.bf16 %v1629_v19, %v1628_v6  ;;  %v1491_v28 = vpack.c.bf16 %v1995_v20, %v1985_v8 }
 0x108   :  { %v448_v26 = vpop.f32.mrf.mxu0  ;;  %v1999_v29 = vpop.f32.mrf.mxu1  ;;  %v1048_v47 = vmul.f32 %v1629_v19, %v1629_v19 }
 0x109   :  { %v1108_v30 = vadd.f32 %v1107_v24, %v1045_v23  ;;  %1531 = vst [vmem:[%s2217_s4 + $0x48] sm:$0xff] %v1411_v25   ;;  %v1406_v31 = vpack.c.bf16 %v448_v26, %v445_v13  ;;  %v973_v32 = vadd.f32 %v972_v21, %v448_v26  ;;  %v1046_v33 = vmul.f32 %v448_v26, %v448_v26 }
 0x10a   :  { %v1632_v35 = vpop.f32.mrf.mxu0  ;;  %1547 = vst [vmem:[%s2217_s4 + $0xc8] sm:$0xff] %v1491_v28   ;;  %v1486_v36 = vpack.c.bf16 %v1999_v29, %v1993_v14  ;;  %v2009_v37 = vpop.f32.mrf.mxu1 }
 0x10b   :  { %1530 = vst [vmem:[%s2217_s4 + $0x40] sm:$0xff] %v1406_v31   ;;  %v974_v39 = vadd.f32 %v1628_v6, %v973_v32  ;;  %v1109_v40 = vadd.f32 %v1108_v30, %v1046_v33  ;;  %v1051_v11 = vmul.f32 %v1632_v35, %v1632_v35 }
 0x10c   :  { %v461_v43 = vpop.f32.mrf.mxu0  ;;  %1546 = vst [vmem:[%s2217_s4 + $0xc0] sm:$0xff] %v1486_v36   ;;  %v2017_v45 = vpop.f32.mrf.mxu1 }
 0x10d   :  { %v1110_v48 = vadd.f32 %v1109_v40, %v1047_v38  ;;  %v975_v50 = vadd.f32 %v1629_v19, %v974_v39  ;;  %v1049_v56 = vmul.f32 %v461_v43, %v461_v43 }
 0x10e   :  { %v1633_v52 = vpop.f32.mrf.mxu0  ;;  %v2019_v53 = vpop.f32.mrf.mxu1 }
 0x10f   :  { %v976_v54 = vadd.f32 %v975_v50, %v461_v43  ;;  %v1111_v58 = vadd.f32 %v1110_v48, %v1048_v47  ;;  %v1421_v59 = vpack.c.bf16 %v1633_v52, %v1632_v35  ;;  %v1501_v61 = vpack.c.bf16 %v2019_v53, %v2009_v37 }
 0x110   :  { %v464_v60 = vpop.f32.mrf.mxu0  ;;  %v2023_v63 = vpop.f32.mrf.mxu1  ;;  %v1052_v18 = vmul.f32 %v1633_v52, %v1633_v52 }
 0x111   :  { %v1112_v1 = vadd.f32 %v1111_v58, %v1049_v56  ;;  %1533 = vst [vmem:[%s2217_s4 + $0x58] sm:$0xff] %v1421_v59   ;;  %v1416_v2 = vpack.c.bf16 %v464_v60, %v461_v43  ;;  %v977_v4 = vadd.f32 %v976_v54, %v464_v60  ;;  %v1050_v5 = vmul.f32 %v464_v60, %v464_v60 }
 0x112   :  { %v1636_v6 = vpop.f32.mrf.mxu0  ;;  %1549 = vst [vmem:[%s2217_s4 + $0xd8] sm:$0xff] %v1501_v61   ;;  %v1496_v7 = vpack.c.bf16 %v2023_v63, %v2017_v45  ;;  %v2033_v9 = vpop.f32.mrf.mxu1 }
 0x113   :  { %1532 = vst [vmem:[%s2217_s4 + $0x50] sm:$0xff] %v1416_v2   ;;  %v978_v12 = vadd.f32 %v1632_v35, %v977_v4  ;;  %v1113_v13 = vadd.f32 %v1112_v1, %v1050_v5  ;;  %v1055_v48 = vmul.f32 %v1636_v6, %v1636_v6 }
 0x114   :  { %v477_v15 = vpop.f32.mrf.mxu0  ;;  %1548 = vst [vmem:[%s2217_s4 + $0xd0] sm:$0xff] %v1496_v7   ;;  %v2041_v16 = vpop.f32.mrf.mxu1 }
 0x115   :  { %v1114_v19 = vadd.f32 %v1113_v13, %v1051_v11  ;;  %v979_v21 = vadd.f32 %v1633_v52, %v978_v12  ;;  %v1053_v26 = vmul.f32 %v477_v15, %v477_v15 }
 0x116   :  { %v1637_v23 = vpop.f32.mrf.mxu0  ;;  %v2043_v24 = vpop.f32.mrf.mxu1 }
 0x117   :  { %v980_v25 = vadd.f32 %v979_v21, %v477_v15  ;;  %v1115_v28 = vadd.f32 %v1114_v19, %v1052_v18  ;;  %v1431_v30 = vpack.c.bf16 %v1637_v23, %v1636_v6  ;;  %v1511_v32 = vpack.c.bf16 %v2043_v24, %v2033_v9 }
 0x118   :  { %v480_v31 = vpop.f32.mrf.mxu0  ;;  %v2047_v33 = vpop.f32.mrf.mxu1  ;;  %v1056_v58 = vmul.f32 %v1637_v23, %v1637_v23 }
 0x119   :  { %v1116_v35 = vadd.f32 %v1115_v28, %v1053_v26  ;;  %1535 = vst [vmem:[%s2217_s4 + $0x68] sm:$0xff] %v1431_v30   ;;  %v1426_v36 = vpack.c.bf16 %v480_v31, %v477_v15  ;;  %v981_v38 = vadd.f32 %v980_v25, %v480_v31  ;;  %v1054_v39 = vmul.f32 %v480_v31, %v480_v31 }
 0x11a   :  { %v1640_v40 = vpop.f32.mrf.mxu0  ;;  %1551 = vst [vmem:[%s2217_s4 + $0xe8] sm:$0xff] %v1511_v32   ;;  %v1506_v43 = vpack.c.bf16 %v2047_v33, %v2041_v16  ;;  %v2057_v47 = vpop.f32.mrf.mxu1  ;;  %v1061_v32 = vmul.f32 %v1897_v44, %v1897_v44 }
 0x11b   :  { %1534 = vst [vmem:[%s2217_s4 + $0x60] sm:$0xff] %v1426_v36   ;;  %v982_v50 = vadd.f32 %v1636_v6, %v981_v38  ;;  %v1117_v52 = vadd.f32 %v1116_v35, %v1054_v39  ;;  %v1062_v39 = vmul.f32 %v1903_v51, %v1903_v51 }
 0x11c   :  { %v493_v54 = vpop.f32.mrf.mxu0  ;;  %1550 = vst [vmem:[%s2217_s4 + $0xe0] sm:$0xff] %v1506_v43   ;;  %v2065_v56 = vpop.f32.mrf.mxu1  ;;  %v1063_v43 = vmul.f32 %v1889_v41, %v1889_v41 }
 0x11d   :  { %v1118_v59 = vadd.f32 %v1117_v52, %v1055_v48  ;;  %v983_v60 = vadd.f32 %v1637_v23, %v982_v50  ;;  %v1057_v4 = vmul.f32 %v493_v54, %v493_v54  ;;  %v1059_v23 = vmul.f32 %v1640_v40, %v1640_v40 }
 0x11e   :  { %v1641_v61 = vpop.f32.mrf.mxu0  ;;  %v2067_v1 = vpop.f32.mrf.mxu1  ;;  %v1064_v52 = vmul.f32 %v1899_v46, %v1899_v46 }
 0x11f   :  { %v984_v2 = vadd.f32 %v983_v60, %v493_v54  ;;  %v1119_v5 = vadd.f32 %v1118_v59, %v1056_v58  ;;  %v1441_v7 = vpack.c.bf16 %v1641_v61, %v1640_v40  ;;  %v1521_v6 = vpack.c.bf16 %v2067_v1, %v2057_v47 }
 0x120   :  { %v496_v11 = vpop.f32.mrf.mxu0  ;;  %v2071_v12 = vpop.f32.mrf.mxu1  ;;  %v1060_v28 = vmul.f32 %v1641_v61, %v1641_v61  ;;  %v1065_v59 = vmul.f32 %v1921_v62, %v1921_v62 }
 0x121   :  { %v1120_v13 = vadd.f32 %v1119_v5, %v1057_v4  ;;  %1537 = vst [vmem:[%s2217_s4 + $0x78] sm:$0xff] %v1441_v7   ;;  %v1436_v15 = vpack.c.bf16 %v496_v11, %v493_v54  ;;  %v985_v18 = vadd.f32 %v984_v2, %v496_v11  ;;  %v1058_v19 = vmul.f32 %v496_v11, %v496_v11 }
 0x122   :  { %1553 = vst [vmem:[%s2217_s4 + $0xf8] sm:$0xff] %v1521_v6   ;;  %v1516_v21 = vpack.c.bf16 %v2071_v12, %v2065_v56  ;;  %v1066_v2 = vmul.f32 %v1927_v10, %v1927_v10  ;;  %v1069_v6 = vmul.f32 %v1945_v22, %v1945_v22 }
 0x123   :  { %1536 = vst [vmem:[%s2217_s4 + $0x70] sm:$0xff] %v1436_v15   ;;  %v986_v25 = vadd.f32 %v1640_v40, %v985_v18  ;;  %v1121_v26 = vadd.f32 %v1120_v13, %v1058_v19  ;;  %v1070_v18 = vmul.f32 %v1951_v34, %v1951_v34 }
 0x124   :  { %1552 = vst [vmem:[%s2217_s4 + $0xf0] sm:$0xff] %v1516_v21  }
 0x125   :  { %v987_v30 = vadd.f32 %v1641_v61, %v986_v25  ;;  %v1122_v31 = vadd.f32 %v1121_v26, %v1059_v23  ;;  %v1073_v26 = vmul.f32 %v1969_v49, %v1969_v49 }
 0x127   :  { %v1123_v35 = vadd.f32 %v1122_v31, %v1060_v28  ;;  %v988_v36 = vadd.f32 %v987_v30, %v1897_v44  ;;  %v1074_v31 = vmul.f32 %v1975_v0, %v1975_v0 }
 0x129   :  { %v989_v38 = vadd.f32 %v988_v36, %v1903_v51  ;;  %v1124_v40 = vadd.f32 %v1123_v35, %v1061_v32 }
 0x12b   :  { %v990_v48 = vadd.f32 %v1889_v41, %v989_v38  ;;  %v1125_v50 = vadd.f32 %v1124_v40, %v1062_v39  ;;  %v1067_v41 = vmul.f32 %v1913_v57, %v1913_v57  ;;  %v1077_v39 = vmul.f32 %v1993_v14, %v1993_v14 }
 0x12d   :  { %v1126_v54 = vadd.f32 %v1125_v50, %v1063_v43  ;;  %v991_v58 = vadd.f32 %v1899_v46, %v990_v48  ;;  %v1068_v46 = vmul.f32 %v1923_v3, %v1923_v3  ;;  %v1078_v48 = vmul.f32 %v1999_v29, %v1999_v29 }
 0x12f   :  { %v992_v44 = vadd.f32 %v991_v58, %v1921_v62  ;;  %v1127_v60 = vadd.f32 %v1126_v54, %v1064_v52 }
 0x131   :  { %v1128_v51 = vadd.f32 %v1127_v60, %v1065_v59  ;;  %v993_v61 = vadd.f32 %v992_v44, %v1927_v10  ;;  %v1081_v44 = vmul.f32 %v2017_v45, %v2017_v45 }
 0x133   :  { %v994_v4 = vadd.f32 %v1913_v57, %v993_v61  ;;  %v1129_v5 = vadd.f32 %v1128_v51, %v1066_v2  ;;  %v1071_v57 = vmul.f32 %v1937_v17, %v1937_v17  ;;  %v1082_v51 = vmul.f32 %v2023_v63, %v2023_v63 }
 0x135   :  { %v1130_v7 = vadd.f32 %v1129_v5, %v1067_v41  ;;  %v995_v11 = vadd.f32 %v1923_v3, %v994_v4  ;;  %v1072_v3 = vmul.f32 %v1947_v27, %v1947_v27  ;;  %v1085_v5 = vmul.f32 %v2041_v16, %v2041_v16 }
 0x137   :  { %v996_v62 = vadd.f32 %v995_v11, %v1945_v22  ;;  %v1131_v13 = vadd.f32 %v1130_v7, %v1068_v46  ;;  %v1086_v11 = vmul.f32 %v2047_v33, %v2047_v33 }
 0x139   :  { %v1132_v15 = vadd.f32 %v1131_v13, %v1069_v6  ;;  %v997_v10 = vadd.f32 %v996_v62, %v1951_v34 }
 0x13b   :  { %v998_v19 = vadd.f32 %v1937_v17, %v997_v10  ;;  %v1133_v21 = vadd.f32 %v1132_v15, %v1070_v18  ;;  %v1075_v17 = vmul.f32 %v1961_v42, %v1961_v42  ;;  %v1089_v10 = vmul.f32 %v2065_v56, %v2065_v56 }
 0x13d   :  { %v1134_v23 = vadd.f32 %v1133_v21, %v1071_v57  ;;  %v999_v25 = vadd.f32 %v1947_v27, %v998_v19  ;;  %v1076_v27 = vmul.f32 %v1971_v55, %v1971_v55  ;;  %v1090_v19 = vmul.f32 %v2071_v12, %v2071_v12 }
 0x13f   :  { %v1000_v22 = vadd.f32 %v999_v25, %v1969_v49  ;;  %v1135_v28 = vadd.f32 %v1134_v23, %v1072_v3 }
 0x141   :  { %v1136_v30 = vadd.f32 %v1135_v28, %v1073_v26  ;;  %v1001_v34 = vadd.f32 %v1000_v22, %v1975_v0 }
 0x143   :  { %v1002_v32 = vadd.f32 %v1961_v42, %v1001_v34  ;;  %v1137_v35 = vadd.f32 %v1136_v30, %v1074_v31  ;;  %v1079_v42 = vmul.f32 %v1985_v8, %v1985_v8 }
 0x145   :  { %v1138_v36 = vadd.f32 %v1137_v35, %v1075_v17  ;;  %v1003_v38 = vadd.f32 %v1971_v55, %v1002_v32  ;;  %v1080_v55 = vmul.f32 %v1995_v20, %v1995_v20 }
 0x147   :  { %v1004_v49 = vadd.f32 %v1003_v38, %v1993_v14  ;;  %v1139_v40 = vadd.f32 %v1138_v36, %v1076_v27 }
 0x149   :  { %v1140_v43 = vadd.f32 %v1139_v40, %v1077_v39  ;;  %v1005_v0 = vadd.f32 %v1004_v49, %v1999_v29 }
 0x14b   :  { %v1006_v50 = vadd.f32 %v1985_v8, %v1005_v0  ;;  %v1141_v52 = vadd.f32 %v1140_v43, %v1078_v48  ;;  %v1083_v8 = vmul.f32 %v2009_v37, %v2009_v37 }
 0x14d   :  { %v1142_v54 = vadd.f32 %v1141_v52, %v1079_v42  ;;  %v1007_v58 = vadd.f32 %v1995_v20, %v1006_v50  ;;  %v1084_v20 = vmul.f32 %v2019_v53, %v2019_v53 }
 0x14f   :  { %v1008_v14 = vadd.f32 %v1007_v58, %v2017_v45  ;;  %v1143_v59 = vadd.f32 %v1142_v54, %v1080_v55  ;;  %v1176_v55 = vld [vmem:[%s2218_s2] sm:$0x1] }
 0x151   :  { %v1144_v60 = vadd.f32 %v1143_v59, %v1081_v44  ;;  %v1009_v29 = vadd.f32 %v1008_v14, %v2023_v63  ;;  %v1179_v14 = vld [vmem:[%s2219_s3] sm:$0x1] }
 0x153   :  { %v1010_v61 = vadd.f32 %v2009_v37, %v1009_v29  ;;  %v1145_v2 = vadd.f32 %v1144_v60, %v1082_v51  ;;  %v1087_v37 = vmul.f32 %v2033_v9, %v2033_v9 }
 0x155   :  { %v1146_v41 = vadd.f32 %v1145_v2, %v1083_v8  ;;  %v1011_v4 = vadd.f32 %v2019_v53, %v1010_v61  ;;  %v1088_v53 = vmul.f32 %v2043_v24, %v2043_v24 }
 0x157   :  { %v1012_v45 = vadd.f32 %v1011_v4, %v2041_v16  ;;  %v1147_v46 = vadd.f32 %v1146_v41, %v1084_v20 }
 0x159   :  { %v1148_v7 = vadd.f32 %v1147_v46, %v1085_v5  ;;  %v1013_v63 = vadd.f32 %v1012_v45, %v2047_v33 }
 0x15b   :  { %v1014_v62 = vadd.f32 %v2033_v9, %v1013_v63  ;;  %v1149_v6 = vadd.f32 %v1148_v7, %v1086_v11  ;;  %v1091_v9 = vmul.f32 %v2057_v47, %v2057_v47 }
 0x15d   :  { %v1150_v13 = vadd.f32 %v1149_v6, %v1087_v37  ;;  %v1015_v15 = vadd.f32 %v2043_v24, %v1014_v62  ;;  %v1092_v24 = vmul.f32 %v2067_v1, %v2067_v1 }
 0x15f   :  { %v1016_v16 = vadd.f32 %v1015_v15, %v2065_v56  ;;  %v1151_v18 = vadd.f32 %v1150_v13, %v1088_v53 }
 0x161   :  { %v1152_v57 = vadd.f32 %v1151_v18, %v1089_v10  ;;  %v1017_v33 = vadd.f32 %v1016_v16, %v2071_v12 }
 0x163   :  { %v1018_v21 = vadd.f32 %v2057_v47, %v1017_v33  ;;  %v1153_v3 = vadd.f32 %v1152_v57, %v1090_v19  ;;  %v956_v47 = vld [vmem:[%s2215_s5] sm:$0x1] }
 0x165   :  { %v1019_v23 = vadd.f32 %v2067_v1, %v1018_v21  ;;  %v1154_v25 = vadd.f32 %v1153_v3, %v1091_v9  ;;  %v1028_v1 = vld [vmem:[%s2216_s6] sm:$0x1] }
 0x167   :  { %v1020_v56 = vrot.slane %v1019_v23, 4  ;;  %v1155_v22 = vadd.f32 %v1154_v25, %v1092_v24 }
 0x169   :  { %v1021_v26 = vadd.f32 %v1020_v56, %v1019_v23  ;;  %v1156_v28 = vrot.slane %v1155_v22, 4 }
 0x16b   :  { %v1022_v30 = vrot.slane %v1021_v26, 2  ;;  %v1157_v34 = vadd.f32 %v1156_v28, %v1155_v22 }
 0x16d   :  { %v1023_v31 = vadd.f32 %v1022_v30, %v1021_v26  ;;  %v1158_v12 = vrot.slane %v1157_v34, 2 }
 0x16f   :  { %v1024_v17 = vrot.slane %v1023_v31, 1  ;;  %v1159_v32 = vadd.f32 %v1158_v12, %v1157_v34 }
 0x171   :  { %v1025_v35 = vadd.f32 %v1024_v17, %v1023_v31  ;;  %v1160_v27 = vrot.slane %v1159_v32, 1 }
 0x173   :  { %v1026_v36 = vadd.f32 %v1025_v35, %v956_v47  ;;  %v1161_v38 = vadd.f32 %v1160_v27, %v1159_v32 }
 0x175   :  { %1027 = vst [vmem:[%s2215_s5] sm:$0x1] %v1026_v36  ;;  %v1162_v49 = vadd.f32 %v1161_v38, %v1028_v1 }
 0x177   :  { %1163 = vst [vmem:[%s2216_s6] sm:$0x1] %v1162_v49 }
 0x17c   :  { %v1167_v39 = vld [vmem:[%s2215_s5] sm:$0x1] }
 0x17d   :  { %v1168_v40 = vmul.f32 0.001953125, %v1167_v39 }
 0x17e   :  { %v1169_v43 = vld [vmem:[%s2216_s6] sm:$0x1] }
 0x17f   :  { %v1170_v0 = vmul.f32 0.001953125, %v1169_v43  ;;  %v1171_v48 = vmul.f32 %v1168_v40, %v1168_v40 }
 0x181   :  { %v1172_v42 = vsub.f32 %v1170_v0, %v1171_v48 }
 0x183   :  { %v1173_v50 = vmax.f32 %v1172_v42, 0.0 }
 0x185   :  { %v1174_v52 = vadd.f32 1e-05, %v1173_v50 }
 0x187   :  { %1731 = vrsqrt.f32 %v1174_v52 }
 0x194   :  { %v1732_v54 = vpop.eup %1731 }
 0x195   :  { %v1177_v58 = vmul.f32 %v1732_v54, %v1176_v55 }
 0x197   :  { %1178 = vst [vmem:[%s2215_s5] sm:$0x1] %v1177_v58  ;;  %v1180_v44 = vmul.f32 %v1177_v58, %v1168_v40 }
 0x199   :  { %v1181_v59 = vsub.f32 %v1179_v14, %v1180_v44 }
 0x19b   :  { %1182 = vst [vmem:[%s2216_s6] sm:$0x1] %v1181_v59 }

// kernel: _lambda_.10
= control target key start
LH: loop header
LB: loop body
LE: loop exit
PB: predicated region body
PF: predicated region fallthrough
CT: control target
= control target key end

     0   :  { %s1566_s0 = inlined_call_operand.vmem [shape: bf16[512,128], index: 0, kind: input, shape index: {}]   ;;  %s1567_s1 = inlined_call_operand.vmem [shape: f32[1,128], index: 1, kind: input, shape index: {}]   ;;  %s1568_s2 = inlined_call_operand.vmem [shape: f32[1,128], index: 2, kind: input, shape index: {}]   ;;  %s1569_s3 = inlined_call_operand.vmem [shape: bf16[512,128], index: 3, kind: output, shape index: {}]  }
   0x1   :  { %v867_v0 = vld [vmem:[%s1566_s0] sm:$0xff]   ;;  %v1154_v4 = vld [vmem:[%s1566_s0 + $0x8] sm:$0xff]   ;;  %v1155_v5 = vld [vmem:[%s1566_s0 + $0x10] sm:$0xff]  }
   0x2   :  { %v1242_v1 = vld [vmem:[%s1567_s1] ss:$0 sm:$0xff]  ;;  %v868_v2 = vunpack.c.l.bf16 %v867_v0  ;;  %v869_v3 = vunpack.c.h.bf16 %v867_v0  ;;  %v1156_v6 = vld [vmem:[%s1566_s0 + $0x18] sm:$0xff]   ;;  %v872_v8 = vunpack.c.l.bf16 %v1154_v4  ;;  %v873_v9 = vunpack.c.h.bf16 %v1154_v4  ;;  %v1158_v41 = vld [vmem:[%s1566_s0 + $0x28] sm:$0xff]  }
   0x3   :  { %v1256_v7 = vld [vmem:[%s1568_s2] ss:$0 sm:$0xff]  ;;  %v876_v10 = vunpack.c.l.bf16 %v1155_v5  ;;  %v877_v11 = vunpack.c.h.bf16 %v1155_v5  ;;  %v880_v14 = vunpack.c.l.bf16 %v1156_v6  ;;  %v881_v15 = vunpack.c.h.bf16 %v1156_v6  ;;  %v1159_v46 = vld [vmem:[%s1566_s0 + $0x30] sm:$0xff]   ;;  %v1160_v55 = vld [vmem:[%s1566_s0 + $0x38] sm:$0xff]  }
   0x4   :  { %v149_v12 = vmul.f32 %v868_v2, %v1242_v1  ;;  %v150_v13 = vmul.f32 %v869_v3, %v1242_v1  ;;  %v151_v16 = vmul.f32 %v872_v8, %v1242_v1  ;;  %v152_v17 = vmul.f32 %v873_v9, %v1242_v1  ;;  %v1157_v24 = vld [vmem:[%s1566_s0 + $0x20] sm:$0xff]  }
   0x5   :  { %v153_v18 = vmul.f32 %v876_v10, %v1242_v1  ;;  %v154_v19 = vmul.f32 %v877_v11, %v1242_v1  ;;  %v155_v22 = vmul.f32 %v880_v14, %v1242_v1  ;;  %v156_v23 = vmul.f32 %v881_v15, %v1242_v1  ;;  %v1161_v14 = vld [vmem:[%s1566_s0 + $0x40] sm:$0xff]  }
   0x6   :  { %v220_v20 = vadd.f32 %v1256_v7, %v149_v12  ;;  %v221_v21 = vadd.f32 %v1256_v7, %v150_v13  ;;  %v222_v25 = vadd.f32 %v1256_v7, %v151_v16  ;;  %v223_v26 = vadd.f32 %v1256_v7, %v152_v17 }
   0x7   :  { %v224_v27 = vadd.f32 %v1256_v7, %v153_v18  ;;  %v225_v28 = vadd.f32 %v1256_v7, %v154_v19  ;;  %v226_v31 = vadd.f32 %v1256_v7, %v155_v22  ;;  %v227_v32 = vadd.f32 %v1256_v7, %v156_v23 }
   0x8   :  { %v284_v29 = vmul.f32 0.2, %v220_v20  ;;  %v285_v30 = vmul.f32 0.2, %v221_v21  ;;  %v286_v33 = vmul.f32 0.2, %v222_v25  ;;  %v884_v36 = vunpack.c.l.bf16 %v1157_v24 }
   0x9   :  { %v287_v34 = vmul.f32 0.2, %v223_v26  ;;  %v288_v35 = vmul.f32 0.2, %v224_v27  ;;  %v289_v39 = vmul.f32 0.2, %v225_v28  ;;  %v885_v50 = vunpack.c.h.bf16 %v1157_v24 }
   0xa   :  { %v348_v37 = vmax.f32 %v220_v20, %v284_v29  ;;  %v349_v38 = vmax.f32 %v221_v21, %v285_v30  ;;  %v290_v40 = vmul.f32 0.2, %v226_v31  ;;  %v350_v42 = vmax.f32 %v222_v25, %v286_v33 }
   0xb   :  { %v351_v43 = vmax.f32 %v223_v26, %v287_v34  ;;  %v352_v44 = vmax.f32 %v224_v27, %v288_v35  ;;  %v291_v45 = vmul.f32 0.2, %v227_v32  ;;  %v353_v48 = vmax.f32 %v225_v28, %v289_v39  ;;  %v1162_v27 = vld [vmem:[%s1566_s0 + $0x48] sm:$0xff]  }
   0xc   :  { %v997_v47 = vpack.c.bf16 %v349_v38, %v348_v37  ;;  %v354_v49 = vmax.f32 %v226_v31, %v290_v40  ;;  %v157_v53 = vmul.f32 %v884_v36, %v1242_v1  ;;  %v888_v54 = vunpack.c.l.bf16 %v1158_v41  ;;  %v1163_v36 = vld [vmem:[%s1566_s0 + $0x50] sm:$0xff]  }
   0xd   :  { %v1002_v51 = vpack.c.bf16 %v351_v43, %v350_v42  ;;  %v355_v52 = vmax.f32 %v227_v32, %v291_v45  ;;  %v1007_v56 = vpack.c.bf16 %v353_v48, %v352_v44  ;;  %v158_v57 = vmul.f32 %v885_v50, %v1242_v1 }
   0xe   :  { %998 = vst [vmem:[%s1569_s3] sm:$0xff] %v997_v47   ;;  %v889_v58 = vunpack.c.h.bf16 %v1158_v41  ;;  %v892_v59 = vunpack.c.l.bf16 %v1159_v46  ;;  %v228_v61 = vadd.f32 %v1256_v7, %v157_v53  ;;  %v159_v62 = vmul.f32 %v888_v54, %v1242_v1  ;;  %v1164_v41 = vld [vmem:[%s1566_s0 + $0x58] sm:$0xff]  }
   0xf   :  { %1185 = vst [vmem:[%s1569_s3 + $0x8] sm:$0xff] %v1002_v51   ;;  %v1012_v60 = vpack.c.bf16 %v355_v52, %v354_v49  ;;  %v893_v63 = vunpack.c.h.bf16 %v1159_v46  ;;  %1186 = vst [vmem:[%s1569_s3 + $0x10] sm:$0xff] %v1007_v56   ;;  %v229_v0 = vadd.f32 %v1256_v7, %v158_v57  ;;  %v896_v4 = vunpack.c.l.bf16 %v1160_v55 }
  0x10   :  { %v160_v2 = vmul.f32 %v889_v58, %v1242_v1  ;;  %v161_v3 = vmul.f32 %v892_v59, %v1242_v1  ;;  %v292_v5 = vmul.f32 0.2, %v228_v61  ;;  %v230_v6 = vadd.f32 %v1256_v7, %v159_v62  ;;  %v1165_v58 = vld [vmem:[%s1566_s0 + $0x60] sm:$0xff]  }
  0x11   :  { %1187 = vst [vmem:[%s1569_s3 + $0x18] sm:$0xff] %v1012_v60   ;;  %v162_v8 = vmul.f32 %v893_v63, %v1242_v1  ;;  %v897_v9 = vunpack.c.h.bf16 %v1160_v55  ;;  %v293_v10 = vmul.f32 0.2, %v229_v0  ;;  %v163_v13 = vmul.f32 %v896_v4, %v1242_v1 }
  0x12   :  { %v231_v11 = vadd.f32 %v1256_v7, %v160_v2  ;;  %v232_v12 = vadd.f32 %v1256_v7, %v161_v3  ;;  %v356_v15 = vmax.f32 %v228_v61, %v292_v5  ;;  %v294_v16 = vmul.f32 0.2, %v230_v6 }
  0x13   :  { %v233_v17 = vadd.f32 %v1256_v7, %v162_v8  ;;  %v164_v18 = vmul.f32 %v897_v9, %v1242_v1  ;;  %v357_v19 = vmax.f32 %v229_v0, %v293_v10  ;;  %v234_v22 = vadd.f32 %v1256_v7, %v163_v13  ;;  %v1166_v13 = vld [vmem:[%s1566_s0 + $0x68] sm:$0xff]  }
  0x14   :  { %v295_v20 = vmul.f32 0.2, %v231_v11  ;;  %v296_v21 = vmul.f32 0.2, %v232_v12  ;;  %v358_v23 = vmax.f32 %v230_v6, %v294_v16  ;;  %v900_v26 = vunpack.c.l.bf16 %v1161_v14 }
  0x15   :  { %v297_v24 = vmul.f32 0.2, %v233_v17  ;;  %v235_v25 = vadd.f32 %v1256_v7, %v164_v18  ;;  %v1017_v28 = vpack.c.bf16 %v357_v19, %v356_v15  ;;  %v298_v31 = vmul.f32 0.2, %v234_v22  ;;  %v1167_v18 = vld [vmem:[%s1566_s0 + $0x70] sm:$0xff]  }
  0x16   :  { %v359_v29 = vmax.f32 %v231_v11, %v295_v20  ;;  %v360_v30 = vmax.f32 %v232_v12, %v296_v21  ;;  %v901_v34 = vunpack.c.h.bf16 %v1161_v14  ;;  %v165_v35 = vmul.f32 %v900_v26, %v1242_v1 }
  0x17   :  { %v361_v32 = vmax.f32 %v233_v17, %v297_v24  ;;  %v299_v33 = vmul.f32 0.2, %v235_v25  ;;  %1188 = vst [vmem:[%s1569_s3 + $0x20] sm:$0xff] %v1017_v28   ;;  %v362_v38 = vmax.f32 %v234_v22, %v298_v31  ;;  %v904_v39 = vunpack.c.l.bf16 %v1162_v27 }
  0x18   :  { %v1022_v37 = vpack.c.bf16 %v359_v29, %v358_v23  ;;  %v905_v40 = vunpack.c.h.bf16 %v1162_v27  ;;  %v166_v44 = vmul.f32 %v901_v34, %v1242_v1  ;;  %v236_v45 = vadd.f32 %v1256_v7, %v165_v35  ;;  %v1168_v27 = vld [vmem:[%s1566_s0 + $0x78] sm:$0xff]  }
  0x19   :  { %v1027_v42 = vpack.c.bf16 %v361_v32, %v360_v30  ;;  %v363_v43 = vmax.f32 %v235_v25, %v299_v33  ;;  %v167_v46 = vmul.f32 %v904_v39, %v1242_v1  ;;  %v908_v48 = vunpack.c.l.bf16 %v1163_v36 }
  0x1a   :  { %1189 = vst [vmem:[%s1569_s3 + $0x28] sm:$0xff] %v1022_v37   ;;  %v168_v47 = vmul.f32 %v905_v40, %v1242_v1  ;;  %v909_v49 = vunpack.c.h.bf16 %v1163_v36  ;;  %v237_v51 = vadd.f32 %v1256_v7, %v166_v44  ;;  %v300_v52 = vmul.f32 0.2, %v236_v45  ;;  %v1169_v44 = vld [vmem:[%s1566_s0 + $0x80] sm:$0xff]  }
  0x1b   :  { %1190 = vst [vmem:[%s1569_s3 + $0x30] sm:$0xff] %v1027_v42   ;;  %v1032_v50 = vpack.c.bf16 %v363_v43, %v362_v38  ;;  %v912_v53 = vunpack.c.l.bf16 %v1164_v41  ;;  %v238_v54 = vadd.f32 %v1256_v7, %v167_v46  ;;  %v169_v56 = vmul.f32 %v908_v48, %v1242_v1 }
  0x1c   :  { %v239_v55 = vadd.f32 %v1256_v7, %v168_v47  ;;  %v170_v57 = vmul.f32 %v909_v49, %v1242_v1  ;;  %v301_v59 = vmul.f32 0.2, %v237_v51  ;;  %v364_v60 = vmax.f32 %v236_v45, %v300_v52 }
  0x1d   :  { %1191 = vst [vmem:[%s1569_s3 + $0x38] sm:$0xff] %v1032_v50   ;;  %v913_v61 = vunpack.c.h.bf16 %v1164_v41  ;;  %v171_v62 = vmul.f32 %v912_v53, %v1242_v1  ;;  %v302_v63 = vmul.f32 0.2, %v238_v54  ;;  %v240_v2 = vadd.f32 %v1256_v7, %v169_v56 }
  0x1e   :  { %v303_v0 = vmul.f32 0.2, %v239_v55  ;;  %v241_v3 = vadd.f32 %v1256_v7, %v170_v57  ;;  %v365_v4 = vmax.f32 %v237_v51, %v301_v59  ;;  %v916_v8 = vunpack.c.l.bf16 %v1165_v58  ;;  %v1170_v57 = vld [vmem:[%s1566_s0 + $0x88] sm:$0xff]  }
  0x1f   :  { %v172_v5 = vmul.f32 %v913_v61, %v1242_v1  ;;  %v242_v6 = vadd.f32 %v1256_v7, %v171_v62  ;;  %v366_v9 = vmax.f32 %v238_v54, %v302_v63  ;;  %v304_v11 = vmul.f32 0.2, %v240_v2 }
  0x20   :  { %v367_v10 = vmax.f32 %v239_v55, %v303_v0  ;;  %v305_v12 = vmul.f32 0.2, %v241_v3  ;;  %v1037_v14 = vpack.c.bf16 %v365_v4, %v364_v60  ;;  %v917_v17 = vunpack.c.h.bf16 %v1165_v58 }
  0x21   :  { %v243_v15 = vadd.f32 %v1256_v7, %v172_v5  ;;  %v306_v16 = vmul.f32 0.2, %v242_v6  ;;  %v368_v20 = vmax.f32 %v240_v2, %v304_v11  ;;  %v173_v22 = vmul.f32 %v916_v8, %v1242_v1  ;;  %v1171_v8 = vld [vmem:[%s1566_s0 + $0x90] sm:$0xff]  }
  0x22   :  { %v1042_v19 = vpack.c.bf16 %v367_v10, %v366_v9  ;;  %v369_v21 = vmax.f32 %v241_v3, %v305_v12  ;;  %1192 = vst [vmem:[%s1569_s3 + $0x40] sm:$0xff] %v1037_v14   ;;  %v174_v25 = vmul.f32 %v917_v17, %v1242_v1  ;;  %v920_v26 = vunpack.c.l.bf16 %v1166_v13 }
  0x23   :  { %v307_v23 = vmul.f32 0.2, %v243_v15  ;;  %v370_v24 = vmax.f32 %v242_v6, %v306_v16  ;;  %v244_v29 = vadd.f32 %v1256_v7, %v173_v22  ;;  %v921_v30 = vunpack.c.h.bf16 %v1166_v13  ;;  %v1172_v13 = vld [vmem:[%s1566_s0 + $0x98] sm:$0xff]  }
  0x24   :  { %1193 = vst [vmem:[%s1569_s3 + $0x48] sm:$0xff] %v1042_v19   ;;  %v1047_v28 = vpack.c.bf16 %v369_v21, %v368_v20  ;;  %v924_v31 = vunpack.c.l.bf16 %v1167_v18  ;;  %v245_v33 = vadd.f32 %v1256_v7, %v174_v25  ;;  %v175_v34 = vmul.f32 %v920_v26, %v1242_v1 }
  0x25   :  { %v371_v32 = vmax.f32 %v243_v15, %v307_v23  ;;  %v925_v35 = vunpack.c.h.bf16 %v1167_v18  ;;  %v308_v36 = vmul.f32 0.2, %v244_v29  ;;  %v176_v37 = vmul.f32 %v921_v30, %v1242_v1  ;;  %v1173_v30 = vld [vmem:[%s1566_s0 + $0xa0] sm:$0xff]  }
  0x26   :  { %1194 = vst [vmem:[%s1569_s3 + $0x50] sm:$0xff] %v1047_v28   ;;  %v177_v38 = vmul.f32 %v924_v31, %v1242_v1  ;;  %v928_v39 = vunpack.c.l.bf16 %v1168_v27  ;;  %v309_v41 = vmul.f32 0.2, %v245_v33  ;;  %v246_v42 = vadd.f32 %v1256_v7, %v175_v34 }
  0x27   :  { %v1052_v40 = vpack.c.bf16 %v371_v32, %v370_v24  ;;  %v178_v43 = vmul.f32 %v925_v35, %v1242_v1  ;;  %v372_v45 = vmax.f32 %v244_v29, %v308_v36  ;;  %v247_v46 = vadd.f32 %v1256_v7, %v176_v37 }
  0x28   :  { %v248_v47 = vadd.f32 %v1256_v7, %v177_v38  ;;  %v929_v48 = vunpack.c.h.bf16 %v1168_v27  ;;  %v373_v49 = vmax.f32 %v245_v33, %v309_v41  ;;  %v310_v50 = vmul.f32 0.2, %v246_v42 }
  0x29   :  { %1195 = vst [vmem:[%s1569_s3 + $0x58] sm:$0xff] %v1052_v40   ;;  %v249_v51 = vadd.f32 %v1256_v7, %v178_v43  ;;  %v179_v52 = vmul.f32 %v928_v39, %v1242_v1  ;;  %v311_v53 = vmul.f32 0.2, %v247_v46  ;;  %v932_v56 = vunpack.c.l.bf16 %v1169_v44  ;;  %v1174_v43 = vld [vmem:[%s1566_s0 + $0xa8] sm:$0xff]  }
  0x2a   :  { %v312_v54 = vmul.f32 0.2, %v248_v47  ;;  %v180_v55 = vmul.f32 %v929_v48, %v1242_v1  ;;  %v1057_v58 = vpack.c.bf16 %v373_v49, %v372_v45  ;;  %v374_v59 = vmax.f32 %v246_v42, %v310_v50 }
  0x2b   :  { %v313_v60 = vmul.f32 0.2, %v249_v51  ;;  %v250_v61 = vadd.f32 %v1256_v7, %v179_v52  ;;  %v375_v62 = vmax.f32 %v247_v46, %v311_v53  ;;  %v933_v2 = vunpack.c.h.bf16 %v1169_v44  ;;  %v1175_v52 = vld [vmem:[%s1566_s0 + $0xb0] sm:$0xff]  }
  0x2c   :  { %v376_v63 = vmax.f32 %v248_v47, %v312_v54  ;;  %v251_v0 = vadd.f32 %v1256_v7, %v180_v55  ;;  %1196 = vst [vmem:[%s1569_s3 + $0x60] sm:$0xff] %v1057_v58   ;;  %v181_v5 = vmul.f32 %v932_v56, %v1242_v1  ;;  %v936_v6 = vunpack.c.l.bf16 %v1170_v57 }
  0x2d   :  { %v377_v3 = vmax.f32 %v249_v51, %v313_v60  ;;  %v314_v4 = vmul.f32 0.2, %v250_v61  ;;  %v1062_v9 = vpack.c.bf16 %v375_v62, %v374_v59  ;;  %v182_v11 = vmul.f32 %v933_v2, %v1242_v1  ;;  %v1176_v2 = vld [vmem:[%s1566_s0 + $0xb8] sm:$0xff]  }
  0x2e   :  { %v315_v10 = vmul.f32 0.2, %v251_v0  ;;  %v937_v12 = vunpack.c.h.bf16 %v1170_v57  ;;  %v252_v16 = vadd.f32 %v1256_v7, %v181_v5  ;;  %v183_v17 = vmul.f32 %v936_v6, %v1242_v1 }
  0x2f   :  { %v1067_v14 = vpack.c.bf16 %v377_v3, %v376_v63  ;;  %v378_v15 = vmax.f32 %v250_v61, %v314_v4  ;;  %1197 = vst [vmem:[%s1569_s3 + $0x68] sm:$0xff] %v1062_v9   ;;  %v253_v19 = vadd.f32 %v1256_v7, %v182_v11  ;;  %v940_v21 = vunpack.c.l.bf16 %v1171_v8 }
  0x30   :  { %v379_v18 = vmax.f32 %v251_v0, %v315_v10  ;;  %v184_v20 = vmul.f32 %v937_v12, %v1242_v1  ;;  %v316_v22 = vmul.f32 0.2, %v252_v16  ;;  %v254_v23 = vadd.f32 %v1256_v7, %v183_v17  ;;  %v1177_v12 = vld [vmem:[%s1566_s0 + $0xc0] sm:$0xff]  }
  0x31   :  { %1198 = vst [vmem:[%s1569_s3 + $0x70] sm:$0xff] %v1067_v14   ;;  %v941_v24 = vunpack.c.h.bf16 %v1171_v8  ;;  %v944_v25 = vunpack.c.l.bf16 %v1172_v13  ;;  %v317_v27 = vmul.f32 0.2, %v253_v19  ;;  %v185_v29 = vmul.f32 %v940_v21, %v1242_v1 }
  0x32   :  { %v1072_v26 = vpack.c.bf16 %v379_v18, %v378_v15  ;;  %v255_v28 = vadd.f32 %v1256_v7, %v184_v20  ;;  %v380_v31 = vmax.f32 %v252_v16, %v316_v22  ;;  %v318_v32 = vmul.f32 0.2, %v254_v23 }
  0x33   :  { %v186_v33 = vmul.f32 %v941_v24, %v1242_v1  ;;  %v945_v34 = vunpack.c.h.bf16 %v1172_v13  ;;  %v381_v35 = vmax.f32 %v253_v19, %v317_v27  ;;  %v256_v37 = vadd.f32 %v1256_v7, %v185_v29  ;;  %v1178_v29 = vld [vmem:[%s1566_s0 + $0xc8] sm:$0xff]  }
  0x34   :  { %1199 = vst [vmem:[%s1569_s3 + $0x78] sm:$0xff] %v1072_v26   ;;  %v319_v36 = vmul.f32 0.2, %v255_v28  ;;  %v187_v38 = vmul.f32 %v944_v25, %v1242_v1  ;;  %v382_v39 = vmax.f32 %v254_v23, %v318_v32  ;;  %v948_v42 = vunpack.c.l.bf16 %v1173_v30 }
  0x35   :  { %v257_v40 = vadd.f32 %v1256_v7, %v186_v33  ;;  %v188_v41 = vmul.f32 %v945_v34, %v1242_v1  ;;  %v1077_v44 = vpack.c.bf16 %v381_v35, %v380_v31  ;;  %v320_v46 = vmul.f32 0.2, %v256_v37 }
  0x36   :  { %v383_v45 = vmax.f32 %v255_v28, %v319_v36  ;;  %v258_v47 = vadd.f32 %v1256_v7, %v187_v38  ;;  %v949_v50 = vunpack.c.h.bf16 %v1173_v30  ;;  %v189_v51 = vmul.f32 %v948_v42, %v1242_v1  ;;  %v1179_v42 = vld [vmem:[%s1566_s0 + $0xd0] sm:$0xff]  }
  0x37   :  { %v321_v48 = vmul.f32 0.2, %v257_v40  ;;  %v259_v49 = vadd.f32 %v1256_v7, %v188_v41  ;;  %1200 = vst [vmem:[%s1569_s3 + $0x80] sm:$0xff] %v1077_v44   ;;  %v384_v54 = vmax.f32 %v256_v37, %v320_v46  ;;  %v952_v56 = vunpack.c.l.bf16 %v1174_v43 }
  0x38   :  { %v1082_v53 = vpack.c.bf16 %v383_v45, %v382_v39  ;;  %v322_v55 = vmul.f32 0.2, %v258_v47  ;;  %v190_v59 = vmul.f32 %v949_v50, %v1242_v1  ;;  %v260_v60 = vadd.f32 %v1256_v7, %v189_v51  ;;  %v1180_v51 = vld [vmem:[%s1566_s0 + $0xd8] sm:$0xff]  }
  0x39   :  { %v385_v57 = vmax.f32 %v257_v40, %v321_v48  ;;  %v323_v58 = vmul.f32 0.2, %v259_v49  ;;  %v953_v62 = vunpack.c.h.bf16 %v1174_v43  ;;  %v191_v63 = vmul.f32 %v952_v56, %v1242_v1 }
  0x3a   :  { %1201 = vst [vmem:[%s1569_s3 + $0x88] sm:$0xff] %v1082_v53   ;;  %v386_v61 = vmax.f32 %v258_v47, %v322_v55  ;;  %v956_v0 = vunpack.c.l.bf16 %v1175_v52  ;;  %v261_v5 = vadd.f32 %v1256_v7, %v190_v59  ;;  %v324_v6 = vmul.f32 0.2, %v260_v60 }
  0x3b   :  { %v1087_v3 = vpack.c.bf16 %v385_v57, %v384_v54  ;;  %v387_v4 = vmax.f32 %v259_v49, %v323_v58  ;;  %v192_v8 = vmul.f32 %v953_v62, %v1242_v1  ;;  %v262_v9 = vadd.f32 %v1256_v7, %v191_v63 }
  0x3c   :  { %v957_v10 = vunpack.c.h.bf16 %v1175_v52  ;;  %v193_v11 = vmul.f32 %v956_v0, %v1242_v1  ;;  %v325_v14 = vmul.f32 0.2, %v261_v5  ;;  %v388_v15 = vmax.f32 %v260_v60, %v324_v6  ;;  %v1181_v0 = vld [vmem:[%s1566_s0 + $0xe0] sm:$0xff]  }
  0x3d   :  { %1202 = vst [vmem:[%s1569_s3 + $0x90] sm:$0xff] %v1087_v3   ;;  %v1092_v13 = vpack.c.bf16 %v387_v4, %v386_v61  ;;  %v960_v16 = vunpack.c.l.bf16 %v1176_v2  ;;  %v263_v17 = vadd.f32 %v1256_v7, %v192_v8  ;;  %v326_v18 = vmul.f32 0.2, %v262_v9 }
  0x3e   :  { %v194_v19 = vmul.f32 %v957_v10, %v1242_v1  ;;  %v264_v20 = vadd.f32 %v1256_v7, %v193_v11  ;;  %v389_v21 = vmax.f32 %v261_v5, %v325_v14  ;;  %v961_v22 = vunpack.c.h.bf16 %v1176_v2  ;;  %v1182_v11 = vld [vmem:[%s1566_s0 + $0xe8] sm:$0xff]  }
  0x3f   :  { %1203 = vst [vmem:[%s1569_s3 + $0x98] sm:$0xff] %v1092_v13   ;;  %v195_v23 = vmul.f32 %v960_v16, %v1242_v1  ;;  %v964_v24 = vunpack.c.l.bf16 %v1177_v12  ;;  %v327_v25 = vmul.f32 0.2, %v263_v17  ;;  %v390_v26 = vmax.f32 %v262_v9, %v326_v18 }
  0x40   :  { %v265_v27 = vadd.f32 %v1256_v7, %v194_v19  ;;  %v328_v28 = vmul.f32 0.2, %v264_v20  ;;  %v1097_v30 = vpack.c.bf16 %v389_v21, %v388_v15  ;;  %v196_v31 = vmul.f32 %v961_v22, %v1242_v1 }
  0x41   :  { %v266_v32 = vadd.f32 %v1256_v7, %v195_v23  ;;  %v965_v33 = vunpack.c.h.bf16 %v1177_v12  ;;  %v391_v34 = vmax.f32 %v263_v17, %v327_v25  ;;  %v197_v37 = vmul.f32 %v964_v24, %v1242_v1  ;;  %v1183_v24 = vld [vmem:[%s1566_s0 + $0xf0] sm:$0xff]  }
  0x42   :  { %v329_v35 = vmul.f32 0.2, %v265_v27  ;;  %v392_v36 = vmax.f32 %v264_v20, %v328_v28  ;;  %1204 = vst [vmem:[%s1569_s3 + $0xa0] sm:$0xff] %v1097_v30   ;;  %v267_v38 = vadd.f32 %v1256_v7, %v196_v31  ;;  %v968_v41 = vunpack.c.l.bf16 %v1178_v29 }
  0x43   :  { %v330_v39 = vmul.f32 0.2, %v266_v32  ;;  %v198_v40 = vmul.f32 %v965_v33, %v1242_v1  ;;  %v1102_v43 = vpack.c.bf16 %v391_v34, %v390_v26  ;;  %v268_v45 = vadd.f32 %v1256_v7, %v197_v37  ;;  %v1184_v37 = vld [vmem:[%s1566_s0 + $0xf8] sm:$0xff]  }
  0x44   :  { %v393_v44 = vmax.f32 %v265_v27, %v329_v35  ;;  %v969_v46 = vunpack.c.h.bf16 %v1178_v29  ;;  %v331_v47 = vmul.f32 0.2, %v267_v38  ;;  %v199_v50 = vmul.f32 %v968_v41, %v1242_v1 }
  0x45   :  { %v394_v48 = vmax.f32 %v266_v32, %v330_v39  ;;  %v269_v49 = vadd.f32 %v1256_v7, %v198_v40  ;;  %1205 = vst [vmem:[%s1569_s3 + $0xa8] sm:$0xff] %v1102_v43   ;;  %v332_v53 = vmul.f32 0.2, %v268_v45  ;;  %v972_v55 = vunpack.c.l.bf16 %v1179_v42 }
  0x46   :  { %v1107_v52 = vpack.c.bf16 %v393_v44, %v392_v36  ;;  %v200_v54 = vmul.f32 %v969_v46, %v1242_v1  ;;  %v395_v56 = vmax.f32 %v267_v38, %v331_v47  ;;  %v270_v58 = vadd.f32 %v1256_v7, %v199_v50 }
  0x47   :  { %v333_v57 = vmul.f32 0.2, %v269_v49  ;;  %v973_v59 = vunpack.c.h.bf16 %v1179_v42  ;;  %v396_v60 = vmax.f32 %v268_v45, %v332_v53  ;;  %v201_v62 = vmul.f32 %v972_v55, %v1242_v1 }
  0x48   :  { %1206 = vst [vmem:[%s1569_s3 + $0xb0] sm:$0xff] %v1107_v52   ;;  %v271_v61 = vadd.f32 %v1256_v7, %v200_v54  ;;  %v976_v63 = vunpack.c.l.bf16 %v1180_v51  ;;  %v1112_v2 = vpack.c.bf16 %v395_v56, %v394_v48  ;;  %v334_v4 = vmul.f32 0.2, %v270_v58 }
  0x49   :  { %v397_v3 = vmax.f32 %v269_v49, %v333_v57  ;;  %v202_v5 = vmul.f32 %v973_v59, %v1242_v1  ;;  %v272_v8 = vadd.f32 %v1256_v7, %v201_v62  ;;  %v977_v9 = vunpack.c.h.bf16 %v1180_v51 }
  0x4a   :  { %v335_v6 = vmul.f32 0.2, %v271_v61  ;;  %v203_v10 = vmul.f32 %v976_v63, %v1242_v1  ;;  %1207 = vst [vmem:[%s1569_s3 + $0xb8] sm:$0xff] %v1112_v2   ;;  %v398_v13 = vmax.f32 %v270_v58, %v334_v4  ;;  %v980_v15 = vunpack.c.l.bf16 %v1181_v0 }
  0x4b   :  { %v1117_v12 = vpack.c.bf16 %v397_v3, %v396_v60  ;;  %v273_v14 = vadd.f32 %v1256_v7, %v202_v5  ;;  %v336_v17 = vmul.f32 0.2, %v272_v8  ;;  %v204_v18 = vmul.f32 %v977_v9, %v1242_v1 }
  0x4c   :  { %v399_v16 = vmax.f32 %v271_v61, %v335_v6  ;;  %v274_v19 = vadd.f32 %v1256_v7, %v203_v10  ;;  %v981_v21 = vunpack.c.h.bf16 %v1181_v0  ;;  %v205_v22 = vmul.f32 %v980_v15, %v1242_v1 }
  0x4d   :  { %1208 = vst [vmem:[%s1569_s3 + $0xc0] sm:$0xff] %v1117_v12   ;;  %v337_v20 = vmul.f32 0.2, %v273_v14  ;;  %v984_v23 = vunpack.c.l.bf16 %v1182_v11  ;;  %v400_v26 = vmax.f32 %v272_v8, %v336_v17  ;;  %v275_v27 = vadd.f32 %v1256_v7, %v204_v18 }
  0x4e   :  { %v1122_v25 = vpack.c.bf16 %v399_v16, %v398_v13  ;;  %v338_v28 = vmul.f32 0.2, %v274_v19  ;;  %v206_v30 = vmul.f32 %v981_v21, %v1242_v1  ;;  %v276_v31 = vadd.f32 %v1256_v7, %v205_v22 }
  0x4f   :  { %v401_v29 = vmax.f32 %v273_v14, %v337_v20  ;;  %v985_v32 = vunpack.c.h.bf16 %v1182_v11  ;;  %v339_v33 = vmul.f32 0.2, %v275_v27  ;;  %v207_v35 = vmul.f32 %v984_v23, %v1242_v1 }
  0x50   :  { %1209 = vst [vmem:[%s1569_s3 + $0xc8] sm:$0xff] %v1122_v25   ;;  %v402_v34 = vmax.f32 %v274_v19, %v338_v28  ;;  %v988_v36 = vunpack.c.l.bf16 %v1183_v24  ;;  %v277_v39 = vadd.f32 %v1256_v7, %v206_v30  ;;  %v340_v40 = vmul.f32 0.2, %v276_v31 }
  0x51   :  { %v1127_v38 = vpack.c.bf16 %v401_v29, %v400_v26  ;;  %v208_v41 = vmul.f32 %v985_v32, %v1242_v1  ;;  %v403_v42 = vmax.f32 %v275_v27, %v339_v33  ;;  %v278_v43 = vadd.f32 %v1256_v7, %v207_v35 }
  0x52   :  { %v989_v44 = vunpack.c.h.bf16 %v1183_v24  ;;  %v209_v45 = vmul.f32 %v988_v36, %v1242_v1  ;;  %v341_v46 = vmul.f32 0.2, %v277_v39  ;;  %v404_v47 = vmax.f32 %v276_v31, %v340_v40 }
  0x53   :  { %1210 = vst [vmem:[%s1569_s3 + $0xd0] sm:$0xff] %v1127_v38   ;;  %v279_v48 = vadd.f32 %v1256_v7, %v208_v41  ;;  %v992_v49 = vunpack.c.l.bf16 %v1184_v37  ;;  %v1132_v50 = vpack.c.bf16 %v403_v42, %v402_v34  ;;  %v342_v51 = vmul.f32 0.2, %v278_v43 }
  0x54   :  { %v210_v52 = vmul.f32 %v989_v44, %v1242_v1  ;;  %v280_v53 = vadd.f32 %v1256_v7, %v209_v45  ;;  %v405_v54 = vmax.f32 %v277_v39, %v341_v46  ;;  %v993_v56 = vunpack.c.h.bf16 %v1184_v37 }
  0x55   :  { %v343_v55 = vmul.f32 0.2, %v279_v48  ;;  %v211_v57 = vmul.f32 %v992_v49, %v1242_v1  ;;  %1211 = vst [vmem:[%s1569_s3 + $0xd8] sm:$0xff] %v1132_v50   ;;  %v406_v58 = vmax.f32 %v278_v43, %v342_v51 }
  0x56   :  { %v281_v59 = vadd.f32 %v1256_v7, %v210_v52  ;;  %v344_v60 = vmul.f32 0.2, %v280_v53  ;;  %v1137_v61 = vpack.c.bf16 %v405_v54, %v404_v47  ;;  %v212_v63 = vmul.f32 %v993_v56, %v1242_v1 }
  0x57   :  { %v407_v62 = vmax.f32 %v279_v48, %v343_v55  ;;  %v282_v0 = vadd.f32 %v1256_v7, %v211_v57 }
  0x58   :  { %v345_v2 = vmul.f32 0.2, %v281_v59  ;;  %v408_v3 = vmax.f32 %v280_v53, %v344_v60  ;;  %1212 = vst [vmem:[%s1569_s3 + $0xe0] sm:$0xff] %v1137_v61   ;;  %v283_v5 = vadd.f32 %v1256_v7, %v212_v63 }
  0x59   :  { %v1142_v4 = vpack.c.bf16 %v407_v62, %v406_v58  ;;  %v346_v6 = vmul.f32 0.2, %v282_v0 }
  0x5a   :  { %v409_v8 = vmax.f32 %v281_v59, %v345_v2  ;;  %v347_v9 = vmul.f32 0.2, %v283_v5 }
  0x5b   :  { %1213 = vst [vmem:[%s1569_s3 + $0xe8] sm:$0xff] %v1142_v4   ;;  %v410_v10 = vmax.f32 %v282_v0, %v346_v6 }
  0x5c   :  { %v1147_v1 = vpack.c.bf16 %v409_v8, %v408_v3  ;;  %v411_v11 = vmax.f32 %v283_v5, %v347_v9 }
  0x5e   :  { %1214 = vst [vmem:[%s1569_s3 + $0xf0] sm:$0xff] %v1147_v1   ;;  %v1152_v12 = vpack.c.bf16 %v411_v11, %v410_v10 }
  0x60   :  { %1215 = vst [vmem:[%s1569_s3 + $0xf8] sm:$0xff] %v1152_v12  }

// kernel: _lambda_.11
= control target key start
LH: loop header
LB: loop body
LE: loop exit
PB: predicated region body
PF: predicated region fallthrough
CT: control target
= control target key end

     0   :  { %v757_v32 = vmov 0.0   ;;  %s973_s1 = inlined_call_operand.vmem [shape: bf16[256,128], index: 1, kind: input, shape index: {}]   ;;  %s974_s0 = inlined_call_operand.vmem [shape: bf16[128,256], index: 0, kind: input, shape index: {}]   ;;  %s975_s5 = inlined_call_operand.vmem [shape: f32[1,128], index: 5, kind: output, shape index: {1}]   ;;  %s976_s6 = inlined_call_operand.vmem [shape: f32[1,128], index: 6, kind: output, shape index: {2}]   ;;  %s977_s4 = inlined_call_operand.vmem [shape: bf16[128,128], index: 4, kind: output, shape index: {0}]   ;;  %s978_s2 = inlined_call_operand.vmem [shape: f32[1,128], index: 2, kind: input, shape index: {}]   ;;  %s979_s3 = inlined_call_operand.vmem [shape: f32[1,128], index: 3, kind: input, shape index: {}]  }
   0x1   :  { %v715_v0 = vld [vmem:[%s973_s1 + $0x78] sm:$0xff]   ;;  %v717_v2 = vld [vmem:[%s973_s1 + $0x70] sm:$0xff]   ;;  %v719_v4 = vld [vmem:[%s973_s1 + $0x68] sm:$0xff]   ;;  %25 = vst [vmem:[%s975_s5] sm:$0x1] %v757_v32 }
   0x2   :  { %v716_v1 = vld [vmem:[%s973_s1 + $0x38] sm:$0xff]   ;;  %634 = vmatprep.subr.bf16.mxu0 %v715_v0  ;;  %698 = vmatprep.subr.bf16.mxu1 %v715_v0  ;;  %v718_v3 = vld [vmem:[%s973_s1 + $0x30] sm:$0xff]   ;;  %v720_v5 = vld [vmem:[%s973_s1 + $0x28] sm:$0xff]   ;;  %26 = vst [vmem:[%s976_s6] sm:$0x1] %v757_v32 }
   0x3   :  { %635 = vmatpush3.bf16.msra.mxu0 %v716_v1  ;;  %706 = vmatpush3.bf16.msra.mxu1 %v716_v1  ;;  %v721_v6 = vld [vmem:[%s973_s1 + $0x60] sm:$0xff]   ;;  %v723_v8 = vld [vmem:[%s973_s1 + $0x58] sm:$0xff]   ;;  %v725_v10 = vld [vmem:[%s973_s1 + $0x50] sm:$0xff]  }
   0x4   :  { %636 = vmatprep.subr.bf16.mxu0 %v717_v2  ;;  %699 = vmatprep.subr.bf16.mxu1 %v717_v2  ;;  %v722_v7 = vld [vmem:[%s973_s1 + $0x20] sm:$0xff]   ;;  %v724_v9 = vld [vmem:[%s973_s1 + $0x18] sm:$0xff]   ;;  %v726_v12 = vld [vmem:[%s973_s1 + $0x10] sm:$0xff]  }
   0x5   :  { %v733_v11 = vld [vmem:[%s974_s0 + $0x4] ss:$8 sps:$4 sm:$0xff]   ;;  %v731_v18 = vld [vmem:[%s974_s0] ss:$8 sps:$4 sm:$0xff]   ;;  %v734_v20 = vld [vmem:[%s974_s0 + $0x14] ss:$8 sps:$4 sm:$0xff]  }
   0x6   :  { %v739_v13 = vld [vmem:[%s974_s0 + $0x44] ss:$8 sps:$4 sm:$0xff]   ;;  %283 = vmatprep.mubr.bf16.mxu0 %v733_v11  ;;  %v737_v19 = vld [vmem:[%s974_s0 + $0x40] ss:$8 sps:$4 sm:$0xff]   ;;  %v743_v21 = vld [vmem:[%s974_s0 + $0x54] ss:$8 sps:$4 sm:$0xff]  }
   0x7   :  { %637 = vmatpush3.bf16.msra.mxu0 %v718_v3  ;;  %707 = vmatpush3.bf16.msra.mxu1 %v718_v3  ;;  %v727_v14 = vld [vmem:[%s973_s1 + $0x48] sm:$0xff]   ;;  %v729_v16 = vld [vmem:[%s973_s1 + $0x40] sm:$0xff]   ;;  %v736_v22 = vld [vmem:[%s974_s0 + $0x10] ss:$8 sps:$4 sm:$0xff]  }
   0x8   :  { %638 = vmatprep.subr.bf16.mxu0 %v719_v4  ;;  %700 = vmatprep.subr.bf16.mxu1 %v719_v4  ;;  %v728_v15 = vld [vmem:[%s973_s1 + $0x8] sm:$0xff]   ;;  %v730_v17 = vld [vmem:[%s973_s1] sm:$0xff]   ;;  %v745_v23 = vld [vmem:[%s974_s0 + $0x50] ss:$8 sps:$4 sm:$0xff]  }
   0x9   :  { %315 = vmatprep.mubr.bf16.mxu1 %v739_v13  ;;  %v740_v24 = vld [vmem:[%s974_s0 + $0x24] ss:$8 sps:$4 sm:$0xff]   ;;  %v742_v26 = vld [vmem:[%s974_s0 + $0x20] ss:$8 sps:$4 sm:$0xff]   ;;  %v746_v28 = vld [vmem:[%s974_s0 + $0x34] ss:$8 sps:$4 sm:$0xff]  }
   0xa   :  { %v749_v25 = vld [vmem:[%s974_s0 + $0x64] ss:$8 sps:$4 sm:$0xff]   ;;  %v751_v27 = vld [vmem:[%s974_s0 + $0x60] ss:$8 sps:$4 sm:$0xff]   ;;  %v752_v29 = vld [vmem:[%s974_s0 + $0x74] ss:$8 sps:$4 sm:$0xff]  }
   0xb   :  { %639 = vmatpush3.bf16.msra.mxu0 %v720_v5  ;;  %708 = vmatpush3.bf16.msra.mxu1 %v720_v5  ;;  %v748_v30 = vld [vmem:[%s974_s0 + $0x30] ss:$8 sps:$4 sm:$0xff]  }
   0xc   :  { %640 = vmatprep.subr.bf16.mxu0 %v721_v6  ;;  %701 = vmatprep.subr.bf16.mxu1 %v721_v6  ;;  %v754_v31 = vld [vmem:[%s974_s0 + $0x70] ss:$8 sps:$4 sm:$0xff]  }
   0xf   :  { %641 = vmatpush3.bf16.msra.mxu0 %v722_v7  ;;  %709 = vmatpush3.bf16.msra.mxu1 %v722_v7 }
  0x10   :  { %642 = vmatprep.subr.bf16.mxu0 %v723_v8  ;;  %702 = vmatprep.subr.bf16.mxu1 %v723_v8 }
  0x13   :  { %643 = vmatpush3.bf16.msra.mxu0 %v724_v9  ;;  %710 = vmatpush3.bf16.msra.mxu1 %v724_v9 }
  0x14   :  { %644 = vmatprep.subr.bf16.mxu0 %v725_v10  ;;  %703 = vmatprep.subr.bf16.mxu1 %v725_v10 }
  0x17   :  { %645 = vmatpush3.bf16.msra.mxu0 %v726_v12  ;;  %711 = vmatpush3.bf16.msra.mxu1 %v726_v12 }
  0x18   :  { %646 = vmatprep.subr.bf16.mxu0 %v727_v14  ;;  %704 = vmatprep.subr.bf16.mxu1 %v727_v14 }
  0x1b   :  { %647 = vmatpush3.bf16.msra.mxu0 %v728_v15  ;;  %712 = vmatpush3.bf16.msra.mxu1 %v728_v15 }
  0x1c   :  { %648 = vmatprep.subr.bf16.mxu0 %v729_v16  ;;  %705 = vmatprep.subr.bf16.mxu1 %v729_v16 }
  0x1f   :  { %649 = vmatpush3.bf16.msra.mxu0 %v730_v17  ;;  %713 = vmatpush3.bf16.msra.mxu1 %v730_v17 }
  0x22   :  { %284 = vmatmul.mubr.bf16.vlgmr.msra.gmra.mxu0 %v731_v18  ;;  %316 = vmatmul.mubr.bf16.vlgmr.msra.gmra.mxu1 %v737_v19 }
  0x23   :  { %291 = vmatprep.mubr.bf16.mxu0 %v734_v20  ;;  %323 = vmatprep.mubr.bf16.mxu1 %v743_v21 }
  0x2a   :  { %292 = vmatmul.mubr.bf16.gmra.mxu0 %v736_v22  ;;  %324 = vmatmul.mubr.bf16.gmra.mxu1 %v745_v23 }
  0x2b   :  { %299 = vmatprep.mubr.bf16.mxu0 %v740_v24  ;;  %331 = vmatprep.mubr.bf16.mxu1 %v749_v25 }
  0x32   :  { %300 = vmatmul.mubr.bf16.gmra.mxu0 %v742_v26  ;;  %332 = vmatmul.mubr.bf16.gmra.mxu1 %v751_v27 }
  0x33   :  { %307 = vmatprep.mubr.bf16.mxu0 %v746_v28  ;;  %339 = vmatprep.mubr.bf16.mxu1 %v752_v29 }
  0x3a   :  { %308 = vmatmul.mubr.bf16.gmra.mxu0 %v748_v30  ;;  %340 = vmatmul.mubr.bf16.gmra.mxu1 %v754_v31 }
  0xe2   :  { %v650_v33 = vpop.f32.mrf.mxu0  ;;  %v674_v34 = vpop.f32.mrf.mxu1 }
  0xe4   :  { %v651_v35 = vpop.f32.mrf.mxu0  ;;  %v675_v36 = vpop.f32.mrf.mxu1 }
  0xe5   :  { %v895_v39 = vadd.f32 %v675_v36, %v674_v34  ;;  %v652_v42 = vadd.f32 %v651_v35, %v650_v33 }
  0xe6   :  { %v653_v37 = vpop.f32.mrf.mxu0  ;;  %v677_v38 = vpop.f32.mrf.mxu1 }
  0xe7   :  { %v453_v2 = vmul.f32 %v652_v42, %v652_v42 }
  0xe8   :  { %v654_v40 = vpop.f32.mrf.mxu0  ;;  %v678_v41 = vpop.f32.mrf.mxu1 }
  0xe9   :  { %v655_v43 = vadd.f32 %v654_v40, %v653_v37  ;;  %v897_v44 = vadd.f32 %v678_v41, %v677_v38 }
  0xea   :  { %v656_v45 = vpop.f32.mrf.mxu0  ;;  %v680_v46 = vpop.f32.mrf.mxu1 }
  0xeb   :  { %v590_v47 = vpack.c.bf16 %v655_v43, %v652_v42  ;;  %v610_v48 = vpack.c.bf16 %v897_v44, %v895_v39  ;;  %v454_v63 = vmul.f32 %v655_v43, %v655_v43  ;;  %v429_v7 = vadd.f32 %v655_v43, %v652_v42 }
  0xec   :  { %v657_v49 = vpop.f32.mrf.mxu0  ;;  %v681_v50 = vpop.f32.mrf.mxu1 }
  0xed   :  { %591 = vst [vmem:[%s977_s4] sm:$0xff] %v590_v47   ;;  %630 = vst [vmem:[%s977_s4 + $0x20] sm:$0xff] %v610_v48   ;;  %v907_v53 = vadd.f32 %v681_v50, %v680_v46  ;;  %v658_v56 = vadd.f32 %v657_v49, %v656_v45  ;;  %v469_v9 = vadd.f32 %v454_v63, %v453_v2 }
  0xee   :  { %v659_v51 = vpop.f32.mrf.mxu0  ;;  %v683_v52 = vpop.f32.mrf.mxu1  ;;  %v461_v48 = vmul.f32 %v895_v39, %v895_v39 }
  0xef   :  { %v455_v3 = vmul.f32 %v658_v56, %v658_v56  ;;  %v430_v13 = vadd.f32 %v658_v56, %v429_v7 }
  0xf0   :  { %v660_v54 = vpop.f32.mrf.mxu0  ;;  %v684_v55 = vpop.f32.mrf.mxu1 }
  0xf1   :  { %v661_v57 = vadd.f32 %v660_v54, %v659_v51  ;;  %v909_v58 = vadd.f32 %v684_v55, %v683_v52  ;;  %v470_v16 = vadd.f32 %v469_v9, %v455_v3  ;;  %v462_v51 = vmul.f32 %v897_v44, %v897_v44 }
  0xf2   :  { %v662_v59 = vpop.f32.mrf.mxu0  ;;  %v686_v60 = vpop.f32.mrf.mxu1  ;;  %v463_v55 = vmul.f32 %v907_v53, %v907_v53 }
  0xf3   :  { %v595_v61 = vpack.c.bf16 %v661_v57, %v658_v56  ;;  %v615_v62 = vpack.c.bf16 %v909_v58, %v907_v53  ;;  %v456_v10 = vmul.f32 %v661_v57, %v661_v57  ;;  %v431_v20 = vadd.f32 %v661_v57, %v430_v13 }
  0xf4   :  { %v663_v0 = vpop.f32.mrf.mxu0  ;;  %v687_v1 = vpop.f32.mrf.mxu1 }
  0xf5   :  { %627 = vst [vmem:[%s977_s4 + $0x8] sm:$0xff] %v595_v61   ;;  %631 = vst [vmem:[%s977_s4 + $0x28] sm:$0xff] %v615_v62   ;;  %v664_v4 = vadd.f32 %v663_v0, %v662_v59  ;;  %v688_v8 = vadd.f32 %v687_v1, %v686_v60  ;;  %v471_v23 = vadd.f32 %v470_v16, %v456_v10 }
  0xf6   :  { %v665_v5 = vpop.f32.mrf.mxu0  ;;  %v689_v6 = vpop.f32.mrf.mxu1 }
  0xf7   :  { %v457_v17 = vmul.f32 %v664_v4, %v664_v4  ;;  %v432_v27 = vadd.f32 %v664_v4, %v431_v20  ;;  %v465_v61 = vmul.f32 %v688_v8, %v688_v8 }
  0xf8   :  { %v666_v11 = vpop.f32.mrf.mxu0  ;;  %v690_v12 = vpop.f32.mrf.mxu1 }
  0xf9   :  { %v667_v14 = vadd.f32 %v666_v11, %v665_v5  ;;  %v691_v15 = vadd.f32 %v690_v12, %v689_v6  ;;  %v472_v29 = vadd.f32 %v471_v23, %v457_v17 }
  0xfa   :  { %v668_v18 = vpop.f32.mrf.mxu0  ;;  %v692_v19 = vpop.f32.mrf.mxu1 }
  0xfb   :  { %v600_v21 = vpack.c.bf16 %v667_v14, %v664_v4  ;;  %v620_v22 = vpack.c.bf16 %v691_v15, %v688_v8  ;;  %v458_v24 = vmul.f32 %v667_v14, %v667_v14  ;;  %v433_v32 = vadd.f32 %v667_v14, %v432_v27 }
  0xfc   :  { %v669_v25 = vpop.f32.mrf.mxu0  ;;  %v693_v26 = vpop.f32.mrf.mxu1  ;;  %v466_v1 = vmul.f32 %v691_v15, %v691_v15 }
  0xfd   :  { %628 = vst [vmem:[%s977_s4 + $0x10] sm:$0xff] %v600_v21   ;;  %v670_v28 = vadd.f32 %v669_v25, %v668_v18  ;;  %632 = vst [vmem:[%s977_s4 + $0x30] sm:$0xff] %v620_v22   ;;  %v694_v34 = vadd.f32 %v693_v26, %v692_v19  ;;  %v473_v35 = vadd.f32 %v472_v29, %v458_v24  ;;  %v452_v19 = vld [vmem:[%s976_s6] sm:$0x1] }
  0xfe   :  { %v671_v30 = vpop.f32.mrf.mxu0  ;;  %v695_v31 = vpop.f32.mrf.mxu1 }
  0xff   :  { %v459_v33 = vmul.f32 %v670_v28, %v670_v28  ;;  %v434_v38 = vadd.f32 %v670_v28, %v433_v32  ;;  %v467_v4 = vmul.f32 %v694_v34, %v694_v34 }
 0x100   :  { %v672_v36 = vpop.f32.mrf.mxu0  ;;  %v696_v37 = vpop.f32.mrf.mxu1 }
 0x101   :  { %v673_v40 = vadd.f32 %v672_v36, %v671_v30  ;;  %v697_v41 = vadd.f32 %v696_v37, %v695_v31  ;;  %v474_v42 = vadd.f32 %v473_v35, %v459_v33  ;;  %v504_v31 = vld [vmem:[%s978_s2] sm:$0x1] }
 0x103   :  { %v605_v43 = vpack.c.bf16 %v673_v40, %v670_v28  ;;  %v435_v45 = vadd.f32 %v673_v40, %v434_v38  ;;  %v460_v46 = vmul.f32 %v673_v40, %v673_v40  ;;  %v625_v47 = vpack.c.bf16 %v697_v41, %v694_v34 }
 0x104   :  { %v468_v7 = vmul.f32 %v697_v41, %v697_v41 }
 0x105   :  { %629 = vst [vmem:[%s977_s4 + $0x18] sm:$0xff] %v605_v43   ;;  %v436_v49 = vadd.f32 %v895_v39, %v435_v45  ;;  %v475_v50 = vadd.f32 %v474_v42, %v460_v46  ;;  %633 = vst [vmem:[%s977_s4 + $0x38] sm:$0xff] %v625_v47   ;;  %v464_v39 = vmul.f32 %v909_v58, %v909_v58 }
 0x107   :  { %v437_v52 = vadd.f32 %v897_v44, %v436_v49  ;;  %v476_v54 = vadd.f32 %v475_v50, %v461_v48 }
 0x109   :  { %v477_v56 = vadd.f32 %v476_v54, %v462_v51  ;;  %v438_v57 = vadd.f32 %v907_v53, %v437_v52 }
 0x10b   :  { %v439_v59 = vadd.f32 %v909_v58, %v438_v57  ;;  %v478_v60 = vadd.f32 %v477_v56, %v463_v55 }
 0x10d   :  { %v440_v62 = vadd.f32 %v688_v8, %v439_v59  ;;  %v479_v63 = vadd.f32 %v478_v60, %v464_v39 }
 0x10f   :  { %v441_v0 = vadd.f32 %v691_v15, %v440_v62  ;;  %v480_v2 = vadd.f32 %v479_v63, %v465_v61  ;;  %v428_v15 = vld [vmem:[%s975_s5] sm:$0x1] }
 0x111   :  { %v481_v44 = vadd.f32 %v480_v2, %v466_v1  ;;  %v442_v3 = vadd.f32 %v694_v34, %v441_v0  ;;  %v507_v34 = vld [vmem:[%s979_s3] sm:$0x1] }
 0x113   :  { %v482_v5 = vadd.f32 %v481_v44, %v467_v4  ;;  %v443_v6 = vadd.f32 %v697_v41, %v442_v3 }
 0x115   :  { %v444_v9 = vrot.slane %v443_v6, 4  ;;  %v483_v53 = vadd.f32 %v482_v5, %v468_v7 }
 0x117   :  { %v445_v10 = vadd.f32 %v444_v9, %v443_v6  ;;  %v484_v11 = vrot.slane %v483_v53, 4 }
 0x119   :  { %v446_v12 = vrot.slane %v445_v10, 2  ;;  %v485_v13 = vadd.f32 %v484_v11, %v483_v53 }
 0x11b   :  { %v447_v58 = vadd.f32 %v446_v12, %v445_v10  ;;  %v486_v14 = vrot.slane %v485_v13, 2 }
 0x11d   :  { %v448_v16 = vrot.slane %v447_v58, 1  ;;  %v487_v8 = vadd.f32 %v486_v14, %v485_v13 }
 0x11f   :  { %v449_v17 = vadd.f32 %v448_v16, %v447_v58  ;;  %v488_v18 = vrot.slane %v487_v8, 1 }
 0x121   :  { %v450_v20 = vadd.f32 %v449_v17, %v428_v15  ;;  %v489_v21 = vadd.f32 %v488_v18, %v487_v8 }
 0x123   :  { %451 = vst [vmem:[%s975_s5] sm:$0x1] %v450_v20  ;;  %v490_v22 = vadd.f32 %v489_v21, %v452_v19 }
 0x125   :  { %491 = vst [vmem:[%s976_s6] sm:$0x1] %v490_v22 }
 0x12a   :  { %v495_v23 = vld [vmem:[%s975_s5] sm:$0x1] }
 0x12b   :  { %v496_v24 = vmul.f32 0.0078125, %v495_v23 }
 0x12c   :  { %v497_v25 = vld [vmem:[%s976_s6] sm:$0x1] }
 0x12d   :  { %v498_v26 = vmul.f32 0.0078125, %v497_v25  ;;  %v499_v27 = vmul.f32 %v496_v24, %v496_v24 }
 0x12f   :  { %v500_v28 = vsub.f32 %v498_v26, %v499_v27 }
 0x131   :  { %v501_v29 = vmax.f32 %v500_v28, 0.0 }
 0x133   :  { %v502_v30 = vadd.f32 1e-05, %v501_v29 }
 0x135   :  { %755 = vrsqrt.f32 %v502_v30 }
 0x142   :  { %v756_v32 = vpop.eup %755 }
 0x143   :  { %v505_v33 = vmul.f32 %v756_v32, %v504_v31 }
 0x145   :  { %506 = vst [vmem:[%s975_s5] sm:$0x1] %v505_v33  ;;  %v508_v35 = vmul.f32 %v505_v33, %v496_v24 }
 0x147   :  { %v509_v36 = vsub.f32 %v507_v34, %v508_v35 }
 0x149   :  { %510 = vst [vmem:[%s976_s6] sm:$0x1] %v509_v36 }

// kernel: _lambda_.12
= control target key start
LH: loop header
LB: loop body
LE: loop exit
PB: predicated region body
PF: predicated region fallthrough
CT: control target
= control target key end

     0   :  { %s438_s0 = inlined_call_operand.vmem [shape: bf16[128,128], index: 0, kind: input, shape index: {}]   ;;  %s439_s1 = inlined_call_operand.vmem [shape: f32[1,128], index: 1, kind: input, shape index: {}]   ;;  %s440_s2 = inlined_call_operand.vmem [shape: f32[1,128], index: 2, kind: input, shape index: {}]   ;;  %s441_s3 = inlined_call_operand.vmem [shape: bf16[128,128], index: 3, kind: output, shape index: {}]  }
   0x1   :  { %v243_v0 = vld [vmem:[%s438_s0] sm:$0xff]   ;;  %v314_v4 = vld [vmem:[%s438_s0 + $0x8] sm:$0xff]   ;;  %v315_v5 = vld [vmem:[%s438_s0 + $0x10] sm:$0xff]  }
   0x2   :  { %v354_v1 = vld [vmem:[%s439_s1] ss:$0 sm:$0xff]  ;;  %v244_v2 = vunpack.c.l.bf16 %v243_v0  ;;  %v245_v3 = vunpack.c.h.bf16 %v243_v0  ;;  %v316_v6 = vld [vmem:[%s438_s0 + $0x18] sm:$0xff]   ;;  %v248_v8 = vunpack.c.l.bf16 %v314_v4  ;;  %v249_v9 = vunpack.c.h.bf16 %v314_v4  ;;  %v318_v41 = vld [vmem:[%s438_s0 + $0x28] sm:$0xff]  }
   0x3   :  { %v368_v7 = vld [vmem:[%s440_s2] ss:$0 sm:$0xff]  ;;  %v252_v10 = vunpack.c.l.bf16 %v315_v5  ;;  %v253_v11 = vunpack.c.h.bf16 %v315_v5  ;;  %v256_v14 = vunpack.c.l.bf16 %v316_v6  ;;  %v257_v15 = vunpack.c.h.bf16 %v316_v6  ;;  %v319_v46 = vld [vmem:[%s438_s0 + $0x30] sm:$0xff]   ;;  %v320_v55 = vld [vmem:[%s438_s0 + $0x38] sm:$0xff]  }
   0x4   :  { %v53_v12 = vmul.f32 %v244_v2, %v354_v1  ;;  %v54_v13 = vmul.f32 %v245_v3, %v354_v1  ;;  %v55_v16 = vmul.f32 %v248_v8, %v354_v1  ;;  %v56_v17 = vmul.f32 %v249_v9, %v354_v1  ;;  %v317_v24 = vld [vmem:[%s438_s0 + $0x20] sm:$0xff]  }
   0x5   :  { %v57_v18 = vmul.f32 %v252_v10, %v354_v1  ;;  %v58_v19 = vmul.f32 %v253_v11, %v354_v1  ;;  %v59_v22 = vmul.f32 %v256_v14, %v354_v1  ;;  %v60_v23 = vmul.f32 %v257_v15, %v354_v1 }
   0x6   :  { %v76_v20 = vadd.f32 %v368_v7, %v53_v12  ;;  %v77_v21 = vadd.f32 %v368_v7, %v54_v13  ;;  %v78_v25 = vadd.f32 %v368_v7, %v55_v16  ;;  %v79_v26 = vadd.f32 %v368_v7, %v56_v17 }
   0x7   :  { %v80_v27 = vadd.f32 %v368_v7, %v57_v18  ;;  %v81_v28 = vadd.f32 %v368_v7, %v58_v19  ;;  %v82_v31 = vadd.f32 %v368_v7, %v59_v22  ;;  %v83_v32 = vadd.f32 %v368_v7, %v60_v23 }
   0x8   :  { %v92_v29 = vmul.f32 0.2, %v76_v20  ;;  %v93_v30 = vmul.f32 0.2, %v77_v21  ;;  %v94_v33 = vmul.f32 0.2, %v78_v25  ;;  %v260_v36 = vunpack.c.l.bf16 %v317_v24 }
   0x9   :  { %v95_v34 = vmul.f32 0.2, %v79_v26  ;;  %v96_v35 = vmul.f32 0.2, %v80_v27  ;;  %v97_v39 = vmul.f32 0.2, %v81_v28  ;;  %v261_v50 = vunpack.c.h.bf16 %v317_v24 }
   0xa   :  { %v108_v37 = vmax.f32 %v76_v20, %v92_v29  ;;  %v109_v38 = vmax.f32 %v77_v21, %v93_v30  ;;  %v98_v40 = vmul.f32 0.2, %v82_v31  ;;  %v110_v42 = vmax.f32 %v78_v25, %v94_v33 }
   0xb   :  { %v111_v43 = vmax.f32 %v79_v26, %v95_v34  ;;  %v112_v44 = vmax.f32 %v80_v27, %v96_v35  ;;  %v99_v45 = vmul.f32 0.2, %v83_v32  ;;  %v113_v48 = vmax.f32 %v81_v28, %v97_v39 }
   0xc   :  { %v277_v47 = vpack.c.bf16 %v109_v38, %v108_v37  ;;  %v114_v49 = vmax.f32 %v82_v31, %v98_v40  ;;  %v61_v53 = vmul.f32 %v260_v36, %v354_v1  ;;  %v264_v54 = vunpack.c.l.bf16 %v318_v41 }
   0xd   :  { %v282_v51 = vpack.c.bf16 %v111_v43, %v110_v42  ;;  %v115_v52 = vmax.f32 %v83_v32, %v99_v45  ;;  %v287_v56 = vpack.c.bf16 %v113_v48, %v112_v44  ;;  %v62_v57 = vmul.f32 %v261_v50, %v354_v1 }
   0xe   :  { %278 = vst [vmem:[%s441_s3] sm:$0xff] %v277_v47   ;;  %v265_v58 = vunpack.c.h.bf16 %v318_v41  ;;  %v268_v59 = vunpack.c.l.bf16 %v319_v46  ;;  %v84_v61 = vadd.f32 %v368_v7, %v61_v53  ;;  %v63_v62 = vmul.f32 %v264_v54, %v354_v1 }
   0xf   :  { %321 = vst [vmem:[%s441_s3 + $0x8] sm:$0xff] %v282_v51   ;;  %v292_v60 = vpack.c.bf16 %v115_v52, %v114_v49  ;;  %v269_v63 = vunpack.c.h.bf16 %v319_v46  ;;  %322 = vst [vmem:[%s441_s3 + $0x10] sm:$0xff] %v287_v56   ;;  %v85_v0 = vadd.f32 %v368_v7, %v62_v57  ;;  %v272_v4 = vunpack.c.l.bf16 %v320_v55 }
  0x10   :  { %v64_v2 = vmul.f32 %v265_v58, %v354_v1  ;;  %v65_v3 = vmul.f32 %v268_v59, %v354_v1  ;;  %v100_v5 = vmul.f32 0.2, %v84_v61  ;;  %v86_v6 = vadd.f32 %v368_v7, %v63_v62 }
  0x11   :  { %323 = vst [vmem:[%s441_s3 + $0x18] sm:$0xff] %v292_v60   ;;  %v66_v8 = vmul.f32 %v269_v63, %v354_v1  ;;  %v273_v9 = vunpack.c.h.bf16 %v320_v55  ;;  %v101_v10 = vmul.f32 0.2, %v85_v0  ;;  %v67_v13 = vmul.f32 %v272_v4, %v354_v1 }
  0x12   :  { %v87_v11 = vadd.f32 %v368_v7, %v64_v2  ;;  %v88_v12 = vadd.f32 %v368_v7, %v65_v3  ;;  %v116_v14 = vmax.f32 %v84_v61, %v100_v5  ;;  %v102_v15 = vmul.f32 0.2, %v86_v6 }
  0x13   :  { %v89_v16 = vadd.f32 %v368_v7, %v66_v8  ;;  %v68_v17 = vmul.f32 %v273_v9, %v354_v1  ;;  %v117_v18 = vmax.f32 %v85_v0, %v101_v10  ;;  %v90_v21 = vadd.f32 %v368_v7, %v67_v13 }
  0x14   :  { %v103_v19 = vmul.f32 0.2, %v87_v11  ;;  %v104_v20 = vmul.f32 0.2, %v88_v12  ;;  %v118_v22 = vmax.f32 %v86_v6, %v102_v15 }
  0x15   :  { %v105_v23 = vmul.f32 0.2, %v89_v16  ;;  %v91_v24 = vadd.f32 %v368_v7, %v68_v17  ;;  %v297_v25 = vpack.c.bf16 %v117_v18, %v116_v14  ;;  %v106_v28 = vmul.f32 0.2, %v90_v21 }
  0x16   :  { %v119_v26 = vmax.f32 %v87_v11, %v103_v19  ;;  %v120_v27 = vmax.f32 %v88_v12, %v104_v20 }
  0x17   :  { %v121_v29 = vmax.f32 %v89_v16, %v105_v23  ;;  %v107_v30 = vmul.f32 0.2, %v91_v24  ;;  %324 = vst [vmem:[%s441_s3 + $0x20] sm:$0xff] %v297_v25   ;;  %v122_v31 = vmax.f32 %v90_v21, %v106_v28 }
  0x18   :  { %v302_v1 = vpack.c.bf16 %v119_v26, %v118_v22 }
  0x19   :  { %v307_v32 = vpack.c.bf16 %v121_v29, %v120_v27  ;;  %v123_v33 = vmax.f32 %v91_v24, %v107_v30 }
  0x1a   :  { %325 = vst [vmem:[%s441_s3 + $0x28] sm:$0xff] %v302_v1  }
  0x1b   :  { %326 = vst [vmem:[%s441_s3 + $0x30] sm:$0xff] %v307_v32   ;;  %v312_v7 = vpack.c.bf16 %v123_v33, %v122_v31 }
  0x1d   :  { %327 = vst [vmem:[%s441_s3 + $0x38] sm:$0xff] %v312_v7  }

// kernel: _lambda_.14
= control target key start
LH: loop header
LB: loop body
LE: loop exit
PB: predicated region body
PF: predicated region fallthrough
CT: control target
= control target key end

     0   :  { %s144_s0 = inlined_call_operand.vmem [shape: bf16[32,128], index: 0, kind: input, shape index: {}]   ;;  %s145_s1 = inlined_call_operand.vmem [shape: f32[1,128], index: 1, kind: input, shape index: {}]   ;;  %s146_s2 = inlined_call_operand.vmem [shape: f32[1,128], index: 2, kind: input, shape index: {}]   ;;  %s147_s3 = inlined_call_operand.vmem [shape: bf16[32,128], index: 3, kind: output, shape index: {}]  }
   0x1   :  { %v87_v0 = vld [vmem:[%s144_s0] sm:$0xff]   ;;  %v104_v4 = vld [vmem:[%s144_s0 + $0x8] sm:$0xff]  }
   0x2   :  { %v76_v1 = vld [vmem:[%s145_s1] ss:$0 sm:$0xff]  ;;  %v88_v2 = vunpack.c.l.bf16 %v87_v0  ;;  %v89_v3 = vunpack.c.h.bf16 %v87_v0  ;;  %v92_v6 = vunpack.c.l.bf16 %v104_v4  ;;  %v93_v7 = vunpack.c.h.bf16 %v104_v4 }
   0x3   :  { %v77_v5 = vld [vmem:[%s146_s2] ss:$0 sm:$0xff] }
   0x4   :  { %v29_v8 = vmul.f32 %v88_v2, %v76_v1  ;;  %v30_v9 = vmul.f32 %v89_v3, %v76_v1  ;;  %v31_v10 = vmul.f32 %v92_v6, %v76_v1  ;;  %v32_v11 = vmul.f32 %v93_v7, %v76_v1 }
   0x6   :  { %v40_v12 = vadd.f32 %v77_v5, %v29_v8  ;;  %v41_v13 = vadd.f32 %v77_v5, %v30_v9  ;;  %v42_v14 = vadd.f32 %v77_v5, %v31_v10  ;;  %v43_v15 = vadd.f32 %v77_v5, %v32_v11 }
   0x8   :  { %v44_v16 = vmul.f32 0.2, %v40_v12  ;;  %v45_v17 = vmul.f32 0.2, %v41_v13  ;;  %v46_v18 = vmul.f32 0.2, %v42_v14 }
   0x9   :  { %v47_v19 = vmul.f32 0.2, %v43_v15 }
   0xa   :  { %v48_v20 = vmax.f32 %v40_v12, %v44_v16  ;;  %v49_v21 = vmax.f32 %v41_v13, %v45_v17  ;;  %v50_v22 = vmax.f32 %v42_v14, %v46_v18 }
   0xb   :  { %v51_v23 = vmax.f32 %v43_v15, %v47_v19 }
   0xc   :  { %v97_v24 = vpack.c.bf16 %v49_v21, %v48_v20 }
   0xd   :  { %v102_v25 = vpack.c.bf16 %v51_v23, %v50_v22 }
   0xe   :  { %98 = vst [vmem:[%s147_s3] sm:$0xff] %v97_v24  }
   0xf   :  { %105 = vst [vmem:[%s147_s3 + $0x8] sm:$0xff] %v102_v25  }

// kernel: _lambda_.13
= control target key start
LH: loop header
LB: loop body
LE: loop exit
PB: predicated region body
PF: predicated region fallthrough
CT: control target
= control target key end

     0   :  { %v670_v40 = vmov 0.0   ;;  %s868_s1 = inlined_call_operand.vmem [shape: bf16[512,128], index: 1, kind: input, shape index: {}]   ;;  %s869_s0 = inlined_call_operand.vmem [shape: bf16[32,512], index: 0, kind: input, shape index: {}]   ;;  %s870_s5 = inlined_call_operand.vmem [shape: f32[1,128], index: 5, kind: output, shape index: {1}]   ;;  %s871_s6 = inlined_call_operand.vmem [shape: f32[1,128], index: 6, kind: output, shape index: {2}]   ;;  %s872_s4 = inlined_call_operand.vmem [shape: bf16[32,128], index: 4, kind: output, shape index: {0}]   ;;  %s873_s2 = inlined_call_operand.vmem [shape: f32[1,128], index: 2, kind: input, shape index: {}]   ;;  %s874_s3 = inlined_call_operand.vmem [shape: f32[1,128], index: 3, kind: input, shape index: {}]  }
   0x1   :  { %v624_v0 = vld [vmem:[%s868_s1 + $0x78] sm:$0xff]   ;;  %v628_v4 = vld [vmem:[%s868_s1 + $0x70] sm:$0xff]   ;;  %v632_v8 = vld [vmem:[%s868_s1 + $0x68] sm:$0xff]   ;;  %25 = vst [vmem:[%s870_s5] sm:$0x1] %v670_v40 }
   0x2   :  { %v625_v1 = vld [vmem:[%s868_s1 + $0xf8] sm:$0xff]   ;;  %567 = vmatprep.subr.bf16.mxu0 %v624_v0  ;;  %v629_v5 = vld [vmem:[%s868_s1 + $0xf0] sm:$0xff]   ;;  %v633_v9 = vld [vmem:[%s868_s1 + $0xe8] sm:$0xff]   ;;  %26 = vst [vmem:[%s871_s6] sm:$0x1] %v670_v40 }
   0x3   :  { %v626_v2 = vld [vmem:[%s868_s1 + $0x38] sm:$0xff]   ;;  %595 = vmatprep.subr.bf16.mxu1 %v625_v1  ;;  %v630_v6 = vld [vmem:[%s868_s1 + $0x30] sm:$0xff]   ;;  %v634_v10 = vld [vmem:[%s868_s1 + $0x28] sm:$0xff]  }
   0x4   :  { %v627_v3 = vld [vmem:[%s868_s1 + $0xb8] sm:$0xff]   ;;  %568 = vmatpush3.bf16.msra.mxu0 %v626_v2  ;;  %v631_v7 = vld [vmem:[%s868_s1 + $0xb0] sm:$0xff]   ;;  %v635_v11 = vld [vmem:[%s868_s1 + $0xa8] sm:$0xff]  }
   0x5   :  { %596 = vmatpush3.bf16.msra.mxu1 %v627_v3  ;;  %569 = vmatprep.subr.bf16.mxu0 %v628_v4  ;;  %v636_v12 = vld [vmem:[%s868_s1 + $0x60] sm:$0xff]   ;;  %v640_v16 = vld [vmem:[%s868_s1 + $0x58] sm:$0xff]   ;;  %v644_v20 = vld [vmem:[%s868_s1 + $0x50] sm:$0xff]  }
   0x6   :  { %597 = vmatprep.subr.bf16.mxu1 %v629_v5  ;;  %v637_v13 = vld [vmem:[%s868_s1 + $0xe0] sm:$0xff]   ;;  %v641_v17 = vld [vmem:[%s868_s1 + $0xd8] sm:$0xff]   ;;  %v645_v21 = vld [vmem:[%s868_s1 + $0xd0] sm:$0xff]  }
   0x7   :  { %v638_v14 = vld [vmem:[%s868_s1 + $0x20] sm:$0xff]   ;;  %v642_v18 = vld [vmem:[%s868_s1 + $0x18] sm:$0xff]   ;;  %v646_v22 = vld [vmem:[%s868_s1 + $0x10] sm:$0xff]  }
   0x8   :  { %570 = vmatpush3.bf16.msra.mxu0 %v630_v6  ;;  %v639_v15 = vld [vmem:[%s868_s1 + $0xa0] sm:$0xff]   ;;  %v643_v19 = vld [vmem:[%s868_s1 + $0x98] sm:$0xff]   ;;  %v647_v23 = vld [vmem:[%s868_s1 + $0x90] sm:$0xff]  }
   0x9   :  { %598 = vmatpush3.bf16.msra.mxu1 %v631_v7  ;;  %571 = vmatprep.subr.bf16.mxu0 %v632_v8  ;;  %v648_v24 = vld [vmem:[%s868_s1 + $0x48] sm:$0xff]   ;;  %v652_v28 = vld [vmem:[%s868_s1 + $0x40] sm:$0xff]  }
   0xa   :  { %599 = vmatprep.subr.bf16.mxu1 %v633_v9  ;;  %v649_v25 = vld [vmem:[%s868_s1 + $0xc8] sm:$0xff]   ;;  %v653_v29 = vld [vmem:[%s868_s1 + $0xc0] sm:$0xff]  }
   0xb   :  { %v650_v26 = vld [vmem:[%s868_s1 + $0x8] sm:$0xff]   ;;  %v654_v30 = vld [vmem:[%s868_s1] sm:$0xff]  }
   0xc   :  { %572 = vmatpush3.bf16.msra.mxu0 %v634_v10  ;;  %v651_v27 = vld [vmem:[%s868_s1 + $0x88] sm:$0xff]   ;;  %v655_v31 = vld [vmem:[%s868_s1 + $0x80] sm:$0xff]  }
   0xd   :  { %600 = vmatpush3.bf16.msra.mxu1 %v635_v11  ;;  %573 = vmatprep.subr.bf16.mxu0 %v636_v12  ;;  %v656_v32 = vld [vmem:[%s869_s0] ss:$16 sps:$4 sm:$0xff]   ;;  %v658_v33 = vld [vmem:[%s869_s0 + $0x4] ss:$16 sps:$4 sm:$0xff]   ;;  %v659_v34 = vld [vmem:[%s869_s0 + $0x8] ss:$16 sps:$4 sm:$0xff]  }
   0xe   :  { %601 = vmatprep.subr.bf16.mxu1 %v637_v13  ;;  %v661_v35 = vld [vmem:[%s869_s0 + $0xc] ss:$16 sps:$4 sm:$0xff]   ;;  %363 = vmatprep.mubr.bf16.mxu0 %v658_v33  ;;  %v662_v36 = vld [vmem:[%s869_s0 + $0x24] ss:$16 sps:$4 sm:$0xff]   ;;  %v666_v38 = vld [vmem:[%s869_s0 + $0x20] ss:$16 sps:$4 sm:$0xff]  }
   0xf   :  { %412 = vmatprep.mubr.bf16.mxu1 %v661_v35  ;;  %v664_v37 = vld [vmem:[%s869_s0 + $0x2c] ss:$16 sps:$4 sm:$0xff]   ;;  %v667_v39 = vld [vmem:[%s869_s0 + $0x28] ss:$16 sps:$4 sm:$0xff]  }
  0x10   :  { %574 = vmatpush3.bf16.msra.mxu0 %v638_v14 }
  0x11   :  { %602 = vmatpush3.bf16.msra.mxu1 %v639_v15  ;;  %575 = vmatprep.subr.bf16.mxu0 %v640_v16 }
  0x12   :  { %603 = vmatprep.subr.bf16.mxu1 %v641_v17 }
  0x14   :  { %576 = vmatpush3.bf16.msra.mxu0 %v642_v18 }
  0x15   :  { %604 = vmatpush3.bf16.msra.mxu1 %v643_v19  ;;  %577 = vmatprep.subr.bf16.mxu0 %v644_v20 }
  0x16   :  { %605 = vmatprep.subr.bf16.mxu1 %v645_v21 }
  0x18   :  { %578 = vmatpush3.bf16.msra.mxu0 %v646_v22 }
  0x19   :  { %606 = vmatpush3.bf16.msra.mxu1 %v647_v23  ;;  %579 = vmatprep.subr.bf16.mxu0 %v648_v24 }
  0x1a   :  { %607 = vmatprep.subr.bf16.mxu1 %v649_v25 }
  0x1c   :  { %580 = vmatpush3.bf16.msra.mxu0 %v650_v26  ;;  %v449_v26 = vld [vmem:[%s870_s5] sm:$0x1] }
  0x1d   :  { %608 = vmatpush3.bf16.msra.mxu1 %v651_v27  ;;  %581 = vmatprep.subr.bf16.mxu0 %v652_v28 }
  0x1e   :  { %609 = vmatprep.subr.bf16.mxu1 %v653_v29  ;;  %v461_v29 = vld [vmem:[%s871_s6] sm:$0x1] }
  0x20   :  { %582 = vmatpush3.bf16.msra.mxu0 %v654_v30 }
  0x21   :  { %610 = vmatpush3.bf16.msra.mxu1 %v655_v31 }
  0x23   :  { %364 = vmatmul.mubr.bf16.vlgmr.msra.gmra.mxu0 %v656_v32 }
  0x24   :  { %413 = vmatmul.mubr.bf16.vlgmr.msra.gmra.mxu1 %v659_v34  ;;  %371 = vmatprep.mubr.bf16.mxu0 %v662_v36 }
  0x25   :  { %420 = vmatprep.mubr.bf16.mxu1 %v664_v37 }
  0x2b   :  { %372 = vmatmul.mubr.bf16.gmra.mxu0 %v666_v38 }
  0x2c   :  { %421 = vmatmul.mubr.bf16.gmra.mxu1 %v667_v39 }
  0xe3   :  { %v583_v41 = vpop.f32.mrf.mxu0 }
  0xe4   :  { %v611_v42 = vpop.f32.mrf.mxu1 }
  0xe5   :  { %v584_v43 = vpop.f32.mrf.mxu0 }
  0xe6   :  { %v612_v44 = vpop.f32.mrf.mxu1  ;;  %v585_v47 = vadd.f32 %v584_v43, %v583_v41  ;;  %v489_v41 = vld [vmem:[%s873_s2] sm:$0x1] }
  0xe7   :  { %v586_v45 = vpop.f32.mrf.mxu0  ;;  %v613_v48 = vadd.f32 %v612_v44, %v611_v42  ;;  %v492_v44 = vld [vmem:[%s874_s3] sm:$0x1] }
  0xe8   :  { %v614_v46 = vpop.f32.mrf.mxu1 }
  0xe9   :  { %v587_v49 = vpop.f32.mrf.mxu0  ;;  %v415_v55 = vadd.f32 %v613_v48, %v585_v47 }
  0xea   :  { %v588_v50 = vadd.f32 %v587_v49, %v586_v45  ;;  %v615_v51 = vpop.f32.mrf.mxu1 }
  0xeb   :  { %v616_v52 = vadd.f32 %v615_v51, %v614_v46  ;;  %v589_v53 = vpop.f32.mrf.mxu0  ;;  %v462_v5 = vmul.f32 %v415_v55, %v415_v55 }
  0xec   :  { %v617_v54 = vpop.f32.mrf.mxu1 }
  0xed   :  { %v418_v56 = vadd.f32 %v616_v52, %v588_v50  ;;  %v590_v57 = vpop.f32.mrf.mxu0 }
  0xee   :  { %v591_v58 = vadd.f32 %v590_v57, %v589_v53  ;;  %v618_v59 = vpop.f32.mrf.mxu1 }
  0xef   :  { %v559_v60 = vpack.c.bf16 %v418_v56, %v415_v55  ;;  %v619_v61 = vadd.f32 %v618_v59, %v617_v54  ;;  %v592_v62 = vpop.f32.mrf.mxu0  ;;  %v463_v0 = vmul.f32 %v418_v56, %v418_v56  ;;  %v450_v6 = vadd.f32 %v418_v56, %v415_v55 }
  0xf0   :  { %v620_v63 = vpop.f32.mrf.mxu1 }
  0xf1   :  { %560 = vst [vmem:[%s872_s4] sm:$0xff] %v559_v60   ;;  %v423_v1 = vadd.f32 %v619_v61, %v591_v58  ;;  %v593_v2 = vpop.f32.mrf.mxu0  ;;  %v466_v9 = vadd.f32 %v463_v0, %v462_v5 }
  0xf2   :  { %v594_v3 = vadd.f32 %v593_v2, %v592_v62  ;;  %v621_v4 = vpop.f32.mrf.mxu1 }
  0xf3   :  { %v464_v7 = vmul.f32 %v423_v1, %v423_v1  ;;  %v622_v8 = vadd.f32 %v621_v4, %v620_v63  ;;  %v451_v10 = vadd.f32 %v450_v6, %v423_v1 }
  0xf5   :  { %v426_v11 = vadd.f32 %v622_v8, %v594_v3  ;;  %v467_v12 = vadd.f32 %v466_v9, %v464_v7 }
  0xf7   :  { %v564_v13 = vpack.c.bf16 %v426_v11, %v423_v1  ;;  %v452_v14 = vadd.f32 %v451_v10, %v426_v11  ;;  %v465_v15 = vmul.f32 %v426_v11, %v426_v11 }
  0xf9   :  { %566 = vst [vmem:[%s872_s4 + $0x8] sm:$0xff] %v564_v13   ;;  %v453_v16 = vrot.slane %v452_v14, 4  ;;  %v468_v17 = vadd.f32 %v467_v12, %v465_v15 }
  0xfb   :  { %v454_v18 = vadd.f32 %v453_v16, %v452_v14  ;;  %v469_v19 = vrot.slane %v468_v17, 4 }
  0xfd   :  { %v455_v20 = vrot.slane %v454_v18, 2  ;;  %v470_v21 = vadd.f32 %v469_v19, %v468_v17 }
  0xff   :  { %v456_v22 = vadd.f32 %v455_v20, %v454_v18  ;;  %v471_v23 = vrot.slane %v470_v21, 2 }
 0x101   :  { %v457_v24 = vrot.slane %v456_v22, 1  ;;  %v472_v25 = vadd.f32 %v471_v23, %v470_v21 }
 0x103   :  { %v458_v27 = vadd.f32 %v457_v24, %v456_v22  ;;  %v473_v28 = vrot.slane %v472_v25, 1 }
 0x105   :  { %v459_v30 = vadd.f32 %v458_v27, %v449_v26  ;;  %v474_v31 = vadd.f32 %v473_v28, %v472_v25 }
 0x107   :  { %460 = vst [vmem:[%s870_s5] sm:$0x1] %v459_v30  ;;  %v475_v32 = vadd.f32 %v474_v31, %v461_v29 }
 0x109   :  { %476 = vst [vmem:[%s871_s6] sm:$0x1] %v475_v32 }
 0x10e   :  { %v480_v33 = vld [vmem:[%s870_s5] sm:$0x1] }
 0x10f   :  { %v481_v34 = vmul.f32 0.03125, %v480_v33 }
 0x110   :  { %v482_v35 = vld [vmem:[%s871_s6] sm:$0x1] }
 0x111   :  { %v483_v36 = vmul.f32 0.03125, %v482_v35  ;;  %v484_v37 = vmul.f32 %v481_v34, %v481_v34 }
 0x113   :  { %v485_v38 = vsub.f32 %v483_v36, %v484_v37 }
 0x115   :  { %v486_v39 = vmax.f32 %v485_v38, 0.0 }
 0x117   :  { %v487_v40 = vadd.f32 1e-05, %v486_v39 }
 0x119   :  { %668 = vrsqrt.f32 %v487_v40 }
 0x126   :  { %v669_v42 = vpop.eup %668 }
 0x127   :  { %v490_v43 = vmul.f32 %v669_v42, %v489_v41 }
 0x129   :  { %491 = vst [vmem:[%s870_s5] sm:$0x1] %v490_v43  ;;  %v493_v45 = vmul.f32 %v490_v43, %v481_v34 }
 0x12b   :  { %v494_v46 = vsub.f32 %v492_v44, %v493_v45 }
 0x12d   :  { %495 = vst [vmem:[%s871_s6] sm:$0x1] %v494_v46 }

// kernel: _lambda_.15
= control target key start
LH: loop header
LB: loop body
LE: loop exit
PB: predicated region body
PF: predicated region fallthrough
CT: control target
= control target key end

     0   :  { %s1242_s1 = inlined_call_operand.vmem [shape: bf16[1024,128], index: 1, kind: input, shape index: {}]   ;;  %s1243_s0 = inlined_call_operand.vmem [shape: bf16[16,1024], index: 0, kind: input, shape index: {}]   ;;  %s1244_s2 = inlined_call_operand.vmem [shape: f32[1,128], index: 2, kind: input, shape index: {}]   ;;  %s1245_s3 = inlined_call_operand.vmem [shape: f32[16,128], index: 3, kind: output, shape index: {}]  }
   0x1   :  { %v925_v0 = vld [vmem:[%s1242_s1 + $0x78] sm:$0xff]   ;;  %v929_v4 = vld [vmem:[%s1242_s1 + $0x70] sm:$0xff]   ;;  %v933_v8 = vld [vmem:[%s1242_s1 + $0x68] sm:$0xff]  }
   0x2   :  { %v926_v1 = vld [vmem:[%s1242_s1 + $0xf8] sm:$0xff]   ;;  %837 = vmatprep.subr.bf16.mxu0 %v925_v0  ;;  %v930_v5 = vld [vmem:[%s1242_s1 + $0xf0] sm:$0xff]   ;;  %v934_v9 = vld [vmem:[%s1242_s1 + $0xe8] sm:$0xff]  }
   0x3   :  { %v927_v2 = vld [vmem:[%s1242_s1 + $0x38] sm:$0xff]   ;;  %859 = vmatprep.subr.bf16.mxu1 %v926_v1  ;;  %v931_v6 = vld [vmem:[%s1242_s1 + $0x30] sm:$0xff]   ;;  %v935_v10 = vld [vmem:[%s1242_s1 + $0x28] sm:$0xff]  }
   0x4   :  { %v928_v3 = vld [vmem:[%s1242_s1 + $0xb8] sm:$0xff]   ;;  %838 = vmatpush3.bf16.msra.mxu0 %v927_v2  ;;  %v932_v7 = vld [vmem:[%s1242_s1 + $0xb0] sm:$0xff]   ;;  %v936_v11 = vld [vmem:[%s1242_s1 + $0xa8] sm:$0xff]  }
   0x5   :  { %860 = vmatpush3.bf16.msra.mxu1 %v928_v3  ;;  %839 = vmatprep.subr.bf16.mxu0 %v929_v4  ;;  %v937_v12 = vld [vmem:[%s1242_s1 + $0x60] sm:$0xff]   ;;  %v941_v16 = vld [vmem:[%s1242_s1 + $0x58] sm:$0xff]   ;;  %v945_v20 = vld [vmem:[%s1242_s1 + $0x50] sm:$0xff]  }
   0x6   :  { %861 = vmatprep.subr.bf16.mxu1 %v930_v5  ;;  %v938_v13 = vld [vmem:[%s1242_s1 + $0xe0] sm:$0xff]   ;;  %v942_v17 = vld [vmem:[%s1242_s1 + $0xd8] sm:$0xff]   ;;  %v946_v21 = vld [vmem:[%s1242_s1 + $0xd0] sm:$0xff]  }
   0x7   :  { %v939_v14 = vld [vmem:[%s1242_s1 + $0x20] sm:$0xff]   ;;  %v943_v18 = vld [vmem:[%s1242_s1 + $0x18] sm:$0xff]   ;;  %v947_v22 = vld [vmem:[%s1242_s1 + $0x10] sm:$0xff]  }
   0x8   :  { %840 = vmatpush3.bf16.msra.mxu0 %v931_v6  ;;  %v940_v15 = vld [vmem:[%s1242_s1 + $0xa0] sm:$0xff]   ;;  %v944_v19 = vld [vmem:[%s1242_s1 + $0x98] sm:$0xff]   ;;  %v948_v23 = vld [vmem:[%s1242_s1 + $0x90] sm:$0xff]  }
   0x9   :  { %862 = vmatpush3.bf16.msra.mxu1 %v932_v7  ;;  %841 = vmatprep.subr.bf16.mxu0 %v933_v8  ;;  %v949_v24 = vld [vmem:[%s1242_s1 + $0x48] sm:$0xff]   ;;  %v953_v28 = vld [vmem:[%s1242_s1 + $0x40] sm:$0xff]   ;;  %v957_v40 = vld [vmem:[%s1242_s1 + $0x178] sm:$0xff]  }
   0xa   :  { %863 = vmatprep.subr.bf16.mxu1 %v934_v9  ;;  %v950_v25 = vld [vmem:[%s1242_s1 + $0xc8] sm:$0xff]   ;;  %v954_v29 = vld [vmem:[%s1242_s1 + $0xc0] sm:$0xff]   ;;  %v958_v41 = vld [vmem:[%s1242_s1 + $0x1f8] sm:$0xff]  }
   0xb   :  { %v951_v26 = vld [vmem:[%s1242_s1 + $0x8] sm:$0xff]   ;;  %v955_v30 = vld [vmem:[%s1242_s1] sm:$0xff]   ;;  %v959_v42 = vld [vmem:[%s1242_s1 + $0x138] sm:$0xff]  }
   0xc   :  { %842 = vmatpush3.bf16.msra.mxu0 %v935_v10  ;;  %v952_v27 = vld [vmem:[%s1242_s1 + $0x88] sm:$0xff]   ;;  %v956_v31 = vld [vmem:[%s1242_s1 + $0x80] sm:$0xff]   ;;  %v960_v43 = vld [vmem:[%s1242_s1 + $0x1b8] sm:$0xff]  }
   0xd   :  { %864 = vmatpush3.bf16.msra.mxu1 %v936_v11  ;;  %843 = vmatprep.subr.bf16.mxu0 %v937_v12  ;;  %v15_v32 = vld [vmem:[%s1243_s0] sm:$0xff]  ;;  %v16_v34 = vld [vmem:[%s1243_s0 + $0x8] sm:$0xff]  ;;  %v961_v44 = vld [vmem:[%s1242_s1 + $0x170] sm:$0xff]  }
   0xe   :  { %865 = vmatprep.subr.bf16.mxu1 %v938_v13  ;;  %v19_v33 = vld [vmem:[%s1243_s0 + $0x20] sm:$0xff]  ;;  %v20_v37 = vld [vmem:[%s1243_s0 + $0x28] sm:$0xff]  ;;  %v962_v45 = vld [vmem:[%s1242_s1 + $0x1f0] sm:$0xff]  }
   0xf   :  { %v765_v35 = vcombine.low %v15_v32, %v19_v33  ;;  %v766_v36 = vcombine.high %v15_v32, %v19_v33  ;;  %v767_v38 = vcombine.low %v16_v34, %v20_v37  ;;  %v768_v39 = vcombine.high %v16_v34, %v20_v37  ;;  %v963_v46 = vld [vmem:[%s1242_s1 + $0x130] sm:$0xff]   ;;  %v965_v48 = vld [vmem:[%s1242_s1 + $0x168] sm:$0xff]   ;;  %v969_v52 = vld [vmem:[%s1242_s1 + $0x160] sm:$0xff]  }
  0x10   :  { %844 = vmatpush3.bf16.msra.mxu0 %v939_v14  ;;  %v964_v47 = vld [vmem:[%s1242_s1 + $0x1b0] sm:$0xff]   ;;  %v966_v49 = vld [vmem:[%s1242_s1 + $0x1e8] sm:$0xff]   ;;  %v970_v53 = vld [vmem:[%s1242_s1 + $0x1e0] sm:$0xff]  }
  0x11   :  { %866 = vmatpush3.bf16.msra.mxu1 %v940_v15  ;;  %845 = vmatprep.subr.bf16.mxu0 %v941_v16  ;;  %v967_v50 = vld [vmem:[%s1242_s1 + $0x128] sm:$0xff]   ;;  %v971_v54 = vld [vmem:[%s1242_s1 + $0x120] sm:$0xff]   ;;  %v973_v56 = vld [vmem:[%s1242_s1 + $0x158] sm:$0xff]  }
  0x12   :  { %867 = vmatprep.subr.bf16.mxu1 %v942_v17  ;;  %614 = vmatprep.mubr.bf16.mxu0 %v766_v36  ;;  %v968_v51 = vld [vmem:[%s1242_s1 + $0x1a8] sm:$0xff]   ;;  %v972_v55 = vld [vmem:[%s1242_s1 + $0x1a0] sm:$0xff]   ;;  %v974_v57 = vld [vmem:[%s1242_s1 + $0x1d8] sm:$0xff]  }
  0x13   :  { %655 = vmatprep.mubr.bf16.mxu1 %v768_v39  ;;  %v975_v58 = vld [vmem:[%s1242_s1 + $0x118] sm:$0xff]   ;;  %v977_v60 = vld [vmem:[%s1242_s1 + $0x150] sm:$0xff]   ;;  %v981_v0 = vld [vmem:[%s1242_s1 + $0x148] sm:$0xff]  }
  0x14   :  { %846 = vmatpush3.bf16.msra.mxu0 %v943_v18  ;;  %v976_v59 = vld [vmem:[%s1242_s1 + $0x198] sm:$0xff]   ;;  %v978_v61 = vld [vmem:[%s1242_s1 + $0x1d0] sm:$0xff]   ;;  %v982_v1 = vld [vmem:[%s1242_s1 + $0x1c8] sm:$0xff]  }
  0x15   :  { %868 = vmatpush3.bf16.msra.mxu1 %v944_v19  ;;  %847 = vmatprep.subr.bf16.mxu0 %v945_v20  ;;  %v979_v62 = vld [vmem:[%s1242_s1 + $0x110] sm:$0xff]   ;;  %v983_v2 = vld [vmem:[%s1242_s1 + $0x108] sm:$0xff]   ;;  %v985_v4 = vld [vmem:[%s1242_s1 + $0x140] sm:$0xff]  }
  0x16   :  { %869 = vmatprep.subr.bf16.mxu1 %v946_v21  ;;  %v980_v63 = vld [vmem:[%s1242_s1 + $0x190] sm:$0xff]   ;;  %v984_v3 = vld [vmem:[%s1242_s1 + $0x188] sm:$0xff]   ;;  %v986_v5 = vld [vmem:[%s1242_s1 + $0x1c0] sm:$0xff]  }
  0x17   :  { %v987_v6 = vld [vmem:[%s1242_s1 + $0x100] sm:$0xff]   ;;  %v17_v8 = vld [vmem:[%s1243_s0 + $0x10] sm:$0xff]  ;;  %v18_v12 = vld [vmem:[%s1243_s0 + $0x18] sm:$0xff] }
  0x18   :  { %848 = vmatpush3.bf16.msra.mxu0 %v947_v22  ;;  %v988_v7 = vld [vmem:[%s1242_s1 + $0x180] sm:$0xff]   ;;  %v21_v9 = vld [vmem:[%s1243_s0 + $0x30] sm:$0xff]  ;;  %v22_v13 = vld [vmem:[%s1243_s0 + $0x38] sm:$0xff] }
  0x19   :  { %870 = vmatpush3.bf16.msra.mxu1 %v948_v23  ;;  %849 = vmatprep.subr.bf16.mxu0 %v949_v24  ;;  %v769_v10 = vcombine.low %v17_v8, %v21_v9  ;;  %v770_v11 = vcombine.high %v17_v8, %v21_v9  ;;  %v771_v14 = vcombine.low %v18_v12, %v22_v13  ;;  %v764_v23 = vld [vmem:[%s1244_s2] ss:$0 sm:$0xff] }
  0x1a   :  { %871 = vmatprep.subr.bf16.mxu1 %v950_v25  ;;  %v772_v15 = vcombine.high %v18_v12, %v22_v13 }
  0x1c   :  { %850 = vmatpush3.bf16.msra.mxu0 %v951_v26 }
  0x1d   :  { %872 = vmatpush3.bf16.msra.mxu1 %v952_v27  ;;  %851 = vmatprep.subr.bf16.mxu0 %v953_v28 }
  0x1e   :  { %873 = vmatprep.subr.bf16.mxu1 %v954_v29 }
  0x20   :  { %852 = vmatpush3.bf16.msra.mxu0 %v955_v30 }
  0x21   :  { %874 = vmatpush3.bf16.msra.mxu1 %v956_v31  ;;  %881 = vmatprep.subr.bf16.mxu0 %v957_v40 }
  0x22   :  { %903 = vmatprep.subr.bf16.mxu1 %v958_v41 }
  0x23   :  { %615 = vmatmul.mubr.bf16.vlgmr.msra.gmra.mxu0 %v765_v35 }
  0x24   :  { %656 = vmatmul.mubr.bf16.vlgmr.msra.gmra.mxu1 %v767_v38  ;;  %882 = vmatpush3.bf16.msra.mxu0 %v959_v42 }
  0x25   :  { %904 = vmatpush3.bf16.msra.mxu1 %v960_v43  ;;  %883 = vmatprep.subr.bf16.mxu0 %v961_v44 }
  0x26   :  { %905 = vmatprep.subr.bf16.mxu1 %v962_v45  ;;  %696 = vmatprep.mubr.bf16.mxu0 %v770_v11 }
  0x27   :  { %737 = vmatprep.mubr.bf16.mxu1 %v772_v15 }
  0x28   :  { %884 = vmatpush3.bf16.msra.mxu0 %v963_v46 }
  0x29   :  { %906 = vmatpush3.bf16.msra.mxu1 %v964_v47  ;;  %885 = vmatprep.subr.bf16.mxu0 %v965_v48 }
  0x2a   :  { %907 = vmatprep.subr.bf16.mxu1 %v966_v49 }
  0x2c   :  { %886 = vmatpush3.bf16.msra.mxu0 %v967_v50 }
  0x2d   :  { %908 = vmatpush3.bf16.msra.mxu1 %v968_v51  ;;  %887 = vmatprep.subr.bf16.mxu0 %v969_v52 }
  0x2e   :  { %909 = vmatprep.subr.bf16.mxu1 %v970_v53 }
  0x30   :  { %888 = vmatpush3.bf16.msra.mxu0 %v971_v54 }
  0x31   :  { %910 = vmatpush3.bf16.msra.mxu1 %v972_v55  ;;  %889 = vmatprep.subr.bf16.mxu0 %v973_v56 }
  0x32   :  { %911 = vmatprep.subr.bf16.mxu1 %v974_v57 }
  0x34   :  { %890 = vmatpush3.bf16.msra.mxu0 %v975_v58 }
  0x35   :  { %912 = vmatpush3.bf16.msra.mxu1 %v976_v59  ;;  %891 = vmatprep.subr.bf16.mxu0 %v977_v60 }
  0x36   :  { %913 = vmatprep.subr.bf16.mxu1 %v978_v61 }
  0x38   :  { %892 = vmatpush3.bf16.msra.mxu0 %v979_v62 }
  0x39   :  { %914 = vmatpush3.bf16.msra.mxu1 %v980_v63  ;;  %893 = vmatprep.subr.bf16.mxu0 %v981_v0 }
  0x3a   :  { %915 = vmatprep.subr.bf16.mxu1 %v982_v1 }
  0x3c   :  { %894 = vmatpush3.bf16.msra.mxu0 %v983_v2 }
  0x3d   :  { %916 = vmatpush3.bf16.msra.mxu1 %v984_v3  ;;  %895 = vmatprep.subr.bf16.mxu0 %v985_v4 }
  0x3e   :  { %917 = vmatprep.subr.bf16.mxu1 %v986_v5 }
  0x40   :  { %896 = vmatpush3.bf16.msra.mxu0 %v987_v6 }
  0x41   :  { %918 = vmatpush3.bf16.msra.mxu1 %v988_v7 }
  0x43   :  { %697 = vmatmul.mubr.bf16.vlgmr.msra.gmra.mxu0 %v769_v10 }
  0x44   :  { %738 = vmatmul.mubr.bf16.vlgmr.msra.gmra.mxu1 %v771_v14 }
  0xe3   :  { %v853_v16 = vpop.f32.mrf.mxu0 }
  0xe4   :  { %v875_v17 = vpop.f32.mrf.mxu1 }
  0xe5   :  { %v854_v18 = vpop.f32.mrf.mxu0 }
  0xe6   :  { %v876_v19 = vpop.f32.mrf.mxu1  ;;  %v855_v21 = vadd.f32 %v854_v18, %v853_v16 }
  0xe7   :  { %v856_v20 = vpop.f32.mrf.mxu0  ;;  %v877_v26 = vadd.f32 %v876_v19, %v875_v17 }
  0xe8   :  { %v878_v22 = vpop.f32.mrf.mxu1  ;;  %v617_v25 = vadd.f32 %v855_v21, %v764_v23 }
  0xe9   :  { %v857_v24 = vpop.f32.mrf.mxu0 }
  0xea   :  { %v858_v27 = vadd.f32 %v857_v24, %v856_v20  ;;  %v879_v28 = vpop.f32.mrf.mxu1  ;;  %v658_v32 = vadd.f32 %v877_v26, %v617_v25 }
  0xeb   :  { %v880_v37 = vadd.f32 %v879_v28, %v878_v22 }
  0xec   :  { %v620_v33 = vadd.f32 %v858_v27, %v764_v23 }
  0xee   :  { %v661_v42 = vadd.f32 %v880_v37, %v620_v33 }
 0x103   :  { %v897_v29 = vpop.f32.mrf.mxu0 }
 0x104   :  { %v919_v30 = vpop.f32.mrf.mxu1 }
 0x105   :  { %v898_v31 = vpop.f32.mrf.mxu0 }
 0x106   :  { %v899_v34 = vadd.f32 %v898_v31, %v897_v29  ;;  %v920_v35 = vpop.f32.mrf.mxu1 }
 0x107   :  { %v900_v36 = vpop.f32.mrf.mxu0  ;;  %v921_v39 = vadd.f32 %v920_v35, %v919_v30 }
 0x108   :  { %v699_v38 = vadd.f32 %v899_v34, %v658_v32  ;;  %v922_v40 = vpop.f32.mrf.mxu1 }
 0x109   :  { %v901_v41 = vpop.f32.mrf.mxu0 }
 0x10a   :  { %v740_v43 = vadd.f32 %v921_v39, %v699_v38  ;;  %v902_v44 = vadd.f32 %v901_v41, %v900_v36  ;;  %v923_v45 = vpop.f32.mrf.mxu1 }
 0x10b   :  { %v924_v48 = vadd.f32 %v923_v45, %v922_v40 }
 0x10c   :  { %v746_v46 = vsub.f32 0.0, %v740_v43  ;;  %v702_v47 = vadd.f32 %v902_v44, %v661_v42 }
 0x10e   :  { %v748_v49 = vmul.f32 1.442695, %v746_v46  ;;  %v743_v50 = vadd.f32 %v924_v48, %v702_v47 }
 0x110   :  { %989 = vpow2.f32 %v748_v49  ;;  %v747_v51 = vsub.f32 0.0, %v743_v50 }
 0x112   :  { %v750_v52 = vmul.f32 1.442695, %v747_v51 }
 0x114   :  { %991 = vpow2.f32 %v750_v52 }
 0x11d   :  { %v990_v53 = vpop.eup %989 }
 0x11e   :  { %v752_v54 = vadd.f32 1.0, %v990_v53 }
 0x120   :  { %993 = vrcp.f32 %v752_v54 }
 0x121   :  { %v992_v55 = vpop.eup %991 }
 0x122   :  { %v753_v56 = vadd.f32 1.0, %v992_v55 }
 0x124   :  { %995 = vrcp.f32 %v753_v56 }
 0x12d   :  { %v994_v57 = vpop.eup %993 }
 0x12e   :  { %758 = vst [vmem:[%s1245_s3] sm:$0xff] %v994_v57 }
 0x131   :  { %v996_v58 = vpop.eup %995 }
 0x132   :  { %759 = vst [vmem:[%s1245_s3 + $0x8] sm:$0xff] %v996_v58 }

</bundles_post_ra>
